<compile_context>
chip_gen: v5e
topology: v5e:2x2
jax: 0.10.0
libtpu: 0.0.40
codegen_flags: <defaults>
</compile_context>

<pallas_src>
import jax
import jax.numpy as jnp
from jax.experimental import pallas as pl

# ----------------------------- model config -----------------------------
B = 2          # batch
S_DEC = 8      # decoder sequence length
S_ENC = 8      # encoder sequence length
D_MODEL = 32   # d_model
N_HEADS = 4    # num heads
D_KV = 8       # per-head dim
INNER = N_HEADS * D_KV          # 32
D_FF = 64      # feed-forward dim
VOCAB = 128    # vocab size for lm_head (lane-dense output)
NUM_BLOCKS = 2 # num_decoder_layers - split_point_2 (split_point_2 > 0 => no rel. attn bias)
EPS = 1e-6     # T5 layer_norm_epsilon

R_DEC = B * S_DEC               # 16 batch-folded decoder rows
R_ENC = B * S_ENC               # 16 batch-folded encoder rows
LANES = 128                     # lane width of the packed parameter slab

# ---- packed-slab row layout (all offsets are multiples of 8 sublanes) ----
BLOCK_ROWS = 160                # per decoder block: 32 (SA) + 32 (CA) + 32 (wi) + 64 (wo)
SA_OFF = 0
CA_OFF = 32
WI_OFF = 64
WO_OFF = 96
LM_OFF = NUM_BLOCKS * BLOCK_ROWS            # 320, rows 320:352 = lm_head (32,128)
LN_OFF = LM_OFF + D_MODEL                   # 352, rows 352:360 = all RMSNorm weights
MASK_OFF = LN_OFF + 8                       # 360, rows 360:376 = block-diag batch mask
TOTAL_ROWS = MASK_OFF + R_DEC               # 376

# TODO(synk): relative attention position bias is omitted because split_point_2 > 0
# in this configuration (has_relative_attention_bias=False and mask=None => bias is 0).


# ----------------------------- fused Pallas kernel -----------------------------
def fused_decoder_kernel(acts_ref, w_ref, out_ref):
    """Whole T5DecoderTopMocker forward in one kernel, everything resident in VMEM.

    acts_ref: (R_DEC + R_ENC, D_MODEL)  rows 0:16 decoder stream, 16:32 encoder states
    w_ref:    (TOTAL_ROWS, 128)         packed parameter slab
    out_ref:  (R_DEC, VOCAB)            lane-dense logits
    """
    h = acts_ref[0:R_DEC, :]                        # (16, 32) batch folded into sublanes
    enc = acts_ref[R_DEC:R_DEC + R_ENC, :]          # (16, 32)

    ln_tile = w_ref[LN_OFF:LN_OFF + 8, :]           # (8, 128): all RMSNorm weights
    batch_mask = w_ref[MASK_OFF:MASK_OFF + R_DEC, 0:R_ENC]  # (16, 16): 0 same-batch, -1e30 cross

    def rmsnorm(x, ln_row):
        # T5LayerNorm: RMS norm in f32, no mean subtraction, no bias.
        w = ln_tile[ln_row:ln_row + 1, 0:D_MODEL]   # (1, 32)
        var = jnp.mean(x * x, axis=-1, keepdims=True)
        return x * jax.lax.rsqrt(var + EPS) * w

    def attention(q_src, kv_src, tile, shared_kv):
        """T5 multi-head attention over the batch-folded (16, 32) streams.

        tile: (32, 128) = [wq | wk | wv | wo] lane-packed.
        One fused QKV(+wo, padding lanes are free) projection per stream, per-head
        score/context matmuls on lane-sliced views (no broadcasts), block-diagonal
        mask keeps the two batch elements independent, single output projection.
        """
        q_proj = jnp.dot(q_src, tile, preferred_element_type=jnp.float32)   # (16, 128)
        if shared_kv:
            kv_proj = q_proj
        else:
            kv_proj = jnp.dot(kv_src, tile, preferred_element_type=jnp.float32)

        q = q_proj[:, 0:INNER]                        # (16, 32)
        k = kv_proj[:, INNER:2 * INNER]               # (16, 32)
        v = kv_proj[:, 2 * INNER:3 * INNER]           # (16, 32)
        wo = tile[:, 3 * INNER:3 * INNER + D_MODEL]   # (32, 32)

        ctx_heads = []
        for hh in range(N_HEADS):                     # static unroll over 4 heads
            lo = hh * D_KV
            q_h = q[:, lo:lo + D_KV]                  # (16, 8)
            k_h = k[:, lo:lo + D_KV]
            v_h = v[:, lo:lo + D_KV]
            # T5 does NOT scale scores by 1/sqrt(d_kv); position bias is zero here.
            s = jax.lax.dot_general(q_h, k_h, (((1,), (1,)), ((), ())),
                                    preferred_element_type=jnp.float32)     # (16, 16)
            s = s + batch_mask                        # isolate batch elements
            s = s - jnp.max(s, axis=-1, keepdims=True)
            p = jnp.exp(s)
            p = p * pl.reciprocal(jnp.sum(p, axis=-1, keepdims=True), approx=True)
            ctx_heads.append(jnp.dot(p, v_h, preferred_element_type=jnp.float32))
        ctx = jnp.concatenate(ctx_heads, axis=-1)     # (16, 32) = (B*S, INNER)
        return jnp.dot(ctx, wo, preferred_element_type=jnp.float32)         # (16, 32)

    for blk in range(NUM_BLOCKS):                     # static unroll over decoder blocks
        base = blk * BLOCK_ROWS
        sa_tile = w_ref[base + SA_OFF:base + SA_OFF + D_MODEL, :]    # (32, 128)
        ca_tile = w_ref[base + CA_OFF:base + CA_OFF + D_MODEL, :]    # (32, 128)
        ff_wi = w_ref[base + WI_OFF:base + WI_OFF + D_MODEL, 0:D_FF]     # (32, 64)
        ff_wo = w_ref[base + WO_OFF:base + WO_OFF + D_FF, 0:D_MODEL]     # (64, 32)

        # --- self-attention: q, k, v all from the RMS-normed stream ---
        y = rmsnorm(h, 3 * blk + 0)
        h = h + attention(y, y, sa_tile, shared_kv=True)

        # --- cross-attention: k, v from raw encoder hidden states ---
        y = rmsnorm(h, 3 * blk + 1)
        h = h + attention(y, enc, ca_tile, shared_kv=False)

        # --- feed-forward (T5DenseActDense, relu) ---
        y = rmsnorm(h, 3 * blk + 2)
        z = jnp.maximum(jnp.dot(y, ff_wi, preferred_element_type=jnp.float32), 0.0)
        h = h + jnp.dot(z, ff_wo, preferred_element_type=jnp.float32)

    # --- final RMSNorm + lm_head: one (16,32)@(32,128) push, lane-dense store ---
    hn = rmsnorm(h, 3 * NUM_BLOCKS)
    lm_w = w_ref[LM_OFF:LM_OFF + D_MODEL, :]          # (32, 128)
    out_ref[...] = jnp.dot(hn, lm_w, preferred_element_type=jnp.float32)


# ----------------------------- parameter init -----------------------------
def init_params(key):
    """Deterministic synthetic parameters (shapes match T5Block / T5LayerNorm / lm_head)."""
    params = {"blocks": []}
    scale = 0.05
    for _ in range(NUM_BLOCKS):
        key, *ks = jax.random.split(key, 14)
        blk = {
            # self-attention sub-layer
            "sa_ln": jnp.ones((1, D_MODEL), jnp.float32),
            "sa_wq": scale * jax.random.normal(ks[0], (D_MODEL, INNER), jnp.float32),
            "sa_wk": scale * jax.random.normal(ks[1], (D_MODEL, INNER), jnp.float32),
            "sa_wv": scale * jax.random.normal(ks[2], (D_MODEL, INNER), jnp.float32),
            "sa_wo": scale * jax.random.normal(ks[3], (INNER, D_MODEL), jnp.float32),
            # cross-attention sub-layer
            "ca_ln": jnp.ones((1, D_MODEL), jnp.float32),
            "ca_wq": scale * jax.random.normal(ks[4], (D_MODEL, INNER), jnp.float32),
            "ca_wk": scale * jax.random.normal(ks[5], (D_MODEL, INNER), jnp.float32),
            "ca_wv": scale * jax.random.normal(ks[6], (D_MODEL, INNER), jnp.float32),
            "ca_wo": scale * jax.random.normal(ks[7], (INNER, D_MODEL), jnp.float32),
            # feed-forward sub-layer
            "ff_ln": jnp.ones((1, D_MODEL), jnp.float32),
            "ff_wi": scale * jax.random.normal(ks[8], (D_MODEL, D_FF), jnp.float32),
            "ff_wo": scale * jax.random.normal(ks[9], (D_FF, D_MODEL), jnp.float32),
        }
        params["blocks"].append(blk)
    key, k1 = jax.random.split(key)
    params["final_ln"] = jnp.ones((1, D_MODEL), jnp.float32)
    params["lm_head"] = scale * jax.random.normal(k1, (D_MODEL, VOCAB), jnp.float32)
    return params


# ----------------------------- parameter packing (wrapper side) -----------------------------
def _lane_pad(a):
    return jnp.pad(a, ((0, 0), (0, LANES - a.shape[1])))


def pack_params(params):
    """Pack every parameter into one lane-dense (TOTAL_ROWS, 128) f32 slab (single DMA)."""
    pieces = []
    for blk in params["blocks"]:
        pieces.append(jnp.concatenate(
            [blk["sa_wq"], blk["sa_wk"], blk["sa_wv"], blk["sa_wo"]], axis=1))   # (32, 128)
        pieces.append(jnp.concatenate(
            [blk["ca_wq"], blk["ca_wk"], blk["ca_wv"], blk["ca_wo"]], axis=1))   # (32, 128)
        pieces.append(_lane_pad(blk["ff_wi"]))                                   # (32, 128)
        pieces.append(_lane_pad(blk["ff_wo"]))                                   # (64, 128)
    pieces.append(_lane_pad(params["lm_head"]))                                  # (32, 128)

    ln_rows = []
    for blk in params["blocks"]:
        ln_rows += [blk["sa_ln"], blk["ca_ln"], blk["ff_ln"]]
    ln_rows.append(params["final_ln"])
    ln_rows.append(jnp.zeros((1, D_MODEL), jnp.float32))          # pad to 8 rows
    pieces.append(_lane_pad(jnp.concatenate(ln_rows, axis=0)))                   # (8, 128)

    # Block-diagonal additive mask: 0 where query row and kv row belong to the
    # same batch element, -1e30 otherwise (exp underflows to exactly 0).
    rb = jnp.arange(R_DEC)[:, None] // S_DEC
    cb = jnp.arange(R_ENC)[None, :] // S_ENC
    mask = jnp.where(rb == cb, 0.0, -1e30).astype(jnp.float32)                   # (16, 16)
    pieces.append(_lane_pad(mask))                                               # (16, 128)

    slab = jnp.concatenate(pieces, axis=0)
    assert slab.shape == (TOTAL_ROWS, LANES), slab.shape
    return slab


# ----------------------------- wrapper -----------------------------
@jax.jit
def t5_decoder_top_mocker_forward(params, x, encoder_inter):
    """x: (B, S_dec, D), encoder_inter: (B, S_enc, D) -> logits (B, S_dec, VOCAB)."""
    # Fold batch into the sublane axis and pack both streams into one operand.
    acts = jnp.concatenate(
        [x.reshape(B * S_DEC, D_MODEL),
         encoder_inter.reshape(B * S_ENC, D_MODEL)], axis=0)      # (32, 32)
    slab = pack_params(params)                                    # (376, 128)

    # Single pallas_call, no grid: whole working set (<256 KiB) is one VMEM block
    # per operand -> 2 input DMAs, 1 lane-dense output DMA.
    logits = pl.pallas_call(
        fused_decoder_kernel,
        out_shape=jax.ShapeDtypeStruct((R_DEC, VOCAB), jnp.float32),
    )(acts, slab)
    return logits.reshape(B, S_DEC, VOCAB)


if __name__ == "__main__":
    key = jax.random.PRNGKey(0)
    kp, kx, ke = jax.random.split(key, 3)
    params = init_params(kp)
    x = jax.random.normal(kx, (B, S_DEC, D_MODEL), jnp.float32)
    encoder_inter = jax.random.normal(ke, (B, S_ENC, D_MODEL), jnp.float32)

    logits = t5_decoder_top_mocker_forward(params, x, encoder_inter)
    jax.block_until_ready(logits)
    assert logits.shape == (B, S_DEC, VOCAB), logits.shape
    assert bool(jnp.all(jnp.isfinite(logits)))
    print("KERNEL_OK")
</pallas_src>

<mosaic_0001>
module attributes {stable_mosaic.version = 11 : i64} {
  func.func @fused_decoder_kernel(%arg0: memref<32x32xf32, #tpu.memory_space<vmem>>, %arg1: memref<376x128xf32, #tpu.memory_space<vmem>>, %arg2: memref<16x128xf32, #tpu.memory_space<vmem>>) attributes {dimension_semantics = [], scalar_prefetch = 0 : i64, scratch_operands = 0 : i64, tpu.core_type = #tpu.core_type<tc>} {
    %c0 = arith.constant 0 : index
    %c0_0 = arith.constant 0 : index
    %0 = vector.load %arg0[%c0, %c0_0] : memref<32x32xf32, #tpu.memory_space<vmem>>, vector<16x32xf32>
    %c16 = arith.constant 16 : index
    %c0_1 = arith.constant 0 : index
    %1 = vector.load %arg0[%c16, %c0_1] : memref<32x32xf32, #tpu.memory_space<vmem>>, vector<16x32xf32>
    %c352 = arith.constant 352 : index
    %c0_2 = arith.constant 0 : index
    %2 = vector.load %arg1[%c352, %c0_2] : memref<376x128xf32, #tpu.memory_space<vmem>>, vector<8x128xf32>
    %c360 = arith.constant 360 : index
    %c0_3 = arith.constant 0 : index
    %3 = vector.load %arg1[%c360, %c0_3] : memref<376x128xf32, #tpu.memory_space<vmem>>, vector<16x16xf32>
    %c0_4 = arith.constant 0 : index
    %c0_5 = arith.constant 0 : index
    %4 = vector.load %arg1[%c0_4, %c0_5] : memref<376x128xf32, #tpu.memory_space<vmem>>, vector<32x128xf32>
    %c32 = arith.constant 32 : index
    %c0_6 = arith.constant 0 : index
    %5 = vector.load %arg1[%c32, %c0_6] : memref<376x128xf32, #tpu.memory_space<vmem>>, vector<32x128xf32>
    %c64 = arith.constant 64 : index
    %c0_7 = arith.constant 0 : index
    %6 = vector.load %arg1[%c64, %c0_7] : memref<376x128xf32, #tpu.memory_space<vmem>>, vector<32x64xf32>
    %c96 = arith.constant 96 : index
    %c0_8 = arith.constant 0 : index
    %7 = vector.load %arg1[%c96, %c0_8] : memref<376x128xf32, #tpu.memory_space<vmem>>, vector<64x32xf32>
    %8 = vector.extract_strided_slice %2 {offsets = [0, 0], sizes = [1, 32], strides = [1, 1]} : vector<8x128xf32> to vector<1x32xf32>
    %9 = arith.mulf %0, %0 : vector<16x32xf32>
    %cst = arith.constant dense<0.000000e+00> : vector<16xf32>
    %10 = vector.multi_reduction <add>, %9, %cst [1] : vector<16x32xf32> to vector<16xf32>
    %11 = vector.shape_cast %10 : vector<16xf32> to vector<16x1xf32>
    %cst_9 = arith.constant 3.200000e+01 : f32
    %12 = vector.broadcast %cst_9 : f32 to vector<16x1xf32>
    %13 = arith.divf %11, %12 : vector<16x1xf32>
    %cst_10 = arith.constant 9.99999997E-7 : f32
    %14 = vector.broadcast %cst_10 : f32 to vector<16x1xf32>
    %15 = arith.addf %13, %14 : vector<16x1xf32>
    %16 = math.rsqrt %15 : vector<16x1xf32>
    %17 = vector.broadcast %16 : vector<16x1xf32> to vector<16x32xf32>
    %18 = arith.mulf %0, %17 : vector<16x32xf32>
    %19 = vector.broadcast %8 : vector<1x32xf32> to vector<16x32xf32>
    %20 = arith.mulf %18, %19 : vector<16x32xf32>
    %cst_11 = arith.constant dense<0.000000e+00> : vector<16x128xf32>
    %21 = tpu.matmul %20, %4, %cst_11 {dimension_numbers = #tpu.dot_dimension_numbers<[1], [0], [0], [1], [0, 0, 1, 1], [], []>} : vector<16x32xf32>, vector<32x128xf32>, vector<16x128xf32> -> vector<16x128xf32>
    %22 = vector.extract_strided_slice %21 {offsets = [0, 0], sizes = [16, 32], strides = [1, 1]} : vector<16x128xf32> to vector<16x32xf32>
    %23 = vector.extract_strided_slice %21 {offsets = [0, 32], sizes = [16, 32], strides = [1, 1]} : vector<16x128xf32> to vector<16x32xf32>
    %24 = vector.extract_strided_slice %21 {offsets = [0, 64], sizes = [16, 32], strides = [1, 1]} : vector<16x128xf32> to vector<16x32xf32>
    %25 = vector.extract_strided_slice %4 {offsets = [0, 96], sizes = [32, 32], strides = [1, 1]} : vector<32x128xf32> to vector<32x32xf32>
    %26 = vector.extract_strided_slice %22 {offsets = [0, 0], sizes = [16, 8], strides = [1, 1]} : vector<16x32xf32> to vector<16x8xf32>
    %27 = vector.extract_strided_slice %23 {offsets = [0, 0], sizes = [16, 8], strides = [1, 1]} : vector<16x32xf32> to vector<16x8xf32>
    %28 = vector.extract_strided_slice %24 {offsets = [0, 0], sizes = [16, 8], strides = [1, 1]} : vector<16x32xf32> to vector<16x8xf32>
    %cst_12 = arith.constant dense<0.000000e+00> : vector<16x16xf32>
    %29 = tpu.matmul %26, %27, %cst_12 {dimension_numbers = #tpu.dot_dimension_numbers<[1], [1], [0], [0], [0, 0, 1, 0], [], []>} : vector<16x8xf32>, vector<16x8xf32>, vector<16x16xf32> -> vector<16x16xf32>
    %30 = arith.addf %29, %3 : vector<16x16xf32>
    %cst_13 = arith.constant dense<0xFF800000> : vector<16xf32>
    %31 = vector.multi_reduction <maximumf>, %30, %cst_13 [1] : vector<16x16xf32> to vector<16xf32>
    %32 = vector.shape_cast %31 : vector<16xf32> to vector<16x1xf32>
    %33 = vector.broadcast %32 : vector<16x1xf32> to vector<16x16xf32>
    %34 = arith.subf %30, %33 : vector<16x16xf32>
    %35 = math.exp %34 : vector<16x16xf32>
    %cst_14 = arith.constant dense<0.000000e+00> : vector<16xf32>
    %36 = vector.multi_reduction <add>, %35, %cst_14 [1] : vector<16x16xf32> to vector<16xf32>
    %37 = vector.shape_cast %36 : vector<16xf32> to vector<16x1xf32>
    %38 = tpu.reciprocal %37 {approx = true} : vector<16x1xf32> -> vector<16x1xf32>
    %39 = vector.broadcast %38 : vector<16x1xf32> to vector<16x16xf32>
    %40 = arith.mulf %35, %39 : vector<16x16xf32>
    %cst_15 = arith.constant dense<0.000000e+00> : vector<16x8xf32>
    %41 = tpu.matmul %40, %28, %cst_15 {dimension_numbers = #tpu.dot_dimension_numbers<[1], [0], [0], [1], [0, 0, 1, 1], [], []>} : vector<16x16xf32>, vector<16x8xf32>, vector<16x8xf32> -> vector<16x8xf32>
    %42 = vector.extract_strided_slice %22 {offsets = [0, 8], sizes = [16, 8], strides = [1, 1]} : vector<16x32xf32> to vector<16x8xf32>
    %43 = vector.extract_strided_slice %23 {offsets = [0, 8], sizes = [16, 8], strides = [1, 1]} : vector<16x32xf32> to vector<16x8xf32>
    %44 = vector.extract_strided_slice %24 {offsets = [0, 8], sizes = [16, 8], strides = [1, 1]} : vector<16x32xf32> to vector<16x8xf32>
    %cst_16 = arith.constant dense<0.000000e+00> : vector<16x16xf32>
    %45 = tpu.matmul %42, %43, %cst_16 {dimension_numbers = #tpu.dot_dimension_numbers<[1], [1], [0], [0], [0, 0, 1, 0], [], []>} : vector<16x8xf32>, vector<16x8xf32>, vector<16x16xf32> -> vector<16x16xf32>
    %46 = arith.addf %45, %3 : vector<16x16xf32>
    %cst_17 = arith.constant dense<0xFF800000> : vector<16xf32>
    %47 = vector.multi_reduction <maximumf>, %46, %cst_17 [1] : vector<16x16xf32> to vector<16xf32>
    %48 = vector.shape_cast %47 : vector<16xf32> to vector<16x1xf32>
    %49 = vector.broadcast %48 : vector<16x1xf32> to vector<16x16xf32>
    %50 = arith.subf %46, %49 : vector<16x16xf32>
    %51 = math.exp %50 : vector<16x16xf32>
    %cst_18 = arith.constant dense<0.000000e+00> : vector<16xf32>
    %52 = vector.multi_reduction <add>, %51, %cst_18 [1] : vector<16x16xf32> to vector<16xf32>
    %53 = vector.shape_cast %52 : vector<16xf32> to vector<16x1xf32>
    %54 = tpu.reciprocal %53 {approx = true} : vector<16x1xf32> -> vector<16x1xf32>
    %55 = vector.broadcast %54 : vector<16x1xf32> to vector<16x16xf32>
    %56 = arith.mulf %51, %55 : vector<16x16xf32>
    %cst_19 = arith.constant dense<0.000000e+00> : vector<16x8xf32>
    %57 = tpu.matmul %56, %44, %cst_19 {dimension_numbers = #tpu.dot_dimension_numbers<[1], [0], [0], [1], [0, 0, 1, 1], [], []>} : vector<16x16xf32>, vector<16x8xf32>, vector<16x8xf32> -> vector<16x8xf32>
    %58 = vector.extract_strided_slice %22 {offsets = [0, 16], sizes = [16, 8], strides = [1, 1]} : vector<16x32xf32> to vector<16x8xf32>
    %59 = vector.extract_strided_slice %23 {offsets = [0, 16], sizes = [16, 8], strides = [1, 1]} : vector<16x32xf32> to vector<16x8xf32>
    %60 = vector.extract_strided_slice %24 {offsets = [0, 16], sizes = [16, 8], strides = [1, 1]} : vector<16x32xf32> to vector<16x8xf32>
    %cst_20 = arith.constant dense<0.000000e+00> : vector<16x16xf32>
    %61 = tpu.matmul %58, %59, %cst_20 {dimension_numbers = #tpu.dot_dimension_numbers<[1], [1], [0], [0], [0, 0, 1, 0], [], []>} : vector<16x8xf32>, vector<16x8xf32>, vector<16x16xf32> -> vector<16x16xf32>
    %62 = arith.addf %61, %3 : vector<16x16xf32>
    %cst_21 = arith.constant dense<0xFF800000> : vector<16xf32>
    %63 = vector.multi_reduction <maximumf>, %62, %cst_21 [1] : vector<16x16xf32> to vector<16xf32>
    %64 = vector.shape_cast %63 : vector<16xf32> to vector<16x1xf32>
    %65 = vector.broadcast %64 : vector<16x1xf32> to vector<16x16xf32>
    %66 = arith.subf %62, %65 : vector<16x16xf32>
    %67 = math.exp %66 : vector<16x16xf32>
    %cst_22 = arith.constant dense<0.000000e+00> : vector<16xf32>
    %68 = vector.multi_reduction <add>, %67, %cst_22 [1] : vector<16x16xf32> to vector<16xf32>
    %69 = vector.shape_cast %68 : vector<16xf32> to vector<16x1xf32>
    %70 = tpu.reciprocal %69 {approx = true} : vector<16x1xf32> -> vector<16x1xf32>
    %71 = vector.broadcast %70 : vector<16x1xf32> to vector<16x16xf32>
    %72 = arith.mulf %67, %71 : vector<16x16xf32>
    %cst_23 = arith.constant dense<0.000000e+00> : vector<16x8xf32>
    %73 = tpu.matmul %72, %60, %cst_23 {dimension_numbers = #tpu.dot_dimension_numbers<[1], [0], [0], [1], [0, 0, 1, 1], [], []>} : vector<16x16xf32>, vector<16x8xf32>, vector<16x8xf32> -> vector<16x8xf32>
    %74 = vector.extract_strided_slice %22 {offsets = [0, 24], sizes = [16, 8], strides = [1, 1]} : vector<16x32xf32> to vector<16x8xf32>
    %75 = vector.extract_strided_slice %23 {offsets = [0, 24], sizes = [16, 8], strides = [1, 1]} : vector<16x32xf32> to vector<16x8xf32>
    %76 = vector.extract_strided_slice %24 {offsets = [0, 24], sizes = [16, 8], strides = [1, 1]} : vector<16x32xf32> to vector<16x8xf32>
    %cst_24 = arith.constant dense<0.000000e+00> : vector<16x16xf32>
    %77 = tpu.matmul %74, %75, %cst_24 {dimension_numbers = #tpu.dot_dimension_numbers<[1], [1], [0], [0], [0, 0, 1, 0], [], []>} : vector<16x8xf32>, vector<16x8xf32>, vector<16x16xf32> -> vector<16x16xf32>
    %78 = arith.addf %77, %3 : vector<16x16xf32>
    %cst_25 = arith.constant dense<0xFF800000> : vector<16xf32>
    %79 = vector.multi_reduction <maximumf>, %78, %cst_25 [1] : vector<16x16xf32> to vector<16xf32>
    %80 = vector.shape_cast %79 : vector<16xf32> to vector<16x1xf32>
    %81 = vector.broadcast %80 : vector<16x1xf32> to vector<16x16xf32>
    %82 = arith.subf %78, %81 : vector<16x16xf32>
    %83 = math.exp %82 : vector<16x16xf32>
    %cst_26 = arith.constant dense<0.000000e+00> : vector<16xf32>
    %84 = vector.multi_reduction <add>, %83, %cst_26 [1] : vector<16x16xf32> to vector<16xf32>
    %85 = vector.shape_cast %84 : vector<16xf32> to vector<16x1xf32>
    %86 = tpu.reciprocal %85 {approx = true} : vector<16x1xf32> -> vector<16x1xf32>
    %87 = vector.broadcast %86 : vector<16x1xf32> to vector<16x16xf32>
    %88 = arith.mulf %83, %87 : vector<16x16xf32>
    %cst_27 = arith.constant dense<0.000000e+00> : vector<16x8xf32>
    %89 = tpu.matmul %88, %76, %cst_27 {dimension_numbers = #tpu.dot_dimension_numbers<[1], [0], [0], [1], [0, 0, 1, 1], [], []>} : vector<16x16xf32>, vector<16x8xf32>, vector<16x8xf32> -> vector<16x8xf32>
    %90 = tpu.concatenate %41, %57, %73, %89 in 1 : vector<16x8xf32>, vector<16x8xf32>, vector<16x8xf32>, vector<16x8xf32> -> vector<16x32xf32>
    %cst_28 = arith.constant dense<0.000000e+00> : vector<16x32xf32>
    %91 = tpu.matmul %90, %25, %cst_28 {dimension_numbers = #tpu.dot_dimension_numbers<[1], [0], [0], [1], [0, 0, 1, 1], [], []>} : vector<16x32xf32>, vector<32x32xf32>, vector<16x32xf32> -> vector<16x32xf32>
    %92 = arith.addf %0, %91 : vector<16x32xf32>
    %93 = vector.extract_strided_slice %2 {offsets = [1, 0], sizes = [1, 32], strides = [1, 1]} : vector<8x128xf32> to vector<1x32xf32>
    %94 = arith.mulf %92, %92 : vector<16x32xf32>
    %cst_29 = arith.constant dense<0.000000e+00> : vector<16xf32>
    %95 = vector.multi_reduction <add>, %94, %cst_29 [1] : vector<16x32xf32> to vector<16xf32>
    %96 = vector.shape_cast %95 : vector<16xf32> to vector<16x1xf32>
    %cst_30 = arith.constant 3.200000e+01 : f32
    %97 = vector.broadcast %cst_30 : f32 to vector<16x1xf32>
    %98 = arith.divf %96, %97 : vector<16x1xf32>
    %cst_31 = arith.constant 9.99999997E-7 : f32
    %99 = vector.broadcast %cst_31 : f32 to vector<16x1xf32>
    %100 = arith.addf %98, %99 : vector<16x1xf32>
    %101 = math.rsqrt %100 : vector<16x1xf32>
    %102 = vector.broadcast %101 : vector<16x1xf32> to vector<16x32xf32>
    %103 = arith.mulf %92, %102 : vector<16x32xf32>
    %104 = vector.broadcast %93 : vector<1x32xf32> to vector<16x32xf32>
    %105 = arith.mulf %103, %104 : vector<16x32xf32>
    %cst_32 = arith.constant dense<0.000000e+00> : vector<16x128xf32>
    %106 = tpu.matmul %105, %5, %cst_32 {dimension_numbers = #tpu.dot_dimension_numbers<[1], [0], [0], [1], [0, 0, 1, 1], [], []>} : vector<16x32xf32>, vector<32x128xf32>, vector<16x128xf32> -> vector<16x128xf32>
    %cst_33 = arith.constant dense<0.000000e+00> : vector<16x128xf32>
    %107 = tpu.matmul %1, %5, %cst_33 {dimension_numbers = #tpu.dot_dimension_numbers<[1], [0], [0], [1], [0, 0, 1, 1], [], []>} : vector<16x32xf32>, vector<32x128xf32>, vector<16x128xf32> -> vector<16x128xf32>
    %108 = vector.extract_strided_slice %106 {offsets = [0, 0], sizes = [16, 32], strides = [1, 1]} : vector<16x128xf32> to vector<16x32xf32>
    %109 = vector.extract_strided_slice %107 {offsets = [0, 32], sizes = [16, 32], strides = [1, 1]} : vector<16x128xf32> to vector<16x32xf32>
    %110 = vector.extract_strided_slice %107 {offsets = [0, 64], sizes = [16, 32], strides = [1, 1]} : vector<16x128xf32> to vector<16x32xf32>
    %111 = vector.extract_strided_slice %5 {offsets = [0, 96], sizes = [32, 32], strides = [1, 1]} : vector<32x128xf32> to vector<32x32xf32>
    %112 = vector.extract_strided_slice %108 {offsets = [0, 0], sizes = [16, 8], strides = [1, 1]} : vector<16x32xf32> to vector<16x8xf32>
    %113 = vector.extract_strided_slice %109 {offsets = [0, 0], sizes = [16, 8], strides = [1, 1]} : vector<16x32xf32> to vector<16x8xf32>
    %114 = vector.extract_strided_slice %110 {offsets = [0, 0], sizes = [16, 8], strides = [1, 1]} : vector<16x32xf32> to vector<16x8xf32>
    %cst_34 = arith.constant dense<0.000000e+00> : vector<16x16xf32>
    %115 = tpu.matmul %112, %113, %cst_34 {dimension_numbers = #tpu.dot_dimension_numbers<[1], [1], [0], [0], [0, 0, 1, 0], [], []>} : vector<16x8xf32>, vector<16x8xf32>, vector<16x16xf32> -> vector<16x16xf32>
    %116 = arith.addf %115, %3 : vector<16x16xf32>
    %cst_35 = arith.constant dense<0xFF800000> : vector<16xf32>
    %117 = vector.multi_reduction <maximumf>, %116, %cst_35 [1] : vector<16x16xf32> to vector<16xf32>
    %118 = vector.shape_cast %117 : vector<16xf32> to vector<16x1xf32>
    %119 = vector.broadcast %118 : vector<16x1xf32> to vector<16x16xf32>
    %120 = arith.subf %116, %119 : vector<16x16xf32>
    %121 = math.exp %120 : vector<16x16xf32>
    %cst_36 = arith.constant dense<0.000000e+00> : vector<16xf32>
    %122 = vector.multi_reduction <add>, %121, %cst_36 [1] : vector<16x16xf32> to vector<16xf32>
    %123 = vector.shape_cast %122 : vector<16xf32> to vector<16x1xf32>
    %124 = tpu.reciprocal %123 {approx = true} : vector<16x1xf32> -> vector<16x1xf32>
    %125 = vector.broadcast %124 : vector<16x1xf32> to vector<16x16xf32>
    %126 = arith.mulf %121, %125 : vector<16x16xf32>
    %cst_37 = arith.constant dense<0.000000e+00> : vector<16x8xf32>
    %127 = tpu.matmul %126, %114, %cst_37 {dimension_numbers = #tpu.dot_dimension_numbers<[1], [0], [0], [1], [0, 0, 1, 1], [], []>} : vector<16x16xf32>, vector<16x8xf32>, vector<16x8xf32> -> vector<16x8xf32>
    %128 = vector.extract_strided_slice %108 {offsets = [0, 8], sizes = [16, 8], strides = [1, 1]} : vector<16x32xf32> to vector<16x8xf32>
    %129 = vector.extract_strided_slice %109 {offsets = [0, 8], sizes = [16, 8], strides = [1, 1]} : vector<16x32xf32> to vector<16x8xf32>
    %130 = vector.extract_strided_slice %110 {offsets = [0, 8], sizes = [16, 8], strides = [1, 1]} : vector<16x32xf32> to vector<16x8xf32>
    %cst_38 = arith.constant dense<0.000000e+00> : vector<16x16xf32>
    %131 = tpu.matmul %128, %129, %cst_38 {dimension_numbers = #tpu.dot_dimension_numbers<[1], [1], [0], [0], [0, 0, 1, 0], [], []>} : vector<16x8xf32>, vector<16x8xf32>, vector<16x16xf32> -> vector<16x16xf32>
    %132 = arith.addf %131, %3 : vector<16x16xf32>
    %cst_39 = arith.constant dense<0xFF800000> : vector<16xf32>
    %133 = vector.multi_reduction <maximumf>, %132, %cst_39 [1] : vector<16x16xf32> to vector<16xf32>
    %134 = vector.shape_cast %133 : vector<16xf32> to vector<16x1xf32>
    %135 = vector.broadcast %134 : vector<16x1xf32> to vector<16x16xf32>
    %136 = arith.subf %132, %135 : vector<16x16xf32>
    %137 = math.exp %136 : vector<16x16xf32>
    %cst_40 = arith.constant dense<0.000000e+00> : vector<16xf32>
    %138 = vector.multi_reduction <add>, %137, %cst_40 [1] : vector<16x16xf32> to vector<16xf32>
    %139 = vector.shape_cast %138 : vector<16xf32> to vector<16x1xf32>
    %140 = tpu.reciprocal %139 {approx = true} : vector<16x1xf32> -> vector<16x1xf32>
    %141 = vector.broadcast %140 : vector<16x1xf32> to vector<16x16xf32>
    %142 = arith.mulf %137, %141 : vector<16x16xf32>
    %cst_41 = arith.constant dense<0.000000e+00> : vector<16x8xf32>
    %143 = tpu.matmul %142, %130, %cst_41 {dimension_numbers = #tpu.dot_dimension_numbers<[1], [0], [0], [1], [0, 0, 1, 1], [], []>} : vector<16x16xf32>, vector<16x8xf32>, vector<16x8xf32> -> vector<16x8xf32>
    %144 = vector.extract_strided_slice %108 {offsets = [0, 16], sizes = [16, 8], strides = [1, 1]} : vector<16x32xf32> to vector<16x8xf32>
    %145 = vector.extract_strided_slice %109 {offsets = [0, 16], sizes = [16, 8], strides = [1, 1]} : vector<16x32xf32> to vector<16x8xf32>
    %146 = vector.extract_strided_slice %110 {offsets = [0, 16], sizes = [16, 8], strides = [1, 1]} : vector<16x32xf32> to vector<16x8xf32>
    %cst_42 = arith.constant dense<0.000000e+00> : vector<16x16xf32>
    %147 = tpu.matmul %144, %145, %cst_42 {dimension_numbers = #tpu.dot_dimension_numbers<[1], [1], [0], [0], [0, 0, 1, 0], [], []>} : vector<16x8xf32>, vector<16x8xf32>, vector<16x16xf32> -> vector<16x16xf32>
    %148 = arith.addf %147, %3 : vector<16x16xf32>
    %cst_43 = arith.constant dense<0xFF800000> : vector<16xf32>
    %149 = vector.multi_reduction <maximumf>, %148, %cst_43 [1] : vector<16x16xf32> to vector<16xf32>
    %150 = vector.shape_cast %149 : vector<16xf32> to vector<16x1xf32>
    %151 = vector.broadcast %150 : vector<16x1xf32> to vector<16x16xf32>
    %152 = arith.subf %148, %151 : vector<16x16xf32>
    %153 = math.exp %152 : vector<16x16xf32>
    %cst_44 = arith.constant dense<0.000000e+00> : vector<16xf32>
    %154 = vector.multi_reduction <add>, %153, %cst_44 [1] : vector<16x16xf32> to vector<16xf32>
    %155 = vector.shape_cast %154 : vector<16xf32> to vector<16x1xf32>
    %156 = tpu.reciprocal %155 {approx = true} : vector<16x1xf32> -> vector<16x1xf32>
    %157 = vector.broadcast %156 : vector<16x1xf32> to vector<16x16xf32>
    %158 = arith.mulf %153, %157 : vector<16x16xf32>
    %cst_45 = arith.constant dense<0.000000e+00> : vector<16x8xf32>
    %159 = tpu.matmul %158, %146, %cst_45 {dimension_numbers = #tpu.dot_dimension_numbers<[1], [0], [0], [1], [0, 0, 1, 1], [], []>} : vector<16x16xf32>, vector<16x8xf32>, vector<16x8xf32> -> vector<16x8xf32>
    %160 = vector.extract_strided_slice %108 {offsets = [0, 24], sizes = [16, 8], strides = [1, 1]} : vector<16x32xf32> to vector<16x8xf32>
    %161 = vector.extract_strided_slice %109 {offsets = [0, 24], sizes = [16, 8], strides = [1, 1]} : vector<16x32xf32> to vector<16x8xf32>
    %162 = vector.extract_strided_slice %110 {offsets = [0, 24], sizes = [16, 8], strides = [1, 1]} : vector<16x32xf32> to vector<16x8xf32>
    %cst_46 = arith.constant dense<0.000000e+00> : vector<16x16xf32>
    %163 = tpu.matmul %160, %161, %cst_46 {dimension_numbers = #tpu.dot_dimension_numbers<[1], [1], [0], [0], [0, 0, 1, 0], [], []>} : vector<16x8xf32>, vector<16x8xf32>, vector<16x16xf32> -> vector<16x16xf32>
    %164 = arith.addf %163, %3 : vector<16x16xf32>
    %cst_47 = arith.constant dense<0xFF800000> : vector<16xf32>
    %165 = vector.multi_reduction <maximumf>, %164, %cst_47 [1] : vector<16x16xf32> to vector<16xf32>
    %166 = vector.shape_cast %165 : vector<16xf32> to vector<16x1xf32>
    %167 = vector.broadcast %166 : vector<16x1xf32> to vector<16x16xf32>
    %168 = arith.subf %164, %167 : vector<16x16xf32>
    %169 = math.exp %168 : vector<16x16xf32>
    %cst_48 = arith.constant dense<0.000000e+00> : vector<16xf32>
    %170 = vector.multi_reduction <add>, %169, %cst_48 [1] : vector<16x16xf32> to vector<16xf32>
    %171 = vector.shape_cast %170 : vector<16xf32> to vector<16x1xf32>
    %172 = tpu.reciprocal %171 {approx = true} : vector<16x1xf32> -> vector<16x1xf32>
    %173 = vector.broadcast %172 : vector<16x1xf32> to vector<16x16xf32>
    %174 = arith.mulf %169, %173 : vector<16x16xf32>
    %cst_49 = arith.constant dense<0.000000e+00> : vector<16x8xf32>
    %175 = tpu.matmul %174, %162, %cst_49 {dimension_numbers = #tpu.dot_dimension_numbers<[1], [0], [0], [1], [0, 0, 1, 1], [], []>} : vector<16x16xf32>, vector<16x8xf32>, vector<16x8xf32> -> vector<16x8xf32>
    %176 = tpu.concatenate %127, %143, %159, %175 in 1 : vector<16x8xf32>, vector<16x8xf32>, vector<16x8xf32>, vector<16x8xf32> -> vector<16x32xf32>
    %cst_50 = arith.constant dense<0.000000e+00> : vector<16x32xf32>
    %177 = tpu.matmul %176, %111, %cst_50 {dimension_numbers = #tpu.dot_dimension_numbers<[1], [0], [0], [1], [0, 0, 1, 1], [], []>} : vector<16x32xf32>, vector<32x32xf32>, vector<16x32xf32> -> vector<16x32xf32>
    %178 = arith.addf %92, %177 : vector<16x32xf32>
    %179 = vector.extract_strided_slice %2 {offsets = [2, 0], sizes = [1, 32], strides = [1, 1]} : vector<8x128xf32> to vector<1x32xf32>
    %180 = arith.mulf %178, %178 : vector<16x32xf32>
    %cst_51 = arith.constant dense<0.000000e+00> : vector<16xf32>
    %181 = vector.multi_reduction <add>, %180, %cst_51 [1] : vector<16x32xf32> to vector<16xf32>
    %182 = vector.shape_cast %181 : vector<16xf32> to vector<16x1xf32>
    %cst_52 = arith.constant 3.200000e+01 : f32
    %183 = vector.broadcast %cst_52 : f32 to vector<16x1xf32>
    %184 = arith.divf %182, %183 : vector<16x1xf32>
    %cst_53 = arith.constant 9.99999997E-7 : f32
    %185 = vector.broadcast %cst_53 : f32 to vector<16x1xf32>
    %186 = arith.addf %184, %185 : vector<16x1xf32>
    %187 = math.rsqrt %186 : vector<16x1xf32>
    %188 = vector.broadcast %187 : vector<16x1xf32> to vector<16x32xf32>
    %189 = arith.mulf %178, %188 : vector<16x32xf32>
    %190 = vector.broadcast %179 : vector<1x32xf32> to vector<16x32xf32>
    %191 = arith.mulf %189, %190 : vector<16x32xf32>
    %cst_54 = arith.constant dense<0.000000e+00> : vector<16x64xf32>
    %192 = tpu.matmul %191, %6, %cst_54 {dimension_numbers = #tpu.dot_dimension_numbers<[1], [0], [0], [1], [0, 0, 1, 1], [], []>} : vector<16x32xf32>, vector<32x64xf32>, vector<16x64xf32> -> vector<16x64xf32>
    %cst_55 = arith.constant 0.000000e+00 : f32
    %193 = vector.broadcast %cst_55 : f32 to vector<16x64xf32>
    %194 = arith.maximumf %192, %193 : vector<16x64xf32>
    %cst_56 = arith.constant dense<0.000000e+00> : vector<16x32xf32>
    %195 = tpu.matmul %194, %7, %cst_56 {dimension_numbers = #tpu.dot_dimension_numbers<[1], [0], [0], [1], [0, 0, 1, 1], [], []>} : vector<16x64xf32>, vector<64x32xf32>, vector<16x32xf32> -> vector<16x32xf32>
    %196 = arith.addf %178, %195 : vector<16x32xf32>
    %c160 = arith.constant 160 : index
    %c0_57 = arith.constant 0 : index
    %197 = vector.load %arg1[%c160, %c0_57] : memref<376x128xf32, #tpu.memory_space<vmem>>, vector<32x128xf32>
    %c192 = arith.constant 192 : index
    %c0_58 = arith.constant 0 : index
    %198 = vector.load %arg1[%c192, %c0_58] : memref<376x128xf32, #tpu.memory_space<vmem>>, vector<32x128xf32>
    %c224 = arith.constant 224 : index
    %c0_59 = arith.constant 0 : index
    %199 = vector.load %arg1[%c224, %c0_59] : memref<376x128xf32, #tpu.memory_space<vmem>>, vector<32x64xf32>
    %c256 = arith.constant 256 : index
    %c0_60 = arith.constant 0 : index
    %200 = vector.load %arg1[%c256, %c0_60] : memref<376x128xf32, #tpu.memory_space<vmem>>, vector<64x32xf32>
    %201 = vector.extract_strided_slice %2 {offsets = [3, 0], sizes = [1, 32], strides = [1, 1]} : vector<8x128xf32> to vector<1x32xf32>
    %202 = arith.mulf %196, %196 : vector<16x32xf32>
    %cst_61 = arith.constant dense<0.000000e+00> : vector<16xf32>
    %203 = vector.multi_reduction <add>, %202, %cst_61 [1] : vector<16x32xf32> to vector<16xf32>
    %204 = vector.shape_cast %203 : vector<16xf32> to vector<16x1xf32>
    %cst_62 = arith.constant 3.200000e+01 : f32
    %205 = vector.broadcast %cst_62 : f32 to vector<16x1xf32>
    %206 = arith.divf %204, %205 : vector<16x1xf32>
    %cst_63 = arith.constant 9.99999997E-7 : f32
    %207 = vector.broadcast %cst_63 : f32 to vector<16x1xf32>
    %208 = arith.addf %206, %207 : vector<16x1xf32>
    %209 = math.rsqrt %208 : vector<16x1xf32>
    %210 = vector.broadcast %209 : vector<16x1xf32> to vector<16x32xf32>
    %211 = arith.mulf %196, %210 : vector<16x32xf32>
    %212 = vector.broadcast %201 : vector<1x32xf32> to vector<16x32xf32>
    %213 = arith.mulf %211, %212 : vector<16x32xf32>
    %cst_64 = arith.constant dense<0.000000e+00> : vector<16x128xf32>
    %214 = tpu.matmul %213, %197, %cst_64 {dimension_numbers = #tpu.dot_dimension_numbers<[1], [0], [0], [1], [0, 0, 1, 1], [], []>} : vector<16x32xf32>, vector<32x128xf32>, vector<16x128xf32> -> vector<16x128xf32>
    %215 = vector.extract_strided_slice %214 {offsets = [0, 0], sizes = [16, 32], strides = [1, 1]} : vector<16x128xf32> to vector<16x32xf32>
    %216 = vector.extract_strided_slice %214 {offsets = [0, 32], sizes = [16, 32], strides = [1, 1]} : vector<16x128xf32> to vector<16x32xf32>
    %217 = vector.extract_strided_slice %214 {offsets = [0, 64], sizes = [16, 32], strides = [1, 1]} : vector<16x128xf32> to vector<16x32xf32>
    %218 = vector.extract_strided_slice %197 {offsets = [0, 96], sizes = [32, 32], strides = [1, 1]} : vector<32x128xf32> to vector<32x32xf32>
    %219 = vector.extract_strided_slice %215 {offsets = [0, 0], sizes = [16, 8], strides = [1, 1]} : vector<16x32xf32> to vector<16x8xf32>
    %220 = vector.extract_strided_slice %216 {offsets = [0, 0], sizes = [16, 8], strides = [1, 1]} : vector<16x32xf32> to vector<16x8xf32>
    %221 = vector.extract_strided_slice %217 {offsets = [0, 0], sizes = [16, 8], strides = [1, 1]} : vector<16x32xf32> to vector<16x8xf32>
    %cst_65 = arith.constant dense<0.000000e+00> : vector<16x16xf32>
    %222 = tpu.matmul %219, %220, %cst_65 {dimension_numbers = #tpu.dot_dimension_numbers<[1], [1], [0], [0], [0, 0, 1, 0], [], []>} : vector<16x8xf32>, vector<16x8xf32>, vector<16x16xf32> -> vector<16x16xf32>
    %223 = arith.addf %222, %3 : vector<16x16xf32>
    %cst_66 = arith.constant dense<0xFF800000> : vector<16xf32>
    %224 = vector.multi_reduction <maximumf>, %223, %cst_66 [1] : vector<16x16xf32> to vector<16xf32>
    %225 = vector.shape_cast %224 : vector<16xf32> to vector<16x1xf32>
    %226 = vector.broadcast %225 : vector<16x1xf32> to vector<16x16xf32>
    %227 = arith.subf %223, %226 : vector<16x16xf32>
    %228 = math.exp %227 : vector<16x16xf32>
    %cst_67 = arith.constant dense<0.000000e+00> : vector<16xf32>
    %229 = vector.multi_reduction <add>, %228, %cst_67 [1] : vector<16x16xf32> to vector<16xf32>
    %230 = vector.shape_cast %229 : vector<16xf32> to vector<16x1xf32>
    %231 = tpu.reciprocal %230 {approx = true} : vector<16x1xf32> -> vector<16x1xf32>
    %232 = vector.broadcast %231 : vector<16x1xf32> to vector<16x16xf32>
    %233 = arith.mulf %228, %232 : vector<16x16xf32>
    %cst_68 = arith.constant dense<0.000000e+00> : vector<16x8xf32>
    %234 = tpu.matmul %233, %221, %cst_68 {dimension_numbers = #tpu.dot_dimension_numbers<[1], [0], [0], [1], [0, 0, 1, 1], [], []>} : vector<16x16xf32>, vector<16x8xf32>, vector<16x8xf32> -> vector<16x8xf32>
    %235 = vector.extract_strided_slice %215 {offsets = [0, 8], sizes = [16, 8], strides = [1, 1]} : vector<16x32xf32> to vector<16x8xf32>
    %236 = vector.extract_strided_slice %216 {offsets = [0, 8], sizes = [16, 8], strides = [1, 1]} : vector<16x32xf32> to vector<16x8xf32>
    %237 = vector.extract_strided_slice %217 {offsets = [0, 8], sizes = [16, 8], strides = [1, 1]} : vector<16x32xf32> to vector<16x8xf32>
    %cst_69 = arith.constant dense<0.000000e+00> : vector<16x16xf32>
    %238 = tpu.matmul %235, %236, %cst_69 {dimension_numbers = #tpu.dot_dimension_numbers<[1], [1], [0], [0], [0, 0, 1, 0], [], []>} : vector<16x8xf32>, vector<16x8xf32>, vector<16x16xf32> -> vector<16x16xf32>
    %239 = arith.addf %238, %3 : vector<16x16xf32>
    %cst_70 = arith.constant dense<0xFF800000> : vector<16xf32>
    %240 = vector.multi_reduction <maximumf>, %239, %cst_70 [1] : vector<16x16xf32> to vector<16xf32>
    %241 = vector.shape_cast %240 : vector<16xf32> to vector<16x1xf32>
    %242 = vector.broadcast %241 : vector<16x1xf32> to vector<16x16xf32>
    %243 = arith.subf %239, %242 : vector<16x16xf32>
    %244 = math.exp %243 : vector<16x16xf32>
    %cst_71 = arith.constant dense<0.000000e+00> : vector<16xf32>
    %245 = vector.multi_reduction <add>, %244, %cst_71 [1] : vector<16x16xf32> to vector<16xf32>
    %246 = vector.shape_cast %245 : vector<16xf32> to vector<16x1xf32>
    %247 = tpu.reciprocal %246 {approx = true} : vector<16x1xf32> -> vector<16x1xf32>
    %248 = vector.broadcast %247 : vector<16x1xf32> to vector<16x16xf32>
    %249 = arith.mulf %244, %248 : vector<16x16xf32>
    %cst_72 = arith.constant dense<0.000000e+00> : vector<16x8xf32>
    %250 = tpu.matmul %249, %237, %cst_72 {dimension_numbers = #tpu.dot_dimension_numbers<[1], [0], [0], [1], [0, 0, 1, 1], [], []>} : vector<16x16xf32>, vector<16x8xf32>, vector<16x8xf32> -> vector<16x8xf32>
    %251 = vector.extract_strided_slice %215 {offsets = [0, 16], sizes = [16, 8], strides = [1, 1]} : vector<16x32xf32> to vector<16x8xf32>
    %252 = vector.extract_strided_slice %216 {offsets = [0, 16], sizes = [16, 8], strides = [1, 1]} : vector<16x32xf32> to vector<16x8xf32>
    %253 = vector.extract_strided_slice %217 {offsets = [0, 16], sizes = [16, 8], strides = [1, 1]} : vector<16x32xf32> to vector<16x8xf32>
    %cst_73 = arith.constant dense<0.000000e+00> : vector<16x16xf32>
    %254 = tpu.matmul %251, %252, %cst_73 {dimension_numbers = #tpu.dot_dimension_numbers<[1], [1], [0], [0], [0, 0, 1, 0], [], []>} : vector<16x8xf32>, vector<16x8xf32>, vector<16x16xf32> -> vector<16x16xf32>
    %255 = arith.addf %254, %3 : vector<16x16xf32>
    %cst_74 = arith.constant dense<0xFF800000> : vector<16xf32>
    %256 = vector.multi_reduction <maximumf>, %255, %cst_74 [1] : vector<16x16xf32> to vector<16xf32>
    %257 = vector.shape_cast %256 : vector<16xf32> to vector<16x1xf32>
    %258 = vector.broadcast %257 : vector<16x1xf32> to vector<16x16xf32>
    %259 = arith.subf %255, %258 : vector<16x16xf32>
    %260 = math.exp %259 : vector<16x16xf32>
    %cst_75 = arith.constant dense<0.000000e+00> : vector<16xf32>
    %261 = vector.multi_reduction <add>, %260, %cst_75 [1] : vector<16x16xf32> to vector<16xf32>
    %262 = vector.shape_cast %261 : vector<16xf32> to vector<16x1xf32>
    %263 = tpu.reciprocal %262 {approx = true} : vector<16x1xf32> -> vector<16x1xf32>
    %264 = vector.broadcast %263 : vector<16x1xf32> to vector<16x16xf32>
    %265 = arith.mulf %260, %264 : vector<16x16xf32>
    %cst_76 = arith.constant dense<0.000000e+00> : vector<16x8xf32>
    %266 = tpu.matmul %265, %253, %cst_76 {dimension_numbers = #tpu.dot_dimension_numbers<[1], [0], [0], [1], [0, 0, 1, 1], [], []>} : vector<16x16xf32>, vector<16x8xf32>, vector<16x8xf32> -> vector<16x8xf32>
    %267 = vector.extract_strided_slice %215 {offsets = [0, 24], sizes = [16, 8], strides = [1, 1]} : vector<16x32xf32> to vector<16x8xf32>
    %268 = vector.extract_strided_slice %216 {offsets = [0, 24], sizes = [16, 8], strides = [1, 1]} : vector<16x32xf32> to vector<16x8xf32>
    %269 = vector.extract_strided_slice %217 {offsets = [0, 24], sizes = [16, 8], strides = [1, 1]} : vector<16x32xf32> to vector<16x8xf32>
    %cst_77 = arith.constant dense<0.000000e+00> : vector<16x16xf32>
    %270 = tpu.matmul %267, %268, %cst_77 {dimension_numbers = #tpu.dot_dimension_numbers<[1], [1], [0], [0], [0, 0, 1, 0], [], []>} : vector<16x8xf32>, vector<16x8xf32>, vector<16x16xf32> -> vector<16x16xf32>
    %271 = arith.addf %270, %3 : vector<16x16xf32>
    %cst_78 = arith.constant dense<0xFF800000> : vector<16xf32>
    %272 = vector.multi_reduction <maximumf>, %271, %cst_78 [1] : vector<16x16xf32> to vector<16xf32>
    %273 = vector.shape_cast %272 : vector<16xf32> to vector<16x1xf32>
    %274 = vector.broadcast %273 : vector<16x1xf32> to vector<16x16xf32>
    %275 = arith.subf %271, %274 : vector<16x16xf32>
    %276 = math.exp %275 : vector<16x16xf32>
    %cst_79 = arith.constant dense<0.000000e+00> : vector<16xf32>
    %277 = vector.multi_reduction <add>, %276, %cst_79 [1] : vector<16x16xf32> to vector<16xf32>
    %278 = vector.shape_cast %277 : vector<16xf32> to vector<16x1xf32>
    %279 = tpu.reciprocal %278 {approx = true} : vector<16x1xf32> -> vector<16x1xf32>
    %280 = vector.broadcast %279 : vector<16x1xf32> to vector<16x16xf32>
    %281 = arith.mulf %276, %280 : vector<16x16xf32>
    %cst_80 = arith.constant dense<0.000000e+00> : vector<16x8xf32>
    %282 = tpu.matmul %281, %269, %cst_80 {dimension_numbers = #tpu.dot_dimension_numbers<[1], [0], [0], [1], [0, 0, 1, 1], [], []>} : vector<16x16xf32>, vector<16x8xf32>, vector<16x8xf32> -> vector<16x8xf32>
    %283 = tpu.concatenate %234, %250, %266, %282 in 1 : vector<16x8xf32>, vector<16x8xf32>, vector<16x8xf32>, vector<16x8xf32> -> vector<16x32xf32>
    %cst_81 = arith.constant dense<0.000000e+00> : vector<16x32xf32>
    %284 = tpu.matmul %283, %218, %cst_81 {dimension_numbers = #tpu.dot_dimension_numbers<[1], [0], [0], [1], [0, 0, 1, 1], [], []>} : vector<16x32xf32>, vector<32x32xf32>, vector<16x32xf32> -> vector<16x32xf32>
    %285 = arith.addf %196, %284 : vector<16x32xf32>
    %286 = vector.extract_strided_slice %2 {offsets = [4, 0], sizes = [1, 32], strides = [1, 1]} : vector<8x128xf32> to vector<1x32xf32>
    %287 = arith.mulf %285, %285 : vector<16x32xf32>
    %cst_82 = arith.constant dense<0.000000e+00> : vector<16xf32>
    %288 = vector.multi_reduction <add>, %287, %cst_82 [1] : vector<16x32xf32> to vector<16xf32>
    %289 = vector.shape_cast %288 : vector<16xf32> to vector<16x1xf32>
    %cst_83 = arith.constant 3.200000e+01 : f32
    %290 = vector.broadcast %cst_83 : f32 to vector<16x1xf32>
    %291 = arith.divf %289, %290 : vector<16x1xf32>
    %cst_84 = arith.constant 9.99999997E-7 : f32
    %292 = vector.broadcast %cst_84 : f32 to vector<16x1xf32>
    %293 = arith.addf %291, %292 : vector<16x1xf32>
    %294 = math.rsqrt %293 : vector<16x1xf32>
    %295 = vector.broadcast %294 : vector<16x1xf32> to vector<16x32xf32>
    %296 = arith.mulf %285, %295 : vector<16x32xf32>
    %297 = vector.broadcast %286 : vector<1x32xf32> to vector<16x32xf32>
    %298 = arith.mulf %296, %297 : vector<16x32xf32>
    %cst_85 = arith.constant dense<0.000000e+00> : vector<16x128xf32>
    %299 = tpu.matmul %298, %198, %cst_85 {dimension_numbers = #tpu.dot_dimension_numbers<[1], [0], [0], [1], [0, 0, 1, 1], [], []>} : vector<16x32xf32>, vector<32x128xf32>, vector<16x128xf32> -> vector<16x128xf32>
    %cst_86 = arith.constant dense<0.000000e+00> : vector<16x128xf32>
    %300 = tpu.matmul %1, %198, %cst_86 {dimension_numbers = #tpu.dot_dimension_numbers<[1], [0], [0], [1], [0, 0, 1, 1], [], []>} : vector<16x32xf32>, vector<32x128xf32>, vector<16x128xf32> -> vector<16x128xf32>
    %301 = vector.extract_strided_slice %299 {offsets = [0, 0], sizes = [16, 32], strides = [1, 1]} : vector<16x128xf32> to vector<16x32xf32>
    %302 = vector.extract_strided_slice %300 {offsets = [0, 32], sizes = [16, 32], strides = [1, 1]} : vector<16x128xf32> to vector<16x32xf32>
    %303 = vector.extract_strided_slice %300 {offsets = [0, 64], sizes = [16, 32], strides = [1, 1]} : vector<16x128xf32> to vector<16x32xf32>
    %304 = vector.extract_strided_slice %198 {offsets = [0, 96], sizes = [32, 32], strides = [1, 1]} : vector<32x128xf32> to vector<32x32xf32>
    %305 = vector.extract_strided_slice %301 {offsets = [0, 0], sizes = [16, 8], strides = [1, 1]} : vector<16x32xf32> to vector<16x8xf32>
    %306 = vector.extract_strided_slice %302 {offsets = [0, 0], sizes = [16, 8], strides = [1, 1]} : vector<16x32xf32> to vector<16x8xf32>
    %307 = vector.extract_strided_slice %303 {offsets = [0, 0], sizes = [16, 8], strides = [1, 1]} : vector<16x32xf32> to vector<16x8xf32>
    %cst_87 = arith.constant dense<0.000000e+00> : vector<16x16xf32>
    %308 = tpu.matmul %305, %306, %cst_87 {dimension_numbers = #tpu.dot_dimension_numbers<[1], [1], [0], [0], [0, 0, 1, 0], [], []>} : vector<16x8xf32>, vector<16x8xf32>, vector<16x16xf32> -> vector<16x16xf32>
    %309 = arith.addf %308, %3 : vector<16x16xf32>
    %cst_88 = arith.constant dense<0xFF800000> : vector<16xf32>
    %310 = vector.multi_reduction <maximumf>, %309, %cst_88 [1] : vector<16x16xf32> to vector<16xf32>
    %311 = vector.shape_cast %310 : vector<16xf32> to vector<16x1xf32>
    %312 = vector.broadcast %311 : vector<16x1xf32> to vector<16x16xf32>
    %313 = arith.subf %309, %312 : vector<16x16xf32>
    %314 = math.exp %313 : vector<16x16xf32>
    %cst_89 = arith.constant dense<0.000000e+00> : vector<16xf32>
    %315 = vector.multi_reduction <add>, %314, %cst_89 [1] : vector<16x16xf32> to vector<16xf32>
    %316 = vector.shape_cast %315 : vector<16xf32> to vector<16x1xf32>
    %317 = tpu.reciprocal %316 {approx = true} : vector<16x1xf32> -> vector<16x1xf32>
    %318 = vector.broadcast %317 : vector<16x1xf32> to vector<16x16xf32>
    %319 = arith.mulf %314, %318 : vector<16x16xf32>
    %cst_90 = arith.constant dense<0.000000e+00> : vector<16x8xf32>
    %320 = tpu.matmul %319, %307, %cst_90 {dimension_numbers = #tpu.dot_dimension_numbers<[1], [0], [0], [1], [0, 0, 1, 1], [], []>} : vector<16x16xf32>, vector<16x8xf32>, vector<16x8xf32> -> vector<16x8xf32>
    %321 = vector.extract_strided_slice %301 {offsets = [0, 8], sizes = [16, 8], strides = [1, 1]} : vector<16x32xf32> to vector<16x8xf32>
    %322 = vector.extract_strided_slice %302 {offsets = [0, 8], sizes = [16, 8], strides = [1, 1]} : vector<16x32xf32> to vector<16x8xf32>
    %323 = vector.extract_strided_slice %303 {offsets = [0, 8], sizes = [16, 8], strides = [1, 1]} : vector<16x32xf32> to vector<16x8xf32>
    %cst_91 = arith.constant dense<0.000000e+00> : vector<16x16xf32>
    %324 = tpu.matmul %321, %322, %cst_91 {dimension_numbers = #tpu.dot_dimension_numbers<[1], [1], [0], [0], [0, 0, 1, 0], [], []>} : vector<16x8xf32>, vector<16x8xf32>, vector<16x16xf32> -> vector<16x16xf32>
    %325 = arith.addf %324, %3 : vector<16x16xf32>
    %cst_92 = arith.constant dense<0xFF800000> : vector<16xf32>
    %326 = vector.multi_reduction <maximumf>, %325, %cst_92 [1] : vector<16x16xf32> to vector<16xf32>
    %327 = vector.shape_cast %326 : vector<16xf32> to vector<16x1xf32>
    %328 = vector.broadcast %327 : vector<16x1xf32> to vector<16x16xf32>
    %329 = arith.subf %325, %328 : vector<16x16xf32>
    %330 = math.exp %329 : vector<16x16xf32>
    %cst_93 = arith.constant dense<0.000000e+00> : vector<16xf32>
    %331 = vector.multi_reduction <add>, %330, %cst_93 [1] : vector<16x16xf32> to vector<16xf32>
    %332 = vector.shape_cast %331 : vector<16xf32> to vector<16x1xf32>
    %333 = tpu.reciprocal %332 {approx = true} : vector<16x1xf32> -> vector<16x1xf32>
    %334 = vector.broadcast %333 : vector<16x1xf32> to vector<16x16xf32>
    %335 = arith.mulf %330, %334 : vector<16x16xf32>
    %cst_94 = arith.constant dense<0.000000e+00> : vector<16x8xf32>
    %336 = tpu.matmul %335, %323, %cst_94 {dimension_numbers = #tpu.dot_dimension_numbers<[1], [0], [0], [1], [0, 0, 1, 1], [], []>} : vector<16x16xf32>, vector<16x8xf32>, vector<16x8xf32> -> vector<16x8xf32>
    %337 = vector.extract_strided_slice %301 {offsets = [0, 16], sizes = [16, 8], strides = [1, 1]} : vector<16x32xf32> to vector<16x8xf32>
    %338 = vector.extract_strided_slice %302 {offsets = [0, 16], sizes = [16, 8], strides = [1, 1]} : vector<16x32xf32> to vector<16x8xf32>
    %339 = vector.extract_strided_slice %303 {offsets = [0, 16], sizes = [16, 8], strides = [1, 1]} : vector<16x32xf32> to vector<16x8xf32>
    %cst_95 = arith.constant dense<0.000000e+00> : vector<16x16xf32>
    %340 = tpu.matmul %337, %338, %cst_95 {dimension_numbers = #tpu.dot_dimension_numbers<[1], [1], [0], [0], [0, 0, 1, 0], [], []>} : vector<16x8xf32>, vector<16x8xf32>, vector<16x16xf32> -> vector<16x16xf32>
    %341 = arith.addf %340, %3 : vector<16x16xf32>
    %cst_96 = arith.constant dense<0xFF800000> : vector<16xf32>
    %342 = vector.multi_reduction <maximumf>, %341, %cst_96 [1] : vector<16x16xf32> to vector<16xf32>
    %343 = vector.shape_cast %342 : vector<16xf32> to vector<16x1xf32>
    %344 = vector.broadcast %343 : vector<16x1xf32> to vector<16x16xf32>
    %345 = arith.subf %341, %344 : vector<16x16xf32>
    %346 = math.exp %345 : vector<16x16xf32>
    %cst_97 = arith.constant dense<0.000000e+00> : vector<16xf32>
    %347 = vector.multi_reduction <add>, %346, %cst_97 [1] : vector<16x16xf32> to vector<16xf32>
    %348 = vector.shape_cast %347 : vector<16xf32> to vector<16x1xf32>
    %349 = tpu.reciprocal %348 {approx = true} : vector<16x1xf32> -> vector<16x1xf32>
    %350 = vector.broadcast %349 : vector<16x1xf32> to vector<16x16xf32>
    %351 = arith.mulf %346, %350 : vector<16x16xf32>
    %cst_98 = arith.constant dense<0.000000e+00> : vector<16x8xf32>
    %352 = tpu.matmul %351, %339, %cst_98 {dimension_numbers = #tpu.dot_dimension_numbers<[1], [0], [0], [1], [0, 0, 1, 1], [], []>} : vector<16x16xf32>, vector<16x8xf32>, vector<16x8xf32> -> vector<16x8xf32>
    %353 = vector.extract_strided_slice %301 {offsets = [0, 24], sizes = [16, 8], strides = [1, 1]} : vector<16x32xf32> to vector<16x8xf32>
    %354 = vector.extract_strided_slice %302 {offsets = [0, 24], sizes = [16, 8], strides = [1, 1]} : vector<16x32xf32> to vector<16x8xf32>
    %355 = vector.extract_strided_slice %303 {offsets = [0, 24], sizes = [16, 8], strides = [1, 1]} : vector<16x32xf32> to vector<16x8xf32>
    %cst_99 = arith.constant dense<0.000000e+00> : vector<16x16xf32>
    %356 = tpu.matmul %353, %354, %cst_99 {dimension_numbers = #tpu.dot_dimension_numbers<[1], [1], [0], [0], [0, 0, 1, 0], [], []>} : vector<16x8xf32>, vector<16x8xf32>, vector<16x16xf32> -> vector<16x16xf32>
    %357 = arith.addf %356, %3 : vector<16x16xf32>
    %cst_100 = arith.constant dense<0xFF800000> : vector<16xf32>
    %358 = vector.multi_reduction <maximumf>, %357, %cst_100 [1] : vector<16x16xf32> to vector<16xf32>
    %359 = vector.shape_cast %358 : vector<16xf32> to vector<16x1xf32>
    %360 = vector.broadcast %359 : vector<16x1xf32> to vector<16x16xf32>
    %361 = arith.subf %357, %360 : vector<16x16xf32>
    %362 = math.exp %361 : vector<16x16xf32>
    %cst_101 = arith.constant dense<0.000000e+00> : vector<16xf32>
    %363 = vector.multi_reduction <add>, %362, %cst_101 [1] : vector<16x16xf32> to vector<16xf32>
    %364 = vector.shape_cast %363 : vector<16xf32> to vector<16x1xf32>
    %365 = tpu.reciprocal %364 {approx = true} : vector<16x1xf32> -> vector<16x1xf32>
    %366 = vector.broadcast %365 : vector<16x1xf32> to vector<16x16xf32>
    %367 = arith.mulf %362, %366 : vector<16x16xf32>
    %cst_102 = arith.constant dense<0.000000e+00> : vector<16x8xf32>
    %368 = tpu.matmul %367, %355, %cst_102 {dimension_numbers = #tpu.dot_dimension_numbers<[1], [0], [0], [1], [0, 0, 1, 1], [], []>} : vector<16x16xf32>, vector<16x8xf32>, vector<16x8xf32> -> vector<16x8xf32>
    %369 = tpu.concatenate %320, %336, %352, %368 in 1 : vector<16x8xf32>, vector<16x8xf32>, vector<16x8xf32>, vector<16x8xf32> -> vector<16x32xf32>
    %cst_103 = arith.constant dense<0.000000e+00> : vector<16x32xf32>
    %370 = tpu.matmul %369, %304, %cst_103 {dimension_numbers = #tpu.dot_dimension_numbers<[1], [0], [0], [1], [0, 0, 1, 1], [], []>} : vector<16x32xf32>, vector<32x32xf32>, vector<16x32xf32> -> vector<16x32xf32>
    %371 = arith.addf %285, %370 : vector<16x32xf32>
    %372 = vector.extract_strided_slice %2 {offsets = [5, 0], sizes = [1, 32], strides = [1, 1]} : vector<8x128xf32> to vector<1x32xf32>
    %373 = arith.mulf %371, %371 : vector<16x32xf32>
    %cst_104 = arith.constant dense<0.000000e+00> : vector<16xf32>
    %374 = vector.multi_reduction <add>, %373, %cst_104 [1] : vector<16x32xf32> to vector<16xf32>
    %375 = vector.shape_cast %374 : vector<16xf32> to vector<16x1xf32>
    %cst_105 = arith.constant 3.200000e+01 : f32
    %376 = vector.broadcast %cst_105 : f32 to vector<16x1xf32>
    %377 = arith.divf %375, %376 : vector<16x1xf32>
    %cst_106 = arith.constant 9.99999997E-7 : f32
    %378 = vector.broadcast %cst_106 : f32 to vector<16x1xf32>
    %379 = arith.addf %377, %378 : vector<16x1xf32>
    %380 = math.rsqrt %379 : vector<16x1xf32>
    %381 = vector.broadcast %380 : vector<16x1xf32> to vector<16x32xf32>
    %382 = arith.mulf %371, %381 : vector<16x32xf32>
    %383 = vector.broadcast %372 : vector<1x32xf32> to vector<16x32xf32>
    %384 = arith.mulf %382, %383 : vector<16x32xf32>
    %cst_107 = arith.constant dense<0.000000e+00> : vector<16x64xf32>
    %385 = tpu.matmul %384, %199, %cst_107 {dimension_numbers = #tpu.dot_dimension_numbers<[1], [0], [0], [1], [0, 0, 1, 1], [], []>} : vector<16x32xf32>, vector<32x64xf32>, vector<16x64xf32> -> vector<16x64xf32>
    %cst_108 = arith.constant 0.000000e+00 : f32
    %386 = vector.broadcast %cst_108 : f32 to vector<16x64xf32>
    %387 = arith.maximumf %385, %386 : vector<16x64xf32>
    %cst_109 = arith.constant dense<0.000000e+00> : vector<16x32xf32>
    %388 = tpu.matmul %387, %200, %cst_109 {dimension_numbers = #tpu.dot_dimension_numbers<[1], [0], [0], [1], [0, 0, 1, 1], [], []>} : vector<16x64xf32>, vector<64x32xf32>, vector<16x32xf32> -> vector<16x32xf32>
    %389 = arith.addf %371, %388 : vector<16x32xf32>
    %390 = vector.extract_strided_slice %2 {offsets = [6, 0], sizes = [1, 32], strides = [1, 1]} : vector<8x128xf32> to vector<1x32xf32>
    %391 = arith.mulf %389, %389 : vector<16x32xf32>
    %cst_110 = arith.constant dense<0.000000e+00> : vector<16xf32>
    %392 = vector.multi_reduction <add>, %391, %cst_110 [1] : vector<16x32xf32> to vector<16xf32>
    %393 = vector.shape_cast %392 : vector<16xf32> to vector<16x1xf32>
    %cst_111 = arith.constant 3.200000e+01 : f32
    %394 = vector.broadcast %cst_111 : f32 to vector<16x1xf32>
    %395 = arith.divf %393, %394 : vector<16x1xf32>
    %cst_112 = arith.constant 9.99999997E-7 : f32
    %396 = vector.broadcast %cst_112 : f32 to vector<16x1xf32>
    %397 = arith.addf %395, %396 : vector<16x1xf32>
    %398 = math.rsqrt %397 : vector<16x1xf32>
    %399 = vector.broadcast %398 : vector<16x1xf32> to vector<16x32xf32>
    %400 = arith.mulf %389, %399 : vector<16x32xf32>
    %401 = vector.broadcast %390 : vector<1x32xf32> to vector<16x32xf32>
    %402 = arith.mulf %400, %401 : vector<16x32xf32>
    %c320 = arith.constant 320 : index
    %c0_113 = arith.constant 0 : index
    %403 = vector.load %arg1[%c320, %c0_113] : memref<376x128xf32, #tpu.memory_space<vmem>>, vector<32x128xf32>
    %cst_114 = arith.constant dense<0.000000e+00> : vector<16x128xf32>
    %404 = tpu.matmul %402, %403, %cst_114 {dimension_numbers = #tpu.dot_dimension_numbers<[1], [0], [0], [1], [0, 0, 1, 1], [], []>} : vector<16x32xf32>, vector<32x128xf32>, vector<16x128xf32> -> vector<16x128xf32>
    %c0_115 = arith.constant 0 : index
    %c0_116 = arith.constant 0 : index
    %405 = vector.load %arg2[%c0_115, %c0_116] : memref<16x128xf32, #tpu.memory_space<vmem>>, vector<16x128xf32>
    tpu.vector_store %arg2[%c0_115, %c0_116], %404 {strides = array<i32>} : memref<16x128xf32, #tpu.memory_space<vmem>>, vector<16x128xf32>,
    return
  }
}

</mosaic_0001>

<bundles_post_ra>
// kernel: t5_decoder_top_mocker_forward.1
= control target key start
LH: loop header
LB: loop body
LE: loop exit
PB: predicated region body
PF: predicated region fallthrough
CT: control target
= control target key end

     0   :  { %vm41_vm0 = vcmask 261120   ;;  %s3886_s0 = inlined_call_operand.vmem [shape: f32[32,32], index: 0, kind: input, shape index: {}]   ;;  %s3887_s1 = inlined_call_operand.vmem [shape: f32[376,128], index: 1, kind: input, shape index: {}]   ;;  %s3888_s2 = inlined_call_operand.hbm [shape: f32[16,128], index: 2, kind: output, shape index: {}]  }
   0x1   :  { %v3009_v0 = vld [vmem:[%s3886_s0 + $0x8] sm:$0xff] }
   0x2   :  { %7 = vsyncpa [#allocation3], 0  ;;  %v40_v1 = vmul.f32 %v3009_v0, %v3009_v0  ;;  %v3016_v2 = vld [vmem:[%s3886_s0] sm:$0xff]  ;;  %v2973_v6 = vmov 32.0   ;;  %v3025_v10 = vld [vmem:[%s3887_s1 + $0x18] sm:$0xff]  ;;  %s2974_s23 = smov 88  }
   0x3   :  { %v39_v4 = vmul.f32 %v3016_v2, %v3016_v2  ;;  %2783 = vrcp.f32 %v2973_v6  ;;  %2641 = vmatpush.msra.mxu3 %v3025_v10  ;;  %102 = vmatpush.msra.mxu0 %v3025_v10  ;;  %v3032_v11 = vld [vmem:[%s3887_s1 + $0x10] sm:$0xff]  ;;  %v3039_v13 = vld [vmem:[%s3887_s1 + $0x8] sm:$0xff]  ;;  %v3046_v14 = vld [vmem:[%s3887_s1] sm:$0xff]  ;;  %s2975_s24 = smov 96   ;;  %s2976_s25 = smov 120   ;;  %vm119_vm8 = vcmask 64512  }
   0x4   :  { %v45_v3 = vsel %vm41_vm0, %v40_v1, 0.0  ;;  %v3057_v28 = vld [vmem:[%s3887_s1 + $0x160] sm:$0xff]  ;;  %s2977_s26 = smov 104   ;;  %s2978_s27 = smov 72   ;;  %v3117_v59 = vld [vmem:[%s3887_s1 + $0x168] sm:$0xff]  ;;  %vm151_vm9 = vcmask 130048  }
   0x5   :  { %46 = vadd.xlane.f32.xlu0 %v45_v3  ;;  %v42_v5 = vsel %vm41_vm0, %v39_v4, 0.0  ;;  %2642 = vmatpush.msra.mxu3 %v3032_v11  ;;  %v81_v32 = vperm.slane %v3057_v28, 0  ;;  %s2979_s28 = smov 80   ;;  %s2980_s29 = smov 112   ;;  %v3126_v4 = vld [vmem:[%s3887_s1 + $0x170] sm:$0xff]  ;;  %vm525_vm10 = vcmask 195584  }
   0x6   :  { %103 = vmatpush.msra.mxu0 %v3032_v11  ;;  %s2981_s6 = smov 64   ;;  %s2982_s7 = smov 40  }
   0x7   :  { %2643 = vmatpush.msra.mxu3 %v3039_v13  ;;  %s2983_s8 = smov 56   ;;  %s2984_s9 = smov 48  }
   0x8   :  { %104 = vmatpush.msra.mxu0 %v3039_v13  ;;  %s2985_s10 = smov 32   ;;  %s2986_s11 = smov 8  }
   0x9   :  { %v2784_v7 = vpop.eup %2783  ;;  %2644 = vmatpush.msra.mxu3 %v3046_v14  ;;  %s2987_s12 = smov 16   ;;  %s2988_s13 = smov 24  }
   0xa   :  { %v49_v8 = vmul.f32 32.0, %v2784_v7  ;;  %105 = vmatpush.msra.mxu0 %v3046_v14  ;;  %vm53_vm1 = vweird.f32 %v2784_v7 }
   0xc   :  { %v50_v9 = vsub.f32 1.0, %v49_v8 }
   0xd   :  { %43 = vadd.xlane.f32.xlu0 %v42_v5 }
   0xe   :  { %v51_v12 = vmul.f32 %v2784_v7, %v50_v9 }
  0x10   :  { %v52_v15 = vadd.f32 %v2784_v7, %v51_v12 }
  0x12   :  { %v3050_v16 = vsel %vm53_vm1, %v2784_v7, %v52_v15 }
  0x78   :  { %v47_v17 = vpop.xlane.xlu0 %46 }
  0x79   :  { %v56_v18 = vmul.f32 %v3050_v16, %v47_v17 }
  0x7b   :  { %v58_v19 = vadd.f32 1e-06, %v56_v18 }
  0x7d   :  { %2785 = vrsqrt.f32 %v58_v19  ;;  %vm75_vm3 = vweird.f32 %v58_v19 }
  0x80   :  { %v44_v20 = vpop.xlane.xlu0 %43 }
  0x81   :  { %v55_v21 = vmul.f32 %v3050_v16, %v44_v20 }
  0x83   :  { %v2786_v22 = vpop.eup %2785  ;;  %v57_v23 = vadd.f32 1e-06, %v55_v21 }
  0x84   :  { %v70_v24 = vmul.f32 %v2786_v22, %v58_v19  ;;  %vm76_vm2 = vweird.f32 %v2786_v22 }
  0x85   :  { %2787 = vrsqrt.f32 %v57_v23  ;;  %vm77_vm4 = vmor %vm75_vm3, %vm76_vm2  ;;  %vm65_vm5 = vweird.f32 %v57_v23 }
  0x86   :  { %v71_v25 = vmul.f32 %v2786_v22, %v70_v24 }
  0x88   :  { %v72_v26 = vmul.f32 0.5, %v71_v25 }
  0x8a   :  { %v73_v27 = vsub.f32 1.5, %v72_v26 }
  0x8b   :  { %v2788_v29 = vpop.eup %2787 }
  0x8c   :  { %v60_v30 = vmul.f32 %v2788_v29, %v57_v23  ;;  %v74_v31 = vmul.f32 %v2786_v22, %v73_v27  ;;  %vm66_vm6 = vweird.f32 %v2788_v29 }
  0x8d   :  { %vm67_vm7 = vmor %vm65_vm5, %vm66_vm6 }
  0x8e   :  { %v61_v33 = vmul.f32 %v2788_v29, %v60_v30  ;;  %v78_v34 = vsel %vm77_vm4, %v2786_v22, %v74_v31 }
  0x8f   :  { %v80_v35 = vmul.f32 %v78_v34, %v3009_v0 }
  0x90   :  { %v62_v36 = vmul.f32 0.5, %v61_v33 }
  0x91   :  { %v83_v37 = vmul.f32 %v81_v32, %v80_v35 }
  0x92   :  { %v63_v38 = vsub.f32 1.5, %v62_v36 }
  0x93   :  { %2516 = vmatmul.msk.f32.vlgmr.msra.gmra.mxu3 %vm41_vm0, %v83_v37 }
  0x94   :  { %v64_v39 = vmul.f32 %v2788_v29, %v63_v38 }
  0x96   :  { %v68_v40 = vsel %vm67_vm7, %v2788_v29, %v64_v39 }
  0x97   :  { %v79_v41 = vmul.f32 %v68_v40, %v3016_v2 }
  0x99   :  { %v82_v42 = vmul.f32 %v81_v32, %v79_v41 }
  0x9b   :  { %2515 = vmatmul.msk.f32.vlgmr.msra.gmra.mxu0 %vm41_vm0, %v82_v42 }
 0x116   :  { %v3064_v43 = vpop.f32.mrf.mxu3 }
 0x117   :  { %215 = vrot.lane.b32.xlu2 %v3064_v43, %s2974_s23  ;;  %117 = vrot.lane.b32.xlu1 %v3064_v43, %s2975_s24 }
 0x118   :  { %v3070_v44 = vpop.f32.mrf.mxu0 }
 0x119   :  { %209 = vrot.lane.b32.xlu0 %v3070_v44, %s2976_s25  ;;  %v2663_v29 = vpack.i.bf16 %v3070_v44, %v3064_v43 }
 0x11f   :  { %213 = vrot.lane.b32.xlu2 %v3070_v44, %s2974_s23  ;;  %115 = vrot.lane.b32.xlu1 %v3070_v44, %s2975_s24 }
 0x121   :  { %403 = vrot.lane.b32.xlu0 %v3064_v43, %s2977_s26 }
 0x127   :  { %407 = vrot.lane.b32.xlu2 %v3064_v43, %s2978_s27  ;;  %211 = vrot.lane.b32.xlu1 %v3064_v43, %s2976_s25 }
 0x12f   :  { %401 = vrot.lane.b32.xlu2 %v3070_v44, %s2977_s26  ;;  %405 = vrot.lane.b32.xlu1 %v3070_v44, %s2978_s27 }
 0x137   :  { %309 = vrot.lane.b32.xlu2 %v3070_v44, %s2979_s28  ;;  %311 = vrot.lane.b32.xlu1 %v3064_v43, %s2979_s28 }
 0x13f   :  { %307 = vrot.lane.b32.xlu2 %v3064_v43, %s2980_s29  ;;  %305 = vrot.lane.b32.xlu1 %v3070_v44, %s2980_s29 }
 0x171   :  { %v216_v45 = vpop.permute.xlu2 %215 }
 0x172   :  { %2523 = vmatpush.xpose.msk.msrb.mxu3 %vm119_vm8, %v216_v45 }
 0x179   :  { %v214_v46 = vpop.permute.xlu2 %213 }
 0x17a   :  { %2524 = vmatpush.xpose.msk.msrb.mxu3 %vm119_vm8, %v214_v46 }
 0x181   :  { %v408_v47 = vpop.permute.xlu2 %407 }
 0x182   :  { %2535 = vmatpush.xpose.msk.msra.mxu3 %vm119_vm8, %v408_v47 }
 0x189   :  { %v118_v48 = vpop.permute.xlu1 %117  ;;  %v402_v53 = vpop.permute.xlu2 %401 }
 0x18a   :  { %2517 = vmatpush.xpose.msk.msra.mxu1 %vm119_vm8, %v118_v48 }
 0x18b   :  { %v210_v49 = vpop.permute.xlu0 %209 }
 0x18c   :  { %2525 = vmatmul.msk.f32.vlgmr.msrb.gmra.mxu3 %vm119_vm8, %v210_v49 }
 0x191   :  { %v116_v50 = vpop.permute.xlu1 %115  ;;  %v310_v56 = vpop.permute.xlu2 %309 }
 0x192   :  { %2518 = vmatpush.xpose.msk.msra.mxu1 %vm119_vm8, %v116_v50 }
 0x193   :  { %v404_v55 = vpop.permute.xlu0 %403 }
 0x195   :  { %2519 = vmatmul.msk.f32.vlgmr.msra.gmra.mxu1 %vm119_vm8, %v3070_v44 }
 0x199   :  { %v212_v51 = vpop.permute.xlu1 %211  ;;  %v308_v58 = vpop.permute.xlu2 %307 }
 0x19a   :  { %2526 = vmatmul.msk.f32.gmra.mxu3 %vm119_vm8, %v212_v51 }
 0x19d   :  { %2520 = vmatmul.msk.f32.gmra.mxu1 %vm119_vm8, %v3064_v43 }
 0x1a1   :  { %v406_v52 = vpop.permute.xlu1 %405 }
 0x1a2   :  { %2536 = vmatpush.xpose.msk.msra.mxu3 %vm119_vm8, %v406_v52 }
 0x1a5   :  { %2537 = vmatmul.msk.f32.vlgmr.msra.gmra.mxu3 %vm119_vm8, %v402_v53 }
 0x1a9   :  { %v312_v54 = vpop.permute.xlu1 %311 }
 0x1aa   :  { %2529 = vmatpush.xpose.msk.msrb.mxu0 %vm119_vm8, %v312_v54 }
 0x1ad   :  { %2538 = vmatmul.msk.f32.gmra.mxu3 %vm119_vm8, %v404_v55 }
 0x1ae   :  { %2530 = vmatpush.xpose.msk.msrb.mxu0 %vm119_vm8, %v310_v56 }
 0x1b1   :  { %v306_v57 = vpop.permute.xlu1 %305 }
 0x1b2   :  { %2531 = vmatmul.msk.f32.vlgmr.msrb.gmra.mxu0 %vm119_vm8, %v306_v57 }
 0x1ba   :  { %2532 = vmatmul.msk.f32.gmra.mxu0 %vm119_vm8, %v308_v58 }
 0x20f   :  { %v242_v60 = vpop.f32.mrf.mxu3 }
 0x210   :  { %v243_v61 = vadd.f32 %v242_v60, %v3117_v59 }
 0x212   :  { %v145_v62 = vpop.f32.mrf.mxu1  ;;  %v248_v63 = vsel %vm151_vm9, %v243_v61, -inf }
 0x213   :  { %v146_v1 = vadd.f32 %v145_v62, %v3117_v59  ;;  %249 = vmax.xlane.f32.xlu2 %v248_v63 }
 0x215   :  { %v152_v3 = vsel %vm151_vm9, %v146_v1, -inf }
 0x216   :  { %153 = vmax.xlane.f32.xlu0 %v152_v3 }
 0x21a   :  { %v148_v19 = vpop.f32.mrf.mxu1 }
 0x21b   :  { %v149_v21 = vadd.f32 %v148_v19, %v3126_v4 }
 0x21d   :  { %v245_v5 = vpop.f32.mrf.mxu3  ;;  %v155_v25 = vsel %vm151_vm9, %v149_v21, -inf }
 0x21e   :  { %v246_v6 = vadd.f32 %v245_v5, %v3126_v4 }
 0x220   :  { %v251_v7 = vsel %vm151_vm9, %v246_v6, -inf }
 0x221   :  { %252 = vmax.xlane.f32.xlu0 %v251_v7 }
 0x228   :  { %v434_v8 = vpop.f32.mrf.mxu3 }
 0x229   :  { %v435_v26 = vadd.f32 %v434_v8, %v3117_v59 }
 0x22b   :  { %v440_v27 = vsel %vm151_vm9, %v435_v26, -inf }
 0x22f   :  { %v338_v9 = vpop.f32.mrf.mxu0 }
 0x230   :  { %v339_v12 = vadd.f32 %v338_v9, %v3117_v59  ;;  %v437_v15 = vpop.f32.mrf.mxu3 }
 0x231   :  { %v3132_v17 = vadd.f32 %v437_v15, %v3126_v4 }
 0x232   :  { %v344_v18 = vsel %vm151_vm9, %v339_v12, -inf }
 0x233   :  { %345 = vmax.xlane.f32.xlu1 %v344_v18  ;;  %v443_v20 = vsel %vm151_vm9, %v3132_v17, -inf }
 0x234   :  { %444 = vmax.xlane.f32.xlu0 %v443_v20 }
 0x237   :  { %v341_v22 = vpop.f32.mrf.mxu0 }
 0x238   :  { %v3139_v23 = vadd.f32 %v341_v22, %v3126_v4 }
 0x23a   :  { %v347_v24 = vsel %vm151_vm9, %v3139_v23, -inf }
 0x23b   :  { %348 = vmax.xlane.f32.xlu2 %v347_v24  ;;  %156 = vmax.xlane.f32.xlu1 %v155_v25 }
 0x243   :  { %441 = vmax.xlane.f32.xlu2 %v440_v27 }
 0x248   :  { %2664 = vrot.lane.b32.xlu0 %v2663_v29, %s2981_s6 }
 0x286   :  { %v250_v30 = vpop.xlane.xlu2 %249 }
 0x287   :  { %v254_v33 = vsub.f32 %v243_v61, %v250_v30 }
 0x289   :  { %v154_v31 = vpop.xlane.xlu0 %153  ;;  %v256_v35 = vmul.f32 1.442695, %v254_v33 }
 0x28a   :  { %v158_v32 = vsub.f32 %v146_v1, %v154_v31 }
 0x28c   :  { %v160_v34 = vmul.f32 1.442695, %v158_v32 }
 0x28e   :  { %2789 = vpow2.f32 %v160_v34 }
 0x28f   :  { %2791 = vpow2.f32 %v256_v35 }
 0x294   :  { %v3149_v36 = vpop.eup %2789  ;;  %v253_v37 = vpop.xlane.xlu0 %252 }
 0x295   :  { %v255_v38 = vsub.f32 %v246_v6, %v253_v37  ;;  %v164_v39 = vsel %vm151_vm9, %v3149_v36, 0.0  ;;  %v3153_v41 = vpop.eup %2791 }
 0x296   :  { %165 = vadd.xlane.f32.xlu1 %v164_v39  ;;  %v260_v42 = vsel %vm151_vm9, %v3153_v41, 0.0 }
 0x297   :  { %v258_v40 = vmul.f32 1.442695, %v255_v38 }
 0x299   :  { %2793 = vpow2.f32 %v258_v40 }
 0x29e   :  { %261 = vadd.xlane.f32.xlu1 %v260_v42 }
 0x29f   :  { %v3157_v43 = vpop.eup %2793 }
 0x2a0   :  { %v263_v44 = vsel %vm151_vm9, %v3157_v43, 0.0 }
 0x2a6   :  { %264 = vadd.xlane.f32.xlu1 %v263_v44  ;;  %v346_v45 = vpop.xlane.xlu1 %345 }
 0x2a7   :  { %v350_v46 = vsub.f32 %v339_v12, %v346_v45  ;;  %v445_v53 = vpop.xlane.xlu0 %444 }
 0x2a8   :  { %v447_v5 = vsub.f32 %v3132_v17, %v445_v53  ;;  %v2688_v53 = vpack.i.bf16 %v3046_v14, %v3039_v13 }
 0x2a9   :  { %v352_v47 = vmul.f32 1.442695, %v350_v46 }
 0x2aa   :  { %v450_v7 = vmul.f32 1.442695, %v447_v5 }
 0x2ab   :  { %2795 = vpow2.f32 %v352_v47 }
 0x2ae   :  { %v349_v48 = vpop.xlane.xlu2 %348  ;;  %v157_v49 = vpop.xlane.xlu1 %156 }
 0x2af   :  { %v159_v50 = vsub.f32 %v149_v21, %v157_v49  ;;  %v351_v6 = vsub.f32 %v3139_v23, %v349_v48 }
 0x2b1   :  { %v3161_v51 = vpop.eup %2795  ;;  %v162_v52 = vmul.f32 1.442695, %v159_v50  ;;  %v354_v8 = vmul.f32 1.442695, %v351_v6 }
 0x2b2   :  { %v356_v54 = vsel %vm151_vm9, %v3161_v51, 0.0 }
 0x2b3   :  { %357 = vadd.xlane.f32.xlu1 %v356_v54  ;;  %2797 = vpow2.f32 %v162_v52 }
 0x2b6   :  { %v442_v55 = vpop.xlane.xlu2 %441 }
 0x2b7   :  { %v446_v56 = vsub.f32 %v435_v26, %v442_v55 }
 0x2b9   :  { %v448_v57 = vmul.f32 1.442695, %v446_v56  ;;  %v2798_v58 = vpop.eup %2797 }
 0x2ba   :  { %v2665_v60 = vpop.permute.xlu0 %2664  ;;  %v167_v61 = vsel %vm151_vm9, %v2798_v58, 0.0 }
 0x2bb   :  { %2799 = vpow2.f32 %v448_v57  ;;  %v2666_v62 = vunpack.i.l.bf16 %v2665_v60  ;;  %168 = vadd.xlane.f32.xlu2 %v167_v61  ;;  %v2667_v63 = vunpack.i.h.bf16 %v2665_v60 }
 0x2bc   :  { %2801 = vpow2.f32 %v450_v7 }
 0x2bd   :  { %200 = vmatpush.msra.mxu2 %v2666_v62  ;;  %2803 = vpow2.f32 %v354_v8 }
 0x2bf   :  { %201 = vmatpush.msra.mxu2 %v2667_v63 }
 0x2c1   :  { %v3166_v1 = vpop.eup %2799 }
 0x2c2   :  { %v452_v3 = vsel %vm151_vm9, %v3166_v1, 0.0  ;;  %v2802_v9 = vpop.eup %2801 }
 0x2c3   :  { %453 = vadd.xlane.f32.xlu0 %v452_v3  ;;  %v2804_v12 = vpop.eup %2803  ;;  %v455_v15 = vsel %vm151_vm9, %v2802_v9, 0.0 }
 0x2c4   :  { %v359_v18 = vsel %vm151_vm9, %v2804_v12, 0.0 }
 0x2cc   :  { %2674 = vrot.lane.b32.xlu1 %v2663_v29, %s2982_s7 }
 0x2d3   :  { %2669 = vrot.lane.b32.xlu2 %v2663_v29, %s2983_s8 }
 0x2d4   :  { %2679 = vrot.lane.b32.xlu1 %v2663_v29, %s2984_s9 }
 0x2fc   :  { %456 = vadd.xlane.f32.xlu2 %v455_v15  ;;  %v3214_v15 = vld [vmem:[%s3887_s1 + $0x30] sm:$0xff] }
 0x2fe   :  { %360 = vadd.xlane.f32.xlu1 %v359_v18  ;;  %v3221_v18 = vld [vmem:[%s3887_s1 + $0x28] sm:$0xff] }
 0x309   :  { %v166_v19 = vpop.xlane.xlu1 %165 }
 0x30a   :  { %2805 = vrcp.f32 %v166_v19  ;;  %v3228_v19 = vld [vmem:[%s3887_s1 + $0x20] sm:$0xff] }
 0x310   :  { %v2806_v20 = vpop.eup %2805 }
 0x311   :  { %v172_v21 = vmul.f32 %v2806_v20, %v3149_v36  ;;  %v262_v17 = vpop.xlane.xlu1 %261 }
 0x313   :  { %2521 = vmatmul.msk.f32.vlgmr.msra.gmra.mxu2 %vm151_vm9, %v172_v21 }
 0x319   :  { %v265_v22 = vpop.xlane.xlu1 %264 }
 0x326   :  { %v358_v25 = vpop.xlane.xlu1 %357 }
 0x32e   :  { %v169_v23 = vpop.xlane.xlu2 %168 }
 0x32f   :  { %2807 = vrcp.f32 %v169_v23 }
 0x330   :  { %2809 = vrcp.f32 %v262_v17 }
 0x331   :  { %2811 = vrcp.f32 %v265_v22 }
 0x332   :  { %2813 = vrcp.f32 %v358_v25  ;;  %v14_v25 = vld [vmem:[%s3886_s0 + $0x10] sm:$0xff] }
 0x335   :  { %v2808_v24 = vpop.eup %2807 }
 0x336   :  { %v2670_v26 = vpop.permute.xlu2 %2669  ;;  %v173_v27 = vmul.f32 %v2808_v24, %v2798_v58  ;;  %v2810_v31 = vpop.eup %2809 }
 0x337   :  { %v2671_v29 = vunpack.i.l.bf16 %v2670_v26  ;;  %v2672_v30 = vunpack.i.h.bf16 %v2670_v26  ;;  %v268_v34 = vmul.f32 %v2810_v31, %v3153_v41  ;;  %v454_v36 = vpop.xlane.xlu0 %453  ;;  %v2812_v37 = vpop.eup %2811  ;;  %v15_v26 = vld [vmem:[%s3886_s0 + $0x18] sm:$0xff] }
 0x338   :  { %2522 = vmatmul.msk.f32.gmra.mxu2 %vm151_vm9, %v173_v27  ;;  %2815 = vrcp.f32 %v454_v36  ;;  %v2814_v39 = vpop.eup %2813  ;;  %v269_v40 = vmul.f32 %v2812_v37, %v3157_v43  ;;  %v2683_v43 = vpack.i.bf16 %v3032_v11, %v3025_v10 }
 0x339   :  { %296 = vmatpush.msrb.mxu2 %v2671_v29  ;;  %v364_v41 = vmul.f32 %v2814_v39, %v3161_v51 }
 0x33a   :  { %2684 = vrot.lane.b32.xlu0 %v2683_v43, %s2985_s10 }
 0x33b   :  { %297 = vmatpush.msrb.mxu2 %v2672_v30 }
 0x33e   :  { %v2675_v32 = vpop.permute.xlu1 %2674  ;;  %v2816_v45 = vpop.eup %2815 }
 0x33f   :  { %v2676_v33 = vunpack.i.l.bf16 %v2675_v32  ;;  %v2677_v35 = vunpack.i.h.bf16 %v2675_v32  ;;  %v460_v46 = vmul.f32 %v2816_v45, %v3166_v1 }
 0x340   :  { %2527 = vmatmul.msk.f32.vlgmr.msrb.gmra.mxu2 %vm151_vm9, %v268_v34 }
 0x341   :  { %488 = vmatpush.msra.mxu2 %v2676_v33 }
 0x342   :  { %2689 = vrot.lane.b32.xlu0 %v2688_v53, %s2985_s10 }
 0x343   :  { %489 = vmatpush.msra.mxu2 %v2677_v35 }
 0x346   :  { %v2680_v38 = vpop.permute.xlu1 %2679 }
 0x347   :  { %v2681_v42 = vunpack.i.l.bf16 %v2680_v38  ;;  %v2682_v44 = vunpack.i.h.bf16 %v2680_v38 }
 0x348   :  { %2528 = vmatmul.msk.f32.gmra.mxu2 %vm151_vm9, %v269_v40 }
 0x349   :  { %392 = vmatpush.msrb.mxu1 %v2681_v42 }
 0x34b   :  { %393 = vmatpush.msrb.mxu1 %v2682_v44 }
 0x34c   :  { %2533 = vmatmul.msk.f32.vlgmr.msrb.gmra.mxu1 %vm151_vm9, %v364_v41 }
 0x350   :  { %2539 = vmatmul.msk.f32.vlgmr.msra.gmra.mxu2 %vm151_vm9, %v460_v46  ;;  %v609_v46 = vperm.slane %v3057_v28, 1 }
 0x36f   :  { %v457_v47 = vpop.xlane.xlu2 %456 }
 0x370   :  { %2817 = vrcp.f32 %v457_v47 }
 0x371   :  { %v361_v48 = vpop.xlane.xlu1 %360 }
 0x372   :  { %2819 = vrcp.f32 %v361_v48 }
 0x376   :  { %v2818_v49 = vpop.eup %2817 }
 0x377   :  { %v461_v52 = vmul.f32 %v2818_v49, %v2802_v9 }
 0x378   :  { %v2820_v50 = vpop.eup %2819 }
 0x379   :  { %v365_v51 = vmul.f32 %v2820_v50, %v2804_v12  ;;  %2540 = vmatmul.msk.f32.gmra.mxu2 %vm151_vm9, %v461_v52  ;;  %v3209_v12 = vld [vmem:[%s3887_s1 + $0x38] sm:$0xff] }
 0x37a   :  { %659 = vmatpush.msrb.mxu3 %v3209_v12  ;;  %630 = vmatpush.msra.mxu1 %v3209_v12 }
 0x37b   :  { %2534 = vmatmul.msk.f32.gmra.mxu1 %vm151_vm9, %v365_v51 }
 0x37c   :  { %660 = vmatpush.msrb.mxu3 %v3214_v15  ;;  %631 = vmatpush.msra.mxu1 %v3214_v15 }
 0x37e   :  { %661 = vmatpush.msrb.mxu3 %v3221_v18  ;;  %632 = vmatpush.msra.mxu1 %v3221_v18 }
 0x380   :  { %662 = vmatpush.msrb.mxu3 %v3228_v19  ;;  %633 = vmatpush.msra.mxu1 %v3228_v19 }
 0x381   :  { %2545 = vmatmul.msk.f32.vlgmr.msrb.gmra.mxu3 %vm41_vm0, %v14_v25 }
 0x389   :  { %2546 = vmatmul.msk.f32.gmra.mxu3 %vm41_vm0, %v15_v26 }
 0x396   :  { %v203_v54 = vpop.f32.mrf.mxu2 }
 0x3ac   :  { %v2685_v58 = vpop.permute.xlu0 %2684 }
 0x3ad   :  { %v2687_v60 = vunpack.i.h.bf16 %v2685_v58  ;;  %v2686_v61 = vunpack.i.l.bf16 %v2685_v58 }
 0x3af   :  { %562 = vmatpush.msra.mxu0 %v2686_v61 }
 0x3b1   :  { %563 = vmatpush.msra.mxu0 %v2687_v60 }
 0x3b4   :  { %v2690_v62 = vpop.permute.xlu0 %2689 }
 0x3b5   :  { %v2692_v63 = vunpack.i.h.bf16 %v2690_v62  ;;  %v2691_v1 = vunpack.i.l.bf16 %v2690_v62 }
 0x3b7   :  { %564 = vmatpush.msra.mxu0 %v2691_v1 }
 0x3b9   :  { %565 = vmatpush.msra.mxu0 %v2692_v63 }
 0x3bb   :  { %v206_v55 = vpop.f32.mrf.mxu2 }
 0x3c3   :  { %v299_v56 = vpop.f32.mrf.mxu2 }
 0x3c4   :  { %499 = vrot.lane.b32.xlu2 %v299_v56, %s2986_s11 }
 0x3c9   :  { %v395_v10 = vpop.f32.mrf.mxu1 }
 0x3ca   :  { %507 = vrot.lane.b32.xlu0 %v395_v10, %s2987_s12 }
 0x3cb   :  { %v302_v11 = vpop.f32.mrf.mxu2 }
 0x3cc   :  { %501 = vrot.lane.b32.xlu2 %v302_v11, %s2986_s11 }
 0x3d3   :  { %v491_v57 = vpop.f32.mrf.mxu2 }
 0x3d4   :  { %515 = vrot.lane.b32.xlu0 %v491_v57, %s2988_s13 }
 0x3f8   :  { %v398_v13 = vpop.f32.mrf.mxu1 }
 0x3f9   :  { %509 = vrot.lane.b32.xlu1 %v398_v13, %s2987_s12 }
 0x3fc   :  { %v494_v14 = vpop.f32.mrf.mxu2 }
 0x3fd   :  { %517 = vrot.lane.b32.xlu0 %v494_v14, %s2988_s13 }
 0x404   :  { %v3258_v36 = vpop.f32.mrf.mxu3 }
 0x41e   :  { %v500_v5 = vpop.permute.xlu2 %499 }
 0x41f   :  { %v521_v6 = vsel %vm119_vm8, %v203_v54, %v500_v5 }
 0x426   :  { %v502_v20 = vpop.permute.xlu2 %501 }
 0x427   :  { %v522_v17 = vsel %vm119_vm8, %v206_v55, %v502_v20 }
 0x43c   :  { %v508_v3 = vpop.permute.xlu0 %507 }
 0x43d   :  { %v523_v7 = vsel %vm151_vm9, %v521_v6, %v508_v3 }
 0x446   :  { %v516_v8 = vpop.permute.xlu0 %515 }
 0x447   :  { %v526_v9 = vsel %vm525_vm10, %v523_v7, %v516_v8 }
 0x448   :  { %2541 = vmatmul.msk.f32.vlgmr.msra.gmra.mxu0 %vm41_vm0, %v526_v9 }
 0x46b   :  { %v510_v21 = vpop.permute.xlu1 %509 }
 0x46c   :  { %v524_v22 = vsel %vm151_vm9, %v522_v17, %v510_v21 }
 0x46f   :  { %v518_v23 = vpop.permute.xlu0 %517 }
 0x470   :  { %v527_v24 = vsel %vm525_vm10, %v524_v22, %v518_v23 }
 0x471   :  { %2542 = vmatmul.msk.f32.gmra.mxu0 %vm41_vm0, %v527_v24 }
 0x4c5   :  { %v567_v27 = vpop.f32.mrf.mxu0 }
 0x4c6   :  { %v3247_v29 = vadd.f32 %v567_v27, %v3016_v2  ;;  %v3262_v2 = vpop.f32.mrf.mxu3 }
 0x4c7   :  { %674 = vrot.lane.b32.xlu1 %v3262_v2, %s2975_s24 }
 0x4c8   :  { %v575_v30 = vmul.f32 %v3247_v29, %v3247_v29 }
 0x4ca   :  { %v577_v31 = vsel %vm41_vm0, %v575_v30, 0.0 }
 0x4cb   :  { %578 = vadd.xlane.f32.xlu2 %v577_v31 }
 0x4cf   :  { %772 = vrot.lane.b32.xlu1 %v3262_v2, %s2974_s23 }
 0x4d7   :  { %672 = vrot.lane.b32.xlu1 %v3258_v36, %s2975_s24 }
 0x4df   :  { %868 = vrot.lane.b32.xlu1 %v3262_v2, %s2979_s28 }
 0x4e3   :  { %770 = vrot.lane.b32.xlu2 %v3258_v36, %s2974_s23 }
 0x4eb   :  { %866 = vrot.lane.b32.xlu2 %v3258_v36, %s2979_s28 }
 0x4ee   :  { %v570_v32 = vpop.f32.mrf.mxu0 }
 0x4ef   :  { %v3253_v33 = vadd.f32 %v570_v32, %v3009_v0 }
 0x4f1   :  { %v576_v34 = vmul.f32 %v3253_v33, %v3253_v33 }
 0x4f3   :  { %v580_v35 = vsel %vm41_vm0, %v576_v34, 0.0 }
 0x4f4   :  { %581 = vadd.xlane.f32.xlu0 %v580_v35 }
 0x539   :  { %v675_v13 = vpop.permute.xlu1 %674 }
 0x53a   :  { %2547 = vmatpush.xpose.msk.msrb.mxu2 %vm119_vm8, %v675_v13 }
 0x53e   :  { %v579_v0 = vpop.xlane.xlu2 %578 }
 0x53f   :  { %v583_v37 = vmul.f32 %v579_v0, %v3050_v16 }
 0x541   :  { %v585_v38 = vadd.f32 1e-06, %v583_v37  ;;  %v773_v14 = vpop.permute.xlu1 %772 }
 0x542   :  { %2553 = vmatpush.xpose.msk.msrb.mxu1 %vm119_vm8, %v773_v14 }
 0x543   :  { %2821 = vrsqrt.f32 %v585_v38  ;;  %vm593_vm12 = vweird.f32 %v585_v38 }
 0x546   :  { %v771_v60 = vpop.permute.xlu2 %770 }
 0x547   :  { %2554 = vmatpush.xpose.msk.msrb.mxu1 %vm119_vm8, %v771_v60 }
 0x549   :  { %v2822_v39 = vpop.eup %2821  ;;  %v673_v58 = vpop.permute.xlu1 %672 }
 0x54a   :  { %v588_v40 = vmul.f32 %v2822_v39, %v585_v38  ;;  %vm594_vm11 = vweird.f32 %v2822_v39  ;;  %2548 = vmatpush.xpose.msk.msrb.mxu2 %vm119_vm8, %v673_v58 }
 0x54b   :  { %vm595_vm13 = vmor %vm593_vm12, %vm594_vm11  ;;  %vm1199_vm11 = vcmask 523264  }
 0x54c   :  { %v589_v42 = vmul.f32 %v2822_v39, %v588_v40 }
 0x54e   :  { %v590_v44 = vmul.f32 0.5, %v589_v42  ;;  %v867_v63 = vpop.permute.xlu2 %866 }
 0x550   :  { %v591_v41 = vsub.f32 1.5, %v590_v44 }
 0x551   :  { %v869_v61 = vpop.permute.xlu1 %868 }
 0x552   :  { %v592_v45 = vmul.f32 %v2822_v39, %v591_v41  ;;  %2559 = vmatpush.xpose.msk.msra.mxu2 %vm119_vm8, %v869_v61 }
 0x554   :  { %v596_v47 = vsel %vm595_vm13, %v2822_v39, %v592_v45 }
 0x555   :  { %v607_v48 = vmul.f32 %v596_v47, %v3247_v29 }
 0x556   :  { %2560 = vmatpush.xpose.msk.msra.mxu2 %vm119_vm8, %v867_v63 }
 0x557   :  { %v610_v43 = vmul.f32 %v609_v46, %v607_v48 }
 0x559   :  { %2543 = vmatmul.msk.f32.vlgmr.msra.gmra.mxu1 %vm41_vm0, %v610_v43 }
 0x567   :  { %v582_v49 = vpop.xlane.xlu0 %581 }
 0x568   :  { %v584_v50 = vmul.f32 %v582_v49, %v3050_v16 }
 0x56a   :  { %v586_v52 = vadd.f32 1e-06, %v584_v50 }
 0x56c   :  { %2823 = vrsqrt.f32 %v586_v52  ;;  %vm603_vm15 = vweird.f32 %v586_v52 }
 0x572   :  { %v2824_v51 = vpop.eup %2823 }
 0x573   :  { %v598_v53 = vmul.f32 %v2824_v51, %v586_v52  ;;  %vm604_vm14 = vweird.f32 %v2824_v51 }
 0x574   :  { %vm605_vm1 = vmor %vm603_vm15, %vm604_vm14 }
 0x575   :  { %v599_v54 = vmul.f32 %v2824_v51, %v598_v53 }
 0x577   :  { %v600_v55 = vmul.f32 0.5, %v599_v54 }
 0x579   :  { %v601_v56 = vsub.f32 1.5, %v600_v55 }
 0x57b   :  { %v602_v10 = vmul.f32 %v2824_v51, %v601_v56 }
 0x57d   :  { %v606_v28 = vsel %vm605_vm1, %v2824_v51, %v602_v10 }
 0x57e   :  { %v608_v11 = vmul.f32 %v606_v28, %v3253_v33  ;;  %v2698_v28 = vpack.i.bf16 %v3258_v36, %v3262_v2 }
 0x580   :  { %v611_v57 = vmul.f32 %v609_v46, %v608_v11 }
 0x582   :  { %2544 = vmatmul.msk.f32.gmra.mxu1 %vm41_vm0, %v611_v57 }
 0x5d6   :  { %v635_v62 = vpop.f32.mrf.mxu1 }
 0x5d7   :  { %958 = vrot.lane.b32.xlu2 %v635_v62, %s2977_s26  ;;  %766 = vrot.lane.b32.xlu1 %v635_v62, %s2976_s25 }
 0x5d8   :  { %2549 = vmatmul.msk.f32.vlgmr.msrb.gmra.mxu2 %vm119_vm8, %v635_v62 }
 0x5df   :  { %964 = vrot.lane.b32.xlu1 %v3262_v2, %s2978_s27 }
 0x5e7   :  { %862 = vrot.lane.b32.xlu1 %v635_v62, %s2980_s29 }
 0x5ff   :  { %v638_v1 = vpop.f32.mrf.mxu1 }
 0x600   :  { %960 = vrot.lane.b32.xlu1 %v638_v1, %s2977_s26  ;;  %768 = vrot.lane.b32.xlu0 %v638_v1, %s2976_s25 }
 0x601   :  { %2550 = vmatmul.msk.f32.gmra.mxu2 %vm119_vm8, %v638_v1 }
 0x608   :  { %962 = vrot.lane.b32.xlu0 %v3258_v36, %s2978_s27 }
 0x610   :  { %864 = vrot.lane.b32.xlu0 %v638_v1, %s2980_s29 }
 0x631   :  { %v959_v17 = vpop.permute.xlu2 %958 }
 0x649   :  { %v767_v3 = vpop.permute.xlu1 %766 }
 0x64a   :  { %2555 = vmatmul.msk.f32.vlgmr.msrb.gmra.mxu1 %vm119_vm8, %v767_v3 }
 0x651   :  { %v965_v5 = vpop.permute.xlu1 %964 }
 0x652   :  { %2565 = vmatpush.xpose.msk.msra.mxu1 %vm119_vm8, %v965_v5 }
 0x659   :  { %v863_v6 = vpop.permute.xlu1 %862 }
 0x65a   :  { %2561 = vmatmul.msk.f32.vlgmr.msra.gmra.mxu2 %vm119_vm8, %v863_v6 }
 0x65b   :  { %v703_v7 = vpop.f32.mrf.mxu2 }
 0x65c   :  { %v704_v8 = vadd.f32 %v703_v7, %v3117_v59 }
 0x65e   :  { %v709_v9 = vsel %vm151_vm9, %v704_v8, -inf }
 0x65f   :  { %710 = vmax.xlane.f32.xlu0 %v709_v9 }
 0x672   :  { %v769_v20 = vpop.permute.xlu0 %768  ;;  %v961_v24 = vpop.permute.xlu1 %960 }
 0x673   :  { %2556 = vmatmul.msk.f32.gmra.mxu1 %vm119_vm8, %v769_v20 }
 0x67a   :  { %v963_v21 = vpop.permute.xlu0 %962 }
 0x67b   :  { %2566 = vmatpush.xpose.msk.msra.mxu1 %vm119_vm8, %v963_v21 }
 0x67e   :  { %2567 = vmatmul.msk.f32.vlgmr.msra.gmra.mxu1 %vm119_vm8, %v959_v17 }
 0x682   :  { %v865_v22 = vpop.permute.xlu0 %864 }
 0x683   :  { %2562 = vmatmul.msk.f32.gmra.mxu2 %vm119_vm8, %v865_v22 }
 0x684   :  { %v706_v23 = vpop.f32.mrf.mxu2 }
 0x685   :  { %v707_v25 = vadd.f32 %v706_v23, %v3126_v4 }
 0x686   :  { %2568 = vmatmul.msk.f32.gmra.mxu1 %vm119_vm8, %v961_v24 }
 0x687   :  { %v712_v26 = vsel %vm151_vm9, %v707_v25, -inf }
 0x688   :  { %713 = vmax.xlane.f32.xlu2 %v712_v26 }
 0x6c7   :  { %v799_v27 = vpop.f32.mrf.mxu1 }
 0x6c8   :  { %v800_v30 = vadd.f32 %v799_v27, %v3117_v59 }
 0x6ca   :  { %v805_v31 = vsel %vm151_vm9, %v800_v30, -inf }
 0x6cb   :  { %806 = vmax.xlane.f32.xlu2 %v805_v31 }
 0x6d2   :  { %v711_v32 = vpop.xlane.xlu0 %710 }
 0x6d3   :  { %v715_v34 = vsub.f32 %v704_v8, %v711_v32 }
 0x6d5   :  { %v717_v35 = vmul.f32 1.442695, %v715_v34 }
 0x6d7   :  { %2825 = vpow2.f32 %v717_v35 }
 0x6dd   :  { %v3313_v0 = vpop.eup %2825  ;;  %v895_v37 = vpop.f32.mrf.mxu2 }
 0x6de   :  { %v896_v38 = vadd.f32 %v895_v37, %v3117_v59  ;;  %v721_v39 = vsel %vm151_vm9, %v3313_v0, 0.0 }
 0x6df   :  { %722 = vadd.xlane.f32.xlu2 %v721_v39 }
 0x6e0   :  { %v901_v40 = vsel %vm151_vm9, %v896_v38, -inf }
 0x6e1   :  { %902 = vmax.xlane.f32.xlu1 %v901_v40 }
 0x6f0   :  { %v802_v42 = vpop.f32.mrf.mxu1 }
 0x6f1   :  { %v803_v44 = vadd.f32 %v802_v42, %v3126_v4 }
 0x6f3   :  { %v808_v41 = vsel %vm151_vm9, %v803_v44, -inf }
 0x6f4   :  { %809 = vmax.xlane.f32.xlu1 %v808_v41 }
 0x6fb   :  { %v714_v45 = vpop.xlane.xlu2 %713  ;;  %v991_v46 = vpop.f32.mrf.mxu1 }
 0x6fc   :  { %v716_v47 = vsub.f32 %v707_v25, %v714_v45  ;;  %v992_v56 = vadd.f32 %v991_v46, %v3117_v59 }
 0x6fe   :  { %v719_v48 = vmul.f32 1.442695, %v716_v47  ;;  %v997_v10 = vsel %vm151_vm9, %v992_v56, -inf }
 0x700   :  { %2827 = vpow2.f32 %v719_v48 }
 0x703   :  { %v994_v43 = vpop.f32.mrf.mxu1 }
 0x704   :  { %v995_v49 = vadd.f32 %v994_v43, %v3126_v4 }
 0x706   :  { %v2828_v50 = vpop.eup %2827  ;;  %v898_v52 = vpop.f32.mrf.mxu2  ;;  %v1000_v51 = vsel %vm151_vm9, %v995_v49, -inf }
 0x707   :  { %v3324_v53 = vadd.f32 %v898_v52, %v3126_v4  ;;  %v724_v54 = vsel %vm151_vm9, %v2828_v50, 0.0  ;;  %1001 = vmax.xlane.f32.xlu2 %v1000_v51 }
 0x708   :  { %725 = vadd.xlane.f32.xlu1 %v724_v54 }
 0x709   :  { %v904_v55 = vsel %vm151_vm9, %v3324_v53, -inf }
 0x70a   :  { %905 = vmax.xlane.f32.xlu0 %v904_v55 }
 0x712   :  { %998 = vmax.xlane.f32.xlu0 %v997_v10 }
 0x71f   :  { %2699 = vrot.lane.b32.xlu2 %v2698_v28, %s2981_s6 }
 0x726   :  { %2694 = vrot.lane.b32.xlu0 %v2698_v28, %s2983_s8 }
 0x73e   :  { %v807_v4 = vpop.xlane.xlu2 %806 }
 0x73f   :  { %v811_v11 = vsub.f32 %v800_v30, %v807_v4 }
 0x741   :  { %v813_v57 = vmul.f32 1.442695, %v811_v11 }
 0x743   :  { %2829 = vpow2.f32 %v813_v57 }
 0x749   :  { %v2830_v13 = vpop.eup %2829 }
 0x74a   :  { %v817_v14 = vsel %vm151_vm9, %v2830_v13, 0.0 }
 0x74b   :  { %818 = vadd.xlane.f32.xlu1 %v817_v14 }
 0x752   :  { %v723_v2 = vpop.xlane.xlu2 %722 }
 0x754   :  { %v903_v58 = vpop.xlane.xlu1 %902 }
 0x755   :  { %v907_v59 = vsub.f32 %v896_v38, %v903_v58 }
 0x757   :  { %v909_v60 = vmul.f32 1.442695, %v907_v59 }
 0x759   :  { %2831 = vpow2.f32 %v909_v60 }
 0x75a   :  { %2833 = vrcp.f32 %v723_v2 }
 0x75f   :  { %v3336_v61 = vpop.eup %2831 }
 0x760   :  { %v913_v36 = vsel %vm151_vm9, %v3336_v61, 0.0  ;;  %v2834_v20 = vpop.eup %2833 }
 0x761   :  { %914 = vadd.xlane.f32.xlu0 %v913_v36  ;;  %v729_v24 = vmul.f32 %v2834_v20, %v3313_v0 }
 0x764   :  { %2704 = vrot.lane.b32.xlu1 %v2698_v28, %s2982_s7 }
 0x767   :  { %v810_v62 = vpop.xlane.xlu1 %809 }
 0x768   :  { %v812_v3 = vsub.f32 %v803_v44, %v810_v62  ;;  %v2713_v62 = vpack.i.bf16 %v3214_v15, %v3209_v12 }
 0x76a   :  { %v815_v7 = vmul.f32 1.442695, %v812_v3 }
 0x775   :  { %2714 = vrot.lane.b32.xlu0 %v2713_v62, %s2985_s10 }
 0x77a   :  { %v1002_v63 = vpop.xlane.xlu2 %1001 }
 0x77b   :  { %v1004_v1 = vsub.f32 %v995_v49, %v1002_v63  ;;  %v726_v8 = vpop.xlane.xlu1 %725 }
 0x77d   :  { %v1007_v5 = vmul.f32 1.442695, %v1004_v1  ;;  %v906_v6 = vpop.xlane.xlu0 %905 }
 0x77e   :  { %v908_v41 = vsub.f32 %v3324_v53, %v906_v6 }
 0x77f   :  { %2835 = vpow2.f32 %v1007_v5 }
 0x780   :  { %2837 = vpow2.f32 %v815_v7  ;;  %v911_v45 = vmul.f32 1.442695, %v908_v41  ;;  %v29_v41 = vld [vmem:[%s3887_s1 + $0x50] sm:$0xff] }
 0x781   :  { %2839 = vrcp.f32 %v726_v8 }
 0x782   :  { %v2700_v9 = vpop.permute.xlu2 %2699 }
 0x783   :  { %v2701_v21 = vunpack.i.l.bf16 %v2700_v9  ;;  %v2702_v22 = vunpack.i.h.bf16 %v2700_v9 }
 0x785   :  { %v2836_v17 = vpop.eup %2835  ;;  %757 = vmatpush.msrb.mxu0 %v2701_v21  ;;  %v999_v23 = vpop.xlane.xlu0 %998 }
 0x786   :  { %v1003_v25 = vsub.f32 %v992_v56, %v999_v23  ;;  %v1012_v26 = vsel %vm151_vm9, %v2836_v17, 0.0  ;;  %v2838_v30 = vpop.eup %2837 }
 0x787   :  { %1013 = vadd.xlane.f32.xlu2 %v1012_v26  ;;  %758 = vmatpush.msrb.mxu0 %v2702_v22  ;;  %v2840_v31 = vpop.eup %2839  ;;  %v820_v32 = vsel %vm151_vm9, %v2838_v30, 0.0 }
 0x788   :  { %v1005_v27 = vmul.f32 1.442695, %v1003_v25  ;;  %2551 = vmatmul.msk.f32.vlgmr.msrb.gmra.mxu0 %vm151_vm9, %v729_v24  ;;  %v730_v34 = vmul.f32 %v2840_v31, %v2828_v50 }
 0x78a   :  { %2841 = vpow2.f32 %v1005_v27 }
 0x78e   :  { %821 = vadd.xlane.f32.xlu1 %v820_v32 }
 0x790   :  { %2552 = vmatmul.msk.f32.gmra.mxu0 %vm151_vm9, %v730_v34  ;;  %v2842_v35 = vpop.eup %2841 }
 0x791   :  { %v1009_v0 = vsel %vm151_vm9, %v2842_v35, 0.0 }
 0x796   :  { %1010 = vadd.xlane.f32.xlu1 %v1009_v0 }
 0x798   :  { %v2695_v37 = vpop.permute.xlu0 %2694 }
 0x799   :  { %v2696_v38 = vunpack.i.l.bf16 %v2695_v37  ;;  %v2697_v39 = vunpack.i.h.bf16 %v2695_v37 }
 0x79b   :  { %853 = vmatpush.msra.mxu3 %v2696_v38 }
 0x79d   :  { %854 = vmatpush.msra.mxu3 %v2697_v39 }
 0x7af   :  { %2709 = vrot.lane.b32.xlu1 %v2698_v28, %s2984_s9 }
 0x7be   :  { %v819_v40 = vpop.xlane.xlu1 %818 }
 0x7bf   :  { %2843 = vrcp.f32 %v819_v40 }
 0x7c0   :  { %2845 = vpow2.f32 %v911_v45  ;;  %v27_v45 = vld [vmem:[%s3887_s1 + $0x40] sm:$0xff] }
 0x7c5   :  { %v2844_v42 = vpop.eup %2843 }
 0x7c6   :  { %v825_v44 = vmul.f32 %v2844_v42, %v2830_v13  ;;  %v2846_v46 = vpop.eup %2845 }
 0x7c7   :  { %v916_v43 = vsel %vm151_vm9, %v2846_v46, 0.0 }
 0x7c8   :  { %2557 = vmatmul.msk.f32.vlgmr.msra.gmra.mxu3 %vm151_vm9, %v825_v44 }
 0x7d4   :  { %v915_v28 = vpop.xlane.xlu0 %914 }
 0x7d6   :  { %v2705_v47 = vpop.permute.xlu1 %2704 }
 0x7d7   :  { %v2706_v48 = vunpack.i.l.bf16 %v2705_v47  ;;  %v2707_v49 = vunpack.i.h.bf16 %v2705_v47 }
 0x7d9   :  { %917 = vadd.xlane.f32.xlu1 %v916_v43  ;;  %1045 = vmatpush.msrb.mxu3 %v2706_v48 }
 0x7db   :  { %1046 = vmatpush.msrb.mxu3 %v2707_v49 }
 0x7e7   :  { %v2715_v15 = vpop.permute.xlu0 %2714 }
 0x7fa   :  { %v1014_v53 = vpop.xlane.xlu2 %1013 }
 0x801   :  { %v822_v50 = vpop.xlane.xlu1 %821 }
 0x802   :  { %2847 = vrcp.f32 %v822_v50 }
 0x805   :  { %v760_v1 = vpop.f32.mrf.mxu0 }
 0x808   :  { %v2848_v52 = vpop.eup %2847 }
 0x809   :  { %v1011_v51 = vpop.xlane.xlu1 %1010  ;;  %v826_v54 = vmul.f32 %v2848_v52, %v2838_v30 }
 0x80a   :  { %2849 = vrcp.f32 %v1011_v51 }
 0x80b   :  { %2558 = vmatmul.msk.f32.gmra.mxu3 %vm151_vm9, %v826_v54  ;;  %2851 = vrcp.f32 %v1014_v53  ;;  %v3405_v53 = vld [vmem:[%s3887_s1 + $0x160] sm:$0xff] }
 0x80c   :  { %2853 = vrcp.f32 %v915_v28 }
 0x80d   :  { %v763_v5 = vpop.f32.mrf.mxu0 }
 0x810   :  { %v2850_v55 = vpop.eup %2849 }
 0x811   :  { %v1017_v56 = vmul.f32 %v2850_v55, %v2842_v35  ;;  %v2852_v10 = vpop.eup %2851  ;;  %v1165_v55 = vperm.slane %v3405_v53, 2 }
 0x812   :  { %v1018_v4 = vmul.f32 %v2852_v10, %v2836_v17  ;;  %v2854_v57 = vpop.eup %2853 }
 0x813   :  { %2569 = vmatmul.msk.f32.vlgmr.msrb.gmra.mxu3 %vm151_vm9, %v1017_v56  ;;  %v921_v58 = vmul.f32 %v2854_v57, %v3336_v61  ;;  %v2718_v61 = vpack.i.bf16 %v3228_v19, %v3221_v18  ;;  %v2717_v18 = vunpack.i.h.bf16 %v2715_v15  ;;  %v2716_v19 = vunpack.i.l.bf16 %v2715_v15  ;;  %v36_v57 = vld [vmem:[%s3887_s1 + $0x88] sm:$0xff]  ;;  %v31_v15 = vld [vmem:[%s3887_s1 + $0x60] sm:$0xff] }
 0x815   :  { %2719 = vrot.lane.b32.xlu0 %v2718_v61, %s2985_s10  ;;  %1118 = vmatpush.msrb.mxu2 %v2716_v19 }
 0x817   :  { %1119 = vmatpush.msrb.mxu2 %v2717_v18 }
 0x81b   :  { %2570 = vmatmul.msk.f32.gmra.mxu3 %vm151_vm9, %v1018_v4  ;;  %v38_v4 = vld [vmem:[%s3887_s1 + $0x98] sm:$0xff] }
 0x81c   :  { %1214 = vmatpush.msrb.mxu1 %v38_v4 }
 0x821   :  { %v2710_v11 = vpop.permute.xlu1 %2709 }
 0x822   :  { %v2711_v13 = vunpack.i.l.bf16 %v2710_v11  ;;  %v2712_v14 = vunpack.i.h.bf16 %v2710_v11  ;;  %v37_v11 = vld [vmem:[%s3887_s1 + $0x90] sm:$0xff] }
 0x823   :  { %1215 = vmatpush.msrb.mxu1 %v37_v11 }
 0x824   :  { %949 = vmatpush.msra.mxu0 %v2711_v13  ;;  %v35_v13 = vld [vmem:[%s3887_s1 + $0x80] sm:$0xff] }
 0x825   :  { %1216 = vmatpush.msrb.mxu1 %v36_v57 }
 0x826   :  { %950 = vmatpush.msra.mxu0 %v2712_v14 }
 0x827   :  { %2563 = vmatmul.msk.f32.vlgmr.msra.gmra.mxu0 %vm151_vm9, %v921_v58  ;;  %1217 = vmatpush.msrb.mxu1 %v35_v13 }
 0x84b   :  { %v856_v59 = vpop.f32.mrf.mxu3 }
 0x84c   :  { %v918_v60 = vpop.xlane.xlu1 %917  ;;  %1056 = vrot.lane.b32.xlu2 %v856_v59, %s2986_s11  ;;  %v34_v59 = vld [vmem:[%s3887_s1 + $0x78] sm:$0xff] }
 0x84d   :  { %2855 = vrcp.f32 %v918_v60  ;;  %1218 = vmatpush.msrb.mxu1 %v34_v59 }
 0x853   :  { %v2856_v36 = vpop.eup %2855 }
 0x854   :  { %v922_v2 = vmul.f32 %v2856_v36, %v2846_v46  ;;  %v33_v36 = vld [vmem:[%s3887_s1 + $0x70] sm:$0xff] }
 0x855   :  { %1219 = vmatpush.msrb.mxu1 %v33_v36 }
 0x856   :  { %2564 = vmatmul.msk.f32.gmra.mxu0 %vm151_vm9, %v922_v2 }
 0x887   :  { %v2720_v8 = vpop.permute.xlu0 %2719 }
 0x888   :  { %v2722_v9 = vunpack.i.h.bf16 %v2720_v8  ;;  %v2721_v20 = vunpack.i.l.bf16 %v2720_v8 }
 0x88a   :  { %1120 = vmatpush.msrb.mxu2 %v2721_v20 }
 0x88c   :  { %1121 = vmatpush.msrb.mxu2 %v2722_v9 }
 0x88e   :  { %v859_v63 = vpop.f32.mrf.mxu3 }
 0x896   :  { %v1048_v3 = vpop.f32.mrf.mxu3 }
 0x897   :  { %1072 = vrot.lane.b32.xlu2 %v1048_v3, %s2988_s13 }
 0x89e   :  { %v1051_v6 = vpop.f32.mrf.mxu3 }
 0x89f   :  { %1074 = vrot.lane.b32.xlu2 %v1051_v6, %s2988_s13 }
 0x8a4   :  { %v952_v7 = vpop.f32.mrf.mxu0 }
 0x8a5   :  { %1064 = vrot.lane.b32.xlu0 %v952_v7, %s2987_s12 }
 0x8a6   :  { %v1057_v21 = vpop.permute.xlu2 %1056 }
 0x8a7   :  { %v1078_v17 = vsel %vm119_vm8, %v760_v1, %v1057_v21 }
 0x8ad   :  { %1058 = vrot.lane.b32.xlu0 %v859_v63, %s2986_s11 }
 0x8d3   :  { %v955_v12 = vpop.f32.mrf.mxu0 }
 0x8d4   :  { %1066 = vrot.lane.b32.xlu1 %v955_v12, %s2987_s12  ;;  %v32_v12 = vld [vmem:[%s3887_s1 + $0x68] sm:$0xff] }
 0x8d5   :  { %1220 = vmatpush.msrb.mxu1 %v32_v12  ;;  %v3539_v12 = vld [vmem:[%s3887_s1 + $0x168] sm:$0xff] }
 0x8d7   :  { %1221 = vmatpush.msrb.mxu1 %v31_v15 }
 0x8f1   :  { %v1073_v23 = vpop.permute.xlu2 %1072 }
 0x8f9   :  { %v1075_v31 = vpop.permute.xlu2 %1074 }
 0x917   :  { %v1065_v22 = vpop.permute.xlu0 %1064 }
 0x918   :  { %v1080_v24 = vsel %vm151_vm9, %v1078_v17, %v1065_v22 }
 0x919   :  { %v1082_v25 = vsel %vm525_vm10, %v1080_v24, %v1073_v23 }
 0x91a   :  { %2571 = vmatmul.msk.f32.vlgmr.msrb.gmra.mxu2 %vm41_vm0, %v1082_v25 }
 0x91f   :  { %v1059_v26 = vpop.permute.xlu0 %1058 }
 0x920   :  { %v1079_v27 = vsel %vm119_vm8, %v763_v5, %v1059_v26 }
 0x946   :  { %v1067_v30 = vpop.permute.xlu1 %1066 }
 0x947   :  { %v1081_v32 = vsel %vm151_vm9, %v1079_v27, %v1067_v30  ;;  %v3454_v27 = vld [vmem:[%s3887_s1 + $0xb8] sm:$0xff]  ;;  %v3460_v30 = vld [vmem:[%s3887_s1 + $0xb0] sm:$0xff] }
 0x948   :  { %v1083_v34 = vsel %vm525_vm10, %v1081_v32, %v1075_v31  ;;  %1306 = vmatpush.msra.mxu3 %v3454_v27  ;;  %v3466_v31 = vld [vmem:[%s3887_s1 + $0xa8] sm:$0xff]  ;;  %v2743_v32 = vpack.i.bf16 %v3460_v30, %v3454_v27 }
 0x949   :  { %2572 = vmatmul.msk.f32.gmra.mxu2 %vm41_vm0, %v1083_v34  ;;  %v3474_v34 = vld [vmem:[%s3887_s1 + $0xa0] sm:$0xff] }
 0x94a   :  { %1307 = vmatpush.msra.mxu3 %v3460_v30 }
 0x94c   :  { %1308 = vmatpush.msra.mxu3 %v3466_v31 }
 0x94e   :  { %1309 = vmatpush.msra.mxu3 %v3474_v34 }
 0x99d   :  { %v1123_v35 = vpop.f32.mrf.mxu2 }
 0x99e   :  { %v3378_v0 = vadd.f32 %v1123_v35, %v3247_v29  ;;  %v30_v29 = vld [vmem:[%s3887_s1 + $0x58] sm:$0xff]  ;;  %v2748_v35 = vpack.i.bf16 %v3474_v34, %v3466_v31 }
 0x99f   :  { %1186 = vmatpush.msrb.mxu0 %v30_v29 }
 0x9a0   :  { %v1131_v37 = vmul.f32 %v3378_v0, %v3378_v0 }
 0x9a1   :  { %1187 = vmatpush.msrb.mxu0 %v29_v41 }
 0x9a2   :  { %v1133_v38 = vsel %vm41_vm0, %v1131_v37, 0.0 }
 0x9a3   :  { %1134 = vadd.xlane.f32.xlu0 %v1133_v38 }
 0x9cc   :  { %v1126_v39 = vpop.f32.mrf.mxu2 }
 0x9cd   :  { %v3384_v40 = vadd.f32 %v1126_v39, %v3253_v33  ;;  %v28_v33 = vld [vmem:[%s3887_s1 + $0x48] sm:$0xff] }
 0x9ce   :  { %1188 = vmatpush.msrb.mxu0 %v28_v33  ;;  %v1285_v33 = vperm.slane %v3405_v53, 3 }
 0x9cf   :  { %v1132_v42 = vmul.f32 %v3384_v40, %v3384_v40 }
 0x9d0   :  { %1189 = vmatpush.msrb.mxu0 %v27_v45 }
 0x9d1   :  { %v1136_v44 = vsel %vm41_vm0, %v1132_v42, 0.0 }
 0x9d2   :  { %1137 = vadd.xlane.f32.xlu2 %v1136_v44 }
 0xa16   :  { %v1135_v46 = vpop.xlane.xlu0 %1134 }
 0xa17   :  { %v1139_v47 = vmul.f32 %v1135_v46, %v3050_v16 }
 0xa19   :  { %v1141_v48 = vadd.f32 1e-06, %v1139_v47 }
 0xa1b   :  { %2857 = vrsqrt.f32 %v1141_v48  ;;  %vm1149_vm3 = vweird.f32 %v1141_v48 }
 0xa21   :  { %v2858_v43 = vpop.eup %2857 }
 0xa22   :  { %v1144_v49 = vmul.f32 %v2858_v43, %v1141_v48  ;;  %vm1150_vm2 = vweird.f32 %v2858_v43 }
 0xa23   :  { %vm1151_vm4 = vmor %vm1149_vm3, %vm1150_vm2 }
 0xa24   :  { %v1145_v50 = vmul.f32 %v2858_v43, %v1144_v49 }
 0xa26   :  { %v1146_v52 = vmul.f32 0.5, %v1145_v50 }
 0xa28   :  { %v1147_v51 = vsub.f32 1.5, %v1146_v52 }
 0xa2a   :  { %v1148_v54 = vmul.f32 %v2858_v43, %v1147_v51 }
 0xa2c   :  { %v1152_v56 = vsel %vm1151_vm4, %v2858_v43, %v1148_v54 }
 0xa2d   :  { %v1163_v10 = vmul.f32 %v1152_v56, %v3378_v0 }
 0xa2f   :  { %v1166_v28 = vmul.f32 %v1165_v55, %v1163_v10 }
 0xa31   :  { %2573 = vmatmul.msk.f32.vlgmr.msrb.gmra.mxu0 %vm41_vm0, %v1166_v28 }
 0xa45   :  { %v1138_v14 = vpop.xlane.xlu2 %1137 }
 0xa46   :  { %v1140_v58 = vmul.f32 %v1138_v14, %v3050_v16 }
 0xa48   :  { %v1142_v60 = vadd.f32 1e-06, %v1140_v58 }
 0xa4a   :  { %2859 = vrsqrt.f32 %v1142_v60  ;;  %vm1159_vm6 = vweird.f32 %v1142_v60 }
 0xa50   :  { %v2860_v2 = vpop.eup %2859 }
 0xa51   :  { %v1154_v62 = vmul.f32 %v2860_v2, %v1142_v60  ;;  %vm1160_vm5 = vweird.f32 %v2860_v2 }
 0xa52   :  { %vm1161_vm7 = vmor %vm1159_vm6, %vm1160_vm5 }
 0xa53   :  { %v1155_v61 = vmul.f32 %v2860_v2, %v1154_v62 }
 0xa55   :  { %v1156_v63 = vmul.f32 0.5, %v1155_v61 }
 0xa57   :  { %v1157_v1 = vsub.f32 1.5, %v1156_v63 }
 0xa59   :  { %v1158_v3 = vmul.f32 %v2860_v2, %v1157_v1 }
 0xa5b   :  { %v1162_v5 = vsel %vm1161_vm7, %v2860_v2, %v1158_v3 }
 0xa5c   :  { %v1164_v6 = vmul.f32 %v1162_v5, %v3384_v40 }
 0xa5e   :  { %v1167_v7 = vmul.f32 %v1165_v55, %v1164_v6 }
 0xa60   :  { %2574 = vmatmul.msk.f32.gmra.mxu0 %vm41_vm0, %v1167_v7 }
 0xaae   :  { %v1191_v18 = vpop.f32.mrf.mxu0 }
 0xaaf   :  { %v1197_v19 = vmax.f32 %v1191_v18, 0.0 }
 0xab1   :  { %2575 = vmatmul.msk.f32.vlgmr.msrb.gmra.mxu1 %vm1199_vm11, %v1197_v19 }
 0xadd   :  { %v1194_v8 = vpop.f32.mrf.mxu0 }
 0xade   :  { %v1198_v9 = vmax.f32 %v1194_v8, 0.0 }
 0xae0   :  { %2576 = vmatmul.msk.f32.gmra.mxu1 %vm1199_vm11, %v1198_v9 }
 0xb2e   :  { %v1223_v20 = vpop.f32.mrf.mxu1 }
 0xb2f   :  { %v3440_v21 = vadd.f32 %v1223_v20, %v3378_v0 }
 0xb31   :  { %v1251_v17 = vmul.f32 %v3440_v21, %v3440_v21 }
 0xb33   :  { %v1253_v22 = vsel %vm41_vm0, %v1251_v17, 0.0  ;;  %v3548_v17 = vld [vmem:[%s3887_s1 + $0x170] sm:$0xff] }
 0xb34   :  { %1254 = vadd.xlane.f32.xlu1 %v1253_v22 }
 0xb5d   :  { %v1226_v23 = vpop.f32.mrf.mxu1 }
 0xb5e   :  { %v3446_v24 = vadd.f32 %v1226_v23, %v3384_v40 }
 0xb60   :  { %v1252_v25 = vmul.f32 %v3446_v24, %v3446_v24 }
 0xb62   :  { %v1256_v26 = vsel %vm41_vm0, %v1252_v25, 0.0 }
 0xb63   :  { %1257 = vadd.xlane.f32.xlu0 %v1256_v26 }
 0xba7   :  { %v1255_v0 = vpop.xlane.xlu1 %1254 }
 0xba8   :  { %v1259_v37 = vmul.f32 %v1255_v0, %v3050_v16 }
 0xbaa   :  { %v1261_v38 = vadd.f32 1e-06, %v1259_v37 }
 0xbac   :  { %2861 = vrsqrt.f32 %v1261_v38  ;;  %vm1269_vm13 = vweird.f32 %v1261_v38 }
 0xbb2   :  { %v2862_v39 = vpop.eup %2861 }
 0xbb3   :  { %v1264_v40 = vmul.f32 %v2862_v39, %v1261_v38  ;;  %vm1270_vm12 = vweird.f32 %v2862_v39 }
 0xbb4   :  { %vm1271_vm14 = vmor %vm1269_vm13, %vm1270_vm12 }
 0xbb5   :  { %v1265_v42 = vmul.f32 %v2862_v39, %v1264_v40 }
 0xbb7   :  { %v1266_v44 = vmul.f32 0.5, %v1265_v42 }
 0xbb9   :  { %v1267_v29 = vsub.f32 1.5, %v1266_v44 }
 0xbbb   :  { %v1268_v41 = vmul.f32 %v2862_v39, %v1267_v29 }
 0xbbd   :  { %v1272_v45 = vsel %vm1271_vm14, %v2862_v39, %v1268_v41 }
 0xbbe   :  { %v1283_v46 = vmul.f32 %v1272_v45, %v3440_v21 }
 0xbc0   :  { %v1286_v47 = vmul.f32 %v1285_v33, %v1283_v46 }
 0xbc2   :  { %2577 = vmatmul.msk.f32.vlgmr.msra.gmra.mxu3 %vm41_vm0, %v1286_v47 }
 0xbd6   :  { %v1258_v48 = vpop.xlane.xlu0 %1257 }
 0xbd7   :  { %v1260_v43 = vmul.f32 %v1258_v48, %v3050_v16 }
 0xbd9   :  { %v1262_v49 = vadd.f32 1e-06, %v1260_v43 }
 0xbdb   :  { %2863 = vrsqrt.f32 %v1262_v49  ;;  %vm1279_vm1 = vweird.f32 %v1262_v49 }
 0xbe1   :  { %v2864_v50 = vpop.eup %2863 }
 0xbe2   :  { %v1274_v52 = vmul.f32 %v2864_v50, %v1262_v49  ;;  %vm1280_vm15 = vweird.f32 %v2864_v50 }
 0xbe3   :  { %vm1281_vm2 = vmor %vm1279_vm1, %vm1280_vm15 }
 0xbe4   :  { %v1275_v51 = vmul.f32 %v2864_v50, %v1274_v52 }
 0xbe6   :  { %v1276_v54 = vmul.f32 0.5, %v1275_v51 }
 0xbe8   :  { %v1277_v55 = vsub.f32 1.5, %v1276_v54 }
 0xbea   :  { %v1278_v56 = vmul.f32 %v2864_v50, %v1277_v55 }
 0xbec   :  { %v1282_v10 = vsel %vm1281_vm2, %v2864_v50, %v1278_v56 }
 0xbed   :  { %v1284_v28 = vmul.f32 %v1282_v10, %v3446_v24 }
 0xbef   :  { %v1287_v4 = vmul.f32 %v1285_v33, %v1284_v28 }
 0xbf1   :  { %2578 = vmatmul.msk.f32.gmra.mxu3 %vm41_vm0, %v1287_v4 }
 0xc45   :  { %v3486_v11 = vpop.f32.mrf.mxu3 }
 0xc46   :  { %1415 = vrot.lane.b32.xlu2 %v3486_v11, %s2974_s23  ;;  %1319 = vrot.lane.b32.xlu1 %v3486_v11, %s2975_s24 }
 0xc4e   :  { %1511 = vrot.lane.b32.xlu1 %v3486_v11, %s2979_s28 }
 0xc56   :  { %1603 = vrot.lane.b32.xlu1 %v3486_v11, %s2977_s26 }
 0xc74   :  { %v3496_v57 = vpop.f32.mrf.mxu3 }
 0xc75   :  { %1417 = vrot.lane.b32.xlu0 %v3496_v57, %s2974_s23  ;;  %1321 = vrot.lane.b32.xlu2 %v3496_v57, %s2975_s24  ;;  %v2723_v48 = vpack.i.bf16 %v3486_v11, %v3496_v57 }
 0xc7d   :  { %1411 = vrot.lane.b32.xlu0 %v3486_v11, %s2976_s25  ;;  %1413 = vrot.lane.b32.xlu2 %v3496_v57, %s2976_s25 }
 0xc85   :  { %1513 = vrot.lane.b32.xlu0 %v3496_v57, %s2979_s28  ;;  %1609 = vrot.lane.b32.xlu2 %v3496_v57, %s2978_s27 }
 0xc8d   :  { %1607 = vrot.lane.b32.xlu0 %v3486_v11, %s2978_s27  ;;  %1507 = vrot.lane.b32.xlu2 %v3486_v11, %s2980_s29 }
 0xc95   :  { %1509 = vrot.lane.b32.xlu0 %v3496_v57, %s2980_s29  ;;  %1605 = vrot.lane.b32.xlu2 %v3496_v57, %s2977_s26 }
 0xca0   :  { %v1416_v13 = vpop.permute.xlu2 %1415 }
 0xcb8   :  { %v1320_v58 = vpop.permute.xlu1 %1319 }
 0xcc0   :  { %v1512_v61 = vpop.permute.xlu1 %1511 }
 0xcc8   :  { %v1604_v3 = vpop.permute.xlu1 %1603 }
 0xccf   :  { %v1322_v14 = vpop.permute.xlu2 %1321 }
 0xcd0   :  { %2579 = vmatpush.xpose.msk.msra.mxu2 %vm119_vm8, %v1322_v14 }
 0xcd4   :  { %2580 = vmatpush.xpose.msk.msra.mxu2 %vm119_vm8, %v1320_v58 }
 0xcd7   :  { %2581 = vmatmul.msk.f32.vlgmr.msra.gmra.mxu2 %vm119_vm8, %v3486_v11  ;;  %v1414_v59 = vpop.permute.xlu2 %1413 }
 0xcdf   :  { %2582 = vmatmul.msk.f32.gmra.mxu2 %vm119_vm8, %v3496_v57  ;;  %v1610_v36 = vpop.permute.xlu2 %1609 }
 0xce7   :  { %v1418_v60 = vpop.permute.xlu0 %1417  ;;  %v1508_v63 = vpop.permute.xlu2 %1507 }
 0xce8   :  { %2585 = vmatpush.xpose.msk.msra.mxu1 %vm119_vm8, %v1418_v60 }
 0xcec   :  { %2586 = vmatpush.xpose.msk.msra.mxu1 %vm119_vm8, %v1416_v13 }
 0xcef   :  { %v1412_v2 = vpop.permute.xlu0 %1411  ;;  %v1606_v6 = vpop.permute.xlu2 %1605 }
 0xcf0   :  { %2597 = vmatpush.xpose.msk.msrb.mxu1 %vm119_vm8, %v1610_v36 }
 0xcf1   :  { %2587 = vmatmul.msk.f32.vlgmr.msra.gmra.mxu1 %vm119_vm8, %v1412_v2 }
 0xcf7   :  { %v1514_v62 = vpop.permute.xlu0 %1513 }
 0xcf8   :  { %2591 = vmatpush.xpose.msk.msrb.mxu2 %vm119_vm8, %v1514_v62 }
 0xcf9   :  { %2588 = vmatmul.msk.f32.gmra.mxu1 %vm119_vm8, %v1414_v59 }
 0xcfc   :  { %2592 = vmatpush.xpose.msk.msrb.mxu2 %vm119_vm8, %v1512_v61 }
 0xcff   :  { %v1608_v1 = vpop.permute.xlu0 %1607  ;;  %2593 = vmatmul.msk.f32.vlgmr.msrb.gmra.mxu2 %vm119_vm8, %v1508_v63 }
 0xd00   :  { %2598 = vmatpush.xpose.msk.msrb.mxu1 %vm119_vm8, %v1608_v1 }
 0xd03   :  { %2599 = vmatmul.msk.f32.vlgmr.msrb.gmra.mxu1 %vm119_vm8, %v1604_v3 }
 0xd07   :  { %v1510_v5 = vpop.permute.xlu0 %1509 }
 0xd08   :  { %2594 = vmatmul.msk.f32.gmra.mxu2 %vm119_vm8, %v1510_v5 }
 0xd0b   :  { %2600 = vmatmul.msk.f32.gmra.mxu1 %vm119_vm8, %v1606_v6 }
 0xd5a   :  { %v1348_v7 = vpop.f32.mrf.mxu2 }
 0xd5b   :  { %v1349_v15 = vadd.f32 %v3539_v12, %v1348_v7 }
 0xd5d   :  { %v1354_v18 = vsel %vm151_vm9, %v1349_v15, -inf }
 0xd5e   :  { %1355 = vmax.xlane.f32.xlu0 %v1354_v18 }
 0xd62   :  { %v1351_v20 = vpop.f32.mrf.mxu2 }
 0xd63   :  { %v1352_v22 = vadd.f32 %v3548_v17, %v1351_v20 }
 0xd65   :  { %v1357_v26 = vsel %vm151_vm9, %v1352_v22, -inf }
 0xd6e   :  { %v1444_v19 = vpop.f32.mrf.mxu1 }
 0xd6f   :  { %v1445_v8 = vadd.f32 %v3539_v12, %v1444_v19 }
 0xd71   :  { %v1450_v9 = vsel %vm151_vm9, %v1445_v8, -inf }
 0xd72   :  { %1451 = vmax.xlane.f32.xlu1 %v1450_v9 }
 0xd76   :  { %v1447_v23 = vpop.f32.mrf.mxu1 }
 0xd77   :  { %v1448_v25 = vadd.f32 %v3548_v17, %v1447_v23 }
 0xd79   :  { %v1453_v0 = vsel %vm151_vm9, %v1448_v25, -inf }
 0xd7a   :  { %1358 = vmax.xlane.f32.xlu1 %v1357_v26  ;;  %1454 = vmax.xlane.f32.xlu2 %v1453_v0 }
 0xd80   :  { %v1636_v37 = vpop.f32.mrf.mxu1 }
 0xd81   :  { %v1637_v38 = vadd.f32 %v3539_v12, %v1636_v37 }
 0xd82   :  { %v1540_v39 = vpop.f32.mrf.mxu2 }
 0xd83   :  { %v3556_v40 = vadd.f32 %v3539_v12, %v1540_v39  ;;  %v1642_v42 = vsel %vm151_vm9, %v1637_v38, -inf }
 0xd84   :  { %1643 = vmax.xlane.f32.xlu0 %v1642_v42 }
 0xd85   :  { %v1546_v44 = vsel %vm151_vm9, %v3556_v40, -inf }
 0xd86   :  { %1547 = vmax.xlane.f32.xlu2 %v1546_v44 }
 0xd88   :  { %v1639_v29 = vpop.f32.mrf.mxu1 }
 0xd89   :  { %v1640_v41 = vadd.f32 %v3548_v17, %v1639_v29 }
 0xd8b   :  { %v1543_v33 = vpop.f32.mrf.mxu2  ;;  %v1645_v45 = vsel %vm151_vm9, %v1640_v41, -inf }
 0xd8c   :  { %v3564_v46 = vadd.f32 %v3548_v17, %v1543_v33  ;;  %1646 = vmax.xlane.f32.xlu1 %v1645_v45 }
 0xd8e   :  { %v1549_v47 = vsel %vm151_vm9, %v3564_v46, -inf }
 0xd8f   :  { %1550 = vmax.xlane.f32.xlu0 %v1549_v47 }
 0xda3   :  { %2724 = vrot.lane.b32.xlu0 %v2723_v48, %s2983_s8 }
 0xdd1   :  { %v1356_v43 = vpop.xlane.xlu0 %1355 }
 0xdd2   :  { %v1360_v49 = vsub.f32 %v1349_v15, %v1356_v43 }
 0xdd4   :  { %v1362_v50 = vmul.f32 1.442695, %v1360_v49 }
 0xdd6   :  { %2865 = vpow2.f32 %v1362_v50 }
 0xddc   :  { %v3571_v52 = vpop.eup %2865 }
 0xddd   :  { %v1366_v51 = vsel %vm151_vm9, %v3571_v52, 0.0 }
 0xdde   :  { %1367 = vadd.xlane.f32.xlu1 %v1366_v51 }
 0xde5   :  { %v1452_v54 = vpop.xlane.xlu1 %1451 }
 0xde6   :  { %v1456_v55 = vsub.f32 %v1445_v8, %v1452_v54 }
 0xde8   :  { %v1458_v56 = vmul.f32 1.442695, %v1456_v55 }
 0xdea   :  { %2867 = vpow2.f32 %v1458_v56 }
 0xded   :  { %v1455_v10 = vpop.xlane.xlu2 %1454  ;;  %v1359_v28 = vpop.xlane.xlu1 %1358 }
 0xdee   :  { %v1457_v4 = vsub.f32 %v1448_v25, %v1455_v10  ;;  %v1361_v13 = vsub.f32 %v1352_v22, %v1359_v28 }
 0xdf0   :  { %v2868_v11 = vpop.eup %2867  ;;  %v1460_v57 = vmul.f32 1.442695, %v1457_v4  ;;  %v1364_v58 = vmul.f32 1.442695, %v1361_v13 }
 0xdf1   :  { %v1462_v14 = vsel %vm151_vm9, %v2868_v11, 0.0 }
 0xdf2   :  { %1463 = vadd.xlane.f32.xlu2 %v1462_v14  ;;  %2869 = vpow2.f32 %v1460_v57 }
 0xdf3   :  { %2871 = vpow2.f32 %v1364_v58 }
 0xdf7   :  { %v1644_v59 = vpop.xlane.xlu0 %1643  ;;  %2729 = vrot.lane.b32.xlu1 %v2723_v48, %s2981_s6 }
 0xdf8   :  { %v2870_v60 = vpop.eup %2869  ;;  %v1648_v36 = vsub.f32 %v1637_v38, %v1644_v59 }
 0xdf9   :  { %v1465_v2 = vsel %vm151_vm9, %v2870_v60, 0.0  ;;  %v2872_v61 = vpop.eup %2871  ;;  %v1548_v22 = vpop.xlane.xlu2 %1547 }
 0xdfa   :  { %v1650_v62 = vmul.f32 1.442695, %v1648_v36  ;;  %1466 = vadd.xlane.f32.xlu2 %v1465_v2  ;;  %v1369_v63 = vsel %vm151_vm9, %v2872_v61, 0.0  ;;  %v1552_v23 = vsub.f32 %v3556_v40, %v1548_v22 }
 0xdfc   :  { %2873 = vpow2.f32 %v1650_v62  ;;  %v1554_v25 = vmul.f32 1.442695, %v1552_v23 }
 0xdff   :  { %v1647_v5 = vpop.xlane.xlu1 %1646 }
 0xe00   :  { %v1649_v7 = vsub.f32 %v1640_v41, %v1647_v5 }
 0xe02   :  { %v2874_v1 = vpop.eup %2873  ;;  %1370 = vadd.xlane.f32.xlu2 %v1369_v63  ;;  %v1551_v6 = vpop.xlane.xlu0 %1550  ;;  %v1652_v15 = vmul.f32 1.442695, %v1649_v7 }
 0xe03   :  { %v1654_v3 = vsel %vm151_vm9, %v2874_v1, 0.0  ;;  %v1553_v42 = vsub.f32 %v3564_v46, %v1551_v6 }
 0xe04   :  { %1655 = vadd.xlane.f32.xlu0 %v1654_v3  ;;  %2875 = vpow2.f32 %v1652_v15 }
 0xe05   :  { %2877 = vpow2.f32 %v1554_v25  ;;  %v1556_v33 = vmul.f32 1.442695, %v1553_v42 }
 0xe0a   :  { %v2876_v9 = vpop.eup %2875 }
 0xe0b   :  { %v1657_v20 = vsel %vm151_vm9, %v2876_v9, 0.0  ;;  %v2878_v26 = vpop.eup %2877 }
 0xe0c   :  { %v1558_v27 = vsel %vm151_vm9, %v2878_v26, 0.0 }
 0xe15   :  { %v2725_v18 = vpop.permute.xlu0 %2724 }
 0xe16   :  { %v2726_v19 = vunpack.i.l.bf16 %v2725_v18  ;;  %v2727_v8 = vunpack.i.h.bf16 %v2725_v18 }
 0xe18   :  { %1498 = vmatpush.msrb.mxu3 %v2726_v19  ;;  %2744 = vrot.lane.b32.xlu0 %v2743_v32, %s2985_s10 }
 0xe1a   :  { %2734 = vrot.lane.b32.xlu2 %v2723_v48, %s2982_s7  ;;  %1499 = vmatpush.msrb.mxu3 %v2727_v8 }
 0xe20   :  { %2749 = vrot.lane.b32.xlu0 %v2748_v35, %s2985_s10 }
 0xe21   :  { %1658 = vadd.xlane.f32.xlu1 %v1657_v20 }
 0xe43   :  { %1559 = vadd.xlane.f32.xlu2 %v1558_v27 }
 0xe51   :  { %v1368_v30 = vpop.xlane.xlu1 %1367 }
 0xe52   :  { %2879 = vrcp.f32 %v1368_v30 }
 0xe58   :  { %v2880_v37 = vpop.eup %2879 }
 0xe59   :  { %v1374_v39 = vmul.f32 %v2880_v37, %v3571_v52 }
 0xe5b   :  { %2739 = vrot.lane.b32.xlu2 %v2723_v48, %s2984_s9 }
 0xe65   :  { %v1464_v32 = vpop.xlane.xlu2 %1463 }
 0xe66   :  { %2881 = vrcp.f32 %v1464_v32 }
 0xe69   :  { %v2730_v0 = vpop.permute.xlu1 %2729 }
 0xe6a   :  { %v2731_v31 = vunpack.i.l.bf16 %v2730_v0  ;;  %v2732_v38 = vunpack.i.h.bf16 %v2730_v0 }
 0xe6c   :  { %v2882_v34 = vpop.eup %2881  ;;  %1402 = vmatpush.msra.mxu0 %v2731_v31 }
 0xe6d   :  { %v1470_v35 = vmul.f32 %v2882_v34, %v2868_v11  ;;  %v1467_v40 = vpop.xlane.xlu2 %1466  ;;  %v3621_v34 = vld [vmem:[%s3887_s1 + $0xd8] sm:$0xff] }
 0xe6e   :  { %2883 = vrcp.f32 %v1467_v40  ;;  %1403 = vmatpush.msra.mxu0 %v2732_v38  ;;  %1854 = vmatpush.msra.mxu1 %v3621_v34  ;;  %v3635_v40 = vld [vmem:[%s3887_s1 + $0xc8] sm:$0xff] }
 0xe6f   :  { %2589 = vmatmul.msk.f32.vlgmr.msrb.gmra.mxu3 %vm151_vm9, %v1470_v35  ;;  %2583 = vmatmul.msk.f32.vlgmr.msra.gmra.mxu0 %vm151_vm9, %v1374_v39  ;;  %v3627_v35 = vld [vmem:[%s3887_s1 + $0xd0] sm:$0xff] }
 0xe70   :  { %v2773_v39 = vpack.i.bf16 %v3627_v35, %v3621_v34  ;;  %1855 = vmatpush.msra.mxu1 %v3627_v35 }
 0xe72   :  { %1856 = vmatpush.msra.mxu1 %v3635_v40 }
 0xe74   :  { %v2884_v44 = vpop.eup %2883 }
 0xe75   :  { %v1371_v29 = vpop.xlane.xlu2 %1370  ;;  %v1471_v41 = vmul.f32 %v2884_v44, %v2870_v60 }
 0xe76   :  { %2885 = vrcp.f32 %v1371_v29  ;;  %v3649_v29 = vld [vmem:[%s3887_s1 + $0xc0] sm:$0xff] }
 0xe77   :  { %2590 = vmatmul.msk.f32.gmra.mxu3 %vm151_vm9, %v1471_v41  ;;  %v1656_v45 = vpop.xlane.xlu0 %1655  ;;  %1857 = vmatpush.msra.mxu1 %v3649_v29 }
 0xe78   :  { %2887 = vrcp.f32 %v1656_v45  ;;  %v2945_v45 = vld [vmem:[%s3886_s0 + $0x18] sm:$0xff] }
 0xe79   :  { %2889 = vpow2.f32 %v1556_v33  ;;  %v2944_v33 = vld [vmem:[%s3886_s0 + $0x10] sm:$0xff] }
 0xe7a   :  { %2607 = vmatmul.msk.f32.vlgmr.msra.gmra.mxu1 %vm41_vm0, %v2944_v33 }
 0xe7c   :  { %v2886_v47 = vpop.eup %2885 }
 0xe7d   :  { %v2735_v48 = vpop.permute.xlu2 %2734  ;;  %v1375_v43 = vmul.f32 %v2886_v47, %v2872_v61 }
 0xe7e   :  { %v2888_v49 = vpop.eup %2887  ;;  %v2736_v50 = vunpack.i.l.bf16 %v2735_v48  ;;  %v2737_v46 = vunpack.i.h.bf16 %v2735_v48 }
 0xe7f   :  { %v1662_v52 = vmul.f32 %v2888_v49, %v2874_v1  ;;  %2584 = vmatmul.msk.f32.gmra.mxu0 %vm151_vm9, %v1375_v43  ;;  %v2890_v51 = vpop.eup %2889 }
 0xe80   :  { %1690 = vmatpush.msra.mxu3 %v2736_v50  ;;  %v1561_v54 = vsel %vm151_vm9, %v2890_v51, 0.0 }
 0xe82   :  { %1691 = vmatpush.msra.mxu3 %v2737_v46  ;;  %2608 = vmatmul.msk.f32.gmra.mxu1 %vm41_vm0, %v2945_v45 }
 0xe83   :  { %2601 = vmatmul.msk.f32.vlgmr.msra.gmra.mxu3 %vm151_vm9, %v1662_v52 }
 0xe84   :  { %1562 = vadd.xlane.f32.xlu2 %v1561_v54 }
 0xe8a   :  { %v2745_v5 = vpop.permute.xlu0 %2744 }
 0xe8b   :  { %v2747_v6 = vunpack.i.h.bf16 %v2745_v5  ;;  %v2746_v7 = vunpack.i.l.bf16 %v2745_v5 }
 0xe8d   :  { %1763 = vmatpush.msra.mxu2 %v2746_v7 }
 0xe8f   :  { %1764 = vmatpush.msra.mxu2 %v2747_v6 }
 0xe92   :  { %v2750_v15 = vpop.permute.xlu0 %2749 }
 0xe93   :  { %v2752_v18 = vunpack.i.h.bf16 %v2750_v15  ;;  %v2751_v19 = vunpack.i.l.bf16 %v2750_v15 }
 0xe94   :  { %v1659_v55 = vpop.xlane.xlu1 %1658 }
 0xe95   :  { %2891 = vrcp.f32 %v1659_v55  ;;  %1765 = vmatpush.msra.mxu2 %v2751_v19 }
 0xe97   :  { %1766 = vmatpush.msra.mxu2 %v2752_v18 }
 0xe9b   :  { %v2892_v56 = vpop.eup %2891 }
 0xe9c   :  { %v1663_v10 = vmul.f32 %v2892_v56, %v2876_v9 }
 0xe9e   :  { %2602 = vmatmul.msk.f32.gmra.mxu3 %vm151_vm9, %v1663_v10 }
 0xeb6   :  { %v1560_v28 = vpop.xlane.xlu2 %1559 }
 0xeb7   :  { %2893 = vrcp.f32 %v1560_v28 }
 0xebd   :  { %v2894_v11 = vpop.eup %2893 }
 0xebe   :  { %v2740_v4 = vpop.permute.xlu2 %2739  ;;  %v1566_v14 = vmul.f32 %v2894_v11, %v2878_v26  ;;  %v1810_v11 = vperm.slane %v3405_v53, 4 }
 0xebf   :  { %v2741_v57 = vunpack.i.l.bf16 %v2740_v4  ;;  %v2742_v13 = vunpack.i.h.bf16 %v2740_v4 }
 0xec1   :  { %1594 = vmatpush.msrb.mxu0 %v2741_v57 }
 0xec3   :  { %1595 = vmatpush.msrb.mxu0 %v2742_v13 }
 0xec4   :  { %2595 = vmatmul.msk.f32.vlgmr.msrb.gmra.mxu0 %vm151_vm9, %v1566_v14 }
 0xec5   :  { %1831 = vmatpush.msra.mxu0 %v3621_v34 }
 0xec7   :  { %1832 = vmatpush.msra.mxu0 %v3627_v35 }
 0xec9   :  { %1833 = vmatpush.msra.mxu0 %v3635_v40 }
 0xecb   :  { %1834 = vmatpush.msra.mxu0 %v3649_v29 }
 0xeec   :  { %v1405_v62 = vpop.f32.mrf.mxu0 }
 0xef2   :  { %v1501_v58 = vpop.f32.mrf.mxu3 }
 0xef3   :  { %1701 = vrot.lane.b32.xlu1 %v1501_v58, %s2986_s11 }
 0xef7   :  { %v1563_v59 = vpop.xlane.xlu2 %1562  ;;  %v3671_v46 = vpop.f32.mrf.mxu1 }
 0xef8   :  { %2895 = vrcp.f32 %v1563_v59 }
 0xefa   :  { %v1504_v60 = vpop.f32.mrf.mxu3 }
 0xefb   :  { %1703 = vrot.lane.b32.xlu1 %v1504_v60, %s2986_s11 }
 0xefc   :  { %v1408_v61 = vpop.f32.mrf.mxu0 }
 0xefe   :  { %v2896_v36 = vpop.eup %2895 }
 0xeff   :  { %v1567_v2 = vmul.f32 %v2896_v36, %v2890_v51 }
 0xf01   :  { %2596 = vmatmul.msk.f32.gmra.mxu0 %vm151_vm9, %v1567_v2 }
 0xf06   :  { %v1693_v1 = vpop.f32.mrf.mxu3 }
 0xf21   :  { %v1696_v3 = vpop.f32.mrf.mxu3 }
 0xf41   :  { %v1597_v63 = vpop.f32.mrf.mxu0 }
 0xf42   :  { %1709 = vrot.lane.b32.xlu0 %v1597_v63, %s2987_s12 }
 0xf4a   :  { %1717 = vrot.lane.b32.xlu0 %v1693_v1, %s2988_s13 }
 0xf52   :  { %1719 = vrot.lane.b32.xlu0 %v1696_v3, %s2988_s13 }
 0xf65   :  { %v1702_v20 = vpop.permute.xlu1 %1701 }
 0xf66   :  { %v1723_v22 = vsel %vm119_vm8, %v1405_v62, %v1702_v20 }
 0xf6d   :  { %v1704_v27 = vpop.permute.xlu1 %1703 }
 0xf6e   :  { %v1724_v30 = vsel %vm119_vm8, %v1408_v61, %v1704_v27 }
 0xf7e   :  { %v1600_v8 = vpop.f32.mrf.mxu0 }
 0xf7f   :  { %1711 = vrot.lane.b32.xlu2 %v1600_v8, %s2987_s12 }
 0xfb4   :  { %v1710_v9 = vpop.permute.xlu0 %1709 }
 0xfb5   :  { %v1725_v23 = vsel %vm151_vm9, %v1723_v22, %v1710_v9 }
 0xfbc   :  { %v1718_v25 = vpop.permute.xlu0 %1717 }
 0xfbd   :  { %v1727_v26 = vsel %vm525_vm10, %v1725_v23, %v1718_v25 }
 0xfbe   :  { %2603 = vmatmul.msk.f32.vlgmr.msra.gmra.mxu2 %vm41_vm0, %v1727_v26 }
 0xfc4   :  { %v1720_v0 = vpop.permute.xlu0 %1719 }
 0xfd9   :  { %v1712_v32 = vpop.permute.xlu2 %1711 }
 0xfda   :  { %v1726_v37 = vsel %vm151_vm9, %v1724_v30, %v1712_v32 }
 0xfdb   :  { %v1728_v31 = vsel %vm525_vm10, %v1726_v37, %v1720_v0 }
 0xfdc   :  { %2604 = vmatmul.msk.f32.gmra.mxu2 %vm41_vm0, %v1728_v31 }
0x1041   :  { %v1768_v38 = vpop.f32.mrf.mxu2 }
0x1042   :  { %v3638_v42 = vadd.f32 %v1768_v38, %v3440_v21  ;;  %v2778_v21 = vpack.i.bf16 %v3649_v29, %v3635_v40 }
0x1044   :  { %v1776_v44 = vmul.f32 %v3638_v42, %v3638_v42 }
0x1046   :  { %v1778_v41 = vsel %vm41_vm0, %v1776_v44, 0.0 }
0x1047   :  { %1779 = vadd.xlane.f32.xlu1 %v1778_v41 }
0x105f   :  { %v1771_v47 = vpop.f32.mrf.mxu2 }
0x1060   :  { %v3665_v48 = vadd.f32 %v1771_v47, %v3446_v24  ;;  %v3673_v24 = vpop.f32.mrf.mxu1 }
0x1061   :  { %1869 = vrot.lane.b32.xlu2 %v3673_v24, %s2975_s24  ;;  %2063 = vrot.lane.b32.xlu1 %v3673_v24, %s2979_s28 }
0x1062   :  { %v1777_v43 = vmul.f32 %v3665_v48, %v3665_v48 }
0x1064   :  { %v1781_v49 = vsel %vm41_vm0, %v1777_v43, 0.0 }
0x1065   :  { %1782 = vadd.xlane.f32.xlu0 %v1781_v49 }
0x1069   :  { %1867 = vrot.lane.b32.xlu2 %v3671_v46, %s2975_s24 }
0x1071   :  { %1967 = vrot.lane.b32.xlu2 %v3673_v24, %s2974_s23 }
0x1079   :  { %1965 = vrot.lane.b32.xlu2 %v3671_v46, %s2974_s23 }
0x1081   :  { %2061 = vrot.lane.b32.xlu2 %v3671_v46, %s2979_s28 }
0x10ba   :  { %v1780_v50 = vpop.xlane.xlu1 %1779 }
0x10bb   :  { %v1784_v52 = vmul.f32 %v1780_v50, %v3050_v16  ;;  %v1870_v6 = vpop.permute.xlu2 %1869 }
0x10bc   :  { %2609 = vmatpush.xpose.msk.msrb.mxu3 %vm119_vm8, %v1870_v6 }
0x10bd   :  { %v1786_v51 = vadd.f32 1e-06, %v1784_v52 }
0x10bf   :  { %2897 = vrsqrt.f32 %v1786_v51  ;;  %vm1794_vm4 = vweird.f32 %v1786_v51 }
0x10c3   :  { %v1868_v7 = vpop.permute.xlu2 %1867 }
0x10c4   :  { %2610 = vmatpush.xpose.msk.msrb.mxu3 %vm119_vm8, %v1868_v7 }
0x10c5   :  { %v2898_v54 = vpop.eup %2897 }
0x10c6   :  { %v1789_v55 = vmul.f32 %v2898_v54, %v1786_v51  ;;  %vm1795_vm3 = vweird.f32 %v2898_v54 }
0x10c7   :  { %vm1796_vm5 = vmor %vm1794_vm4, %vm1795_vm3 }
0x10c8   :  { %v1790_v56 = vmul.f32 %v2898_v54, %v1789_v55 }
0x10ca   :  { %v1791_v10 = vmul.f32 0.5, %v1790_v56 }
0x10cb   :  { %v1968_v18 = vpop.permute.xlu2 %1967 }
0x10cc   :  { %v1792_v28 = vsub.f32 1.5, %v1791_v10  ;;  %2615 = vmatpush.xpose.msk.msrb.mxu0 %vm119_vm8, %v1968_v18 }
0x10ce   :  { %v1793_v4 = vmul.f32 %v2898_v54, %v1792_v28 }
0x10d0   :  { %v1797_v57 = vsel %vm1796_vm5, %v2898_v54, %v1793_v4 }
0x10d1   :  { %v1808_v13 = vmul.f32 %v1797_v57, %v3638_v42 }
0x10d3   :  { %v1811_v14 = vmul.f32 %v1810_v11, %v1808_v13  ;;  %v2064_v19 = vpop.permute.xlu1 %2063  ;;  %v1966_v8 = vpop.permute.xlu2 %1965 }
0x10d4   :  { %2621 = vmatpush.xpose.msk.msra.mxu3 %vm119_vm8, %v2064_v19  ;;  %2616 = vmatpush.xpose.msk.msrb.mxu0 %vm119_vm8, %v1966_v8 }
0x10d5   :  { %2605 = vmatmul.msk.f32.vlgmr.msra.gmra.mxu0 %vm41_vm0, %v1811_v14 }
0x10d8   :  { %v1783_v58 = vpop.xlane.xlu0 %1782 }
0x10d9   :  { %v1785_v59 = vmul.f32 %v1783_v58, %v3050_v16 }
0x10db   :  { %v1787_v60 = vadd.f32 1e-06, %v1785_v59  ;;  %v2062_v9 = vpop.permute.xlu2 %2061 }
0x10dc   :  { %2622 = vmatpush.xpose.msk.msra.mxu3 %vm119_vm8, %v2062_v9 }
0x10dd   :  { %2899 = vrsqrt.f32 %v1787_v60  ;;  %vm1804_vm7 = vweird.f32 %v1787_v60 }
0x10e3   :  { %v2900_v36 = vpop.eup %2899 }
0x10e4   :  { %v1799_v53 = vmul.f32 %v2900_v36, %v1787_v60  ;;  %vm1805_vm6 = vweird.f32 %v2900_v36 }
0x10e5   :  { %vm1806_vm12 = vmor %vm1804_vm7, %vm1805_vm6 }
0x10e6   :  { %v1800_v2 = vmul.f32 %v2900_v36, %v1799_v53 }
0x10e8   :  { %v1801_v62 = vmul.f32 0.5, %v1800_v2 }
0x10ea   :  { %v1802_v61 = vsub.f32 1.5, %v1801_v62 }
0x10ec   :  { %v1803_v63 = vmul.f32 %v2900_v36, %v1802_v61 }
0x10ee   :  { %v1807_v1 = vsel %vm1806_vm12, %v2900_v36, %v1803_v63 }
0x10ef   :  { %v1809_v3 = vmul.f32 %v1807_v1, %v3665_v48 }
0x10f1   :  { %v1812_v5 = vmul.f32 %v1810_v11, %v1809_v3  ;;  %v2753_v3 = vpack.i.bf16 %v3671_v46, %v3673_v24 }
0x10f3   :  { %2606 = vmatmul.msk.f32.gmra.mxu0 %vm41_vm0, %v1812_v5 }
0x1152   :  { %v1836_v15 = vpop.f32.mrf.mxu0 }
0x1153   :  { %2057 = vrot.lane.b32.xlu2 %v1836_v15, %s2980_s29  ;;  %2611 = vmatmul.msk.f32.vlgmr.msrb.gmra.mxu3 %vm119_vm8, %v1836_v15 }
0x1154   :  { %1961 = vrot.lane.b32.xlu0 %v1836_v15, %s2976_s25 }
0x115b   :  { %2159 = vrot.lane.b32.xlu2 %v3673_v24, %s2978_s27 }
0x1163   :  { %2153 = vrot.lane.b32.xlu2 %v1836_v15, %s2977_s26 }
0x1170   :  { %v1839_v20 = vpop.f32.mrf.mxu0 }
0x1171   :  { %2059 = vrot.lane.b32.xlu0 %v1839_v20, %s2980_s29  ;;  %1963 = vrot.lane.b32.xlu1 %v1839_v20, %s2976_s25 }
0x1172   :  { %2612 = vmatmul.msk.f32.gmra.mxu3 %vm119_vm8, %v1839_v20 }
0x1179   :  { %2155 = vrot.lane.b32.xlu0 %v1839_v20, %s2977_s26  ;;  %2157 = vrot.lane.b32.xlu1 %v3671_v46, %s2978_s27 }
0x11ad   :  { %v2058_v22 = vpop.permute.xlu2 %2057 }
0x11ae   :  { %2623 = vmatmul.msk.f32.vlgmr.msra.gmra.mxu3 %vm119_vm8, %v2058_v22 }
0x11b5   :  { %v2160_v23 = vpop.permute.xlu2 %2159 }
0x11b6   :  { %2627 = vmatpush.xpose.msk.msra.mxu0 %vm119_vm8, %v2160_v23 }
0x11bd   :  { %v2154_v31 = vpop.permute.xlu2 %2153 }
0x11c6   :  { %v1962_v25 = vpop.permute.xlu0 %1961 }
0x11c7   :  { %2617 = vmatmul.msk.f32.vlgmr.msrb.gmra.mxu0 %vm119_vm8, %v1962_v25 }
0x11d6   :  { %v1898_v26 = vpop.f32.mrf.mxu3 }
0x11d7   :  { %v1899_v27 = vadd.f32 %v3539_v12, %v1898_v26 }
0x11d9   :  { %v1904_v30 = vsel %vm151_vm9, %v1899_v27, -inf }
0x11da   :  { %1905 = vmax.xlane.f32.xlu1 %v1904_v30 }
0x11e3   :  { %v1964_v32 = vpop.permute.xlu1 %1963  ;;  %v2060_v0 = vpop.permute.xlu0 %2059 }
0x11e4   :  { %2618 = vmatmul.msk.f32.gmra.mxu0 %vm119_vm8, %v1964_v32  ;;  %2624 = vmatmul.msk.f32.gmra.mxu3 %vm119_vm8, %v2060_v0 }
0x11eb   :  { %v2158_v37 = vpop.permute.xlu1 %2157  ;;  %v2156_v44 = vpop.permute.xlu0 %2155 }
0x11ec   :  { %2628 = vmatpush.xpose.msk.msra.mxu0 %vm119_vm8, %v2158_v37 }
0x11ef   :  { %2629 = vmatmul.msk.f32.vlgmr.msra.gmra.mxu0 %vm119_vm8, %v2154_v31 }
0x11f5   :  { %v1901_v38 = vpop.f32.mrf.mxu3 }
0x11f6   :  { %v1902_v41 = vadd.f32 %v3548_v17, %v1901_v38 }
0x11f7   :  { %2630 = vmatmul.msk.f32.gmra.mxu0 %vm119_vm8, %v2156_v44 }
0x11f8   :  { %v1907_v33 = vsel %vm151_vm9, %v1902_v41, -inf }
0x11f9   :  { %1908 = vmax.xlane.f32.xlu0 %v1907_v33 }
0x1231   :  { %v2090_v45 = vpop.f32.mrf.mxu3 }
0x1232   :  { %v2091_v47 = vadd.f32 %v3539_v12, %v2090_v45 }
0x1234   :  { %v2096_v43 = vsel %vm151_vm9, %v2091_v47, -inf }
0x1235   :  { %2097 = vmax.xlane.f32.xlu1 %v2096_v43 }
0x1244   :  { %v1994_v49 = vpop.f32.mrf.mxu0 }
0x1245   :  { %v1995_v50 = vadd.f32 %v3539_v12, %v1994_v49 }
0x1247   :  { %v2000_v52 = vsel %vm151_vm9, %v1995_v50, -inf }
0x1248   :  { %2001 = vmax.xlane.f32.xlu2 %v2000_v52 }
0x124d   :  { %v1906_v55 = vpop.xlane.xlu1 %1905 }
0x124e   :  { %v1910_v10 = vsub.f32 %v1899_v27, %v1906_v55 }
0x1250   :  { %v1912_v11 = vmul.f32 1.442695, %v1910_v10 }
0x1252   :  { %2901 = vpow2.f32 %v1912_v11 }
0x1258   :  { %v3733_v53 = vpop.eup %2901 }
0x1259   :  { %v1916_v63 = vsel %vm151_vm9, %v3733_v53, 0.0 }
0x1261   :  { %v1997_v51 = vpop.f32.mrf.mxu0 }
0x1262   :  { %v1998_v54 = vadd.f32 %v3548_v17, %v1997_v51 }
0x1264   :  { %v2003_v56 = vsel %vm151_vm9, %v1998_v54, -inf }
0x1265   :  { %2004 = vmax.xlane.f32.xlu2 %v2003_v56 }
0x1267   :  { %v2093_v28 = vpop.f32.mrf.mxu3 }
0x1268   :  { %v2094_v4 = vadd.f32 %v3548_v17, %v2093_v28 }
0x126a   :  { %v2099_v14 = vsel %vm151_vm9, %v2094_v4, -inf }
0x126c   :  { %v1909_v57 = vpop.xlane.xlu0 %1908  ;;  %v2186_v13 = vpop.f32.mrf.mxu0 }
0x126d   :  { %v2187_v58 = vadd.f32 %v3539_v12, %v2186_v13  ;;  %2100 = vmax.xlane.f32.xlu2 %v2099_v14  ;;  %v1911_v59 = vsub.f32 %v1902_v41, %v1909_v57 }
0x126f   :  { %v2192_v60 = vsel %vm151_vm9, %v2187_v58, -inf  ;;  %v1914_v36 = vmul.f32 1.442695, %v1911_v59 }
0x1270   :  { %2193 = vmax.xlane.f32.xlu0 %v2192_v60 }
0x1271   :  { %2903 = vpow2.f32 %v1914_v36 }
0x1274   :  { %v2189_v2 = vpop.f32.mrf.mxu0 }
0x1275   :  { %v2190_v62 = vadd.f32 %v3548_v17, %v2189_v2 }
0x1277   :  { %v2195_v61 = vsel %vm151_vm9, %v2190_v62, -inf  ;;  %v3739_v12 = vpop.eup %2903 }
0x1278   :  { %2196 = vmax.xlane.f32.xlu1 %v2195_v61  ;;  %1917 = vadd.xlane.f32.xlu0 %v1916_v63  ;;  %v1919_v1 = vsel %vm151_vm9, %v3739_v12, 0.0 }
0x1280   :  { %1920 = vadd.xlane.f32.xlu0 %v1919_v1 }
0x1285   :  { %2754 = vrot.lane.b32.xlu2 %v2753_v3, %s2981_s6 }
0x128d   :  { %2764 = vrot.lane.b32.xlu2 %v2753_v3, %s2984_s9 }
0x1291   :  { %2759 = vrot.lane.b32.xlu1 %v2753_v3, %s2983_s8  ;;  %s2990_s8 = smov 128  }
0x12a8   :  { %v2098_v17 = vpop.xlane.xlu1 %2097 }
0x12a9   :  { %v2102_v5 = vsub.f32 %v2091_v47, %v2098_v17 }
0x12ab   :  { %v2104_v6 = vmul.f32 1.442695, %v2102_v5 }
0x12ad   :  { %2905 = vpow2.f32 %v2104_v6 }
0x12b3   :  { %v3748_v7 = vpop.eup %2905 }
0x12b4   :  { %v2108_v15 = vsel %vm151_vm9, %v3748_v7, 0.0 }
0x12b5   :  { %2109 = vadd.xlane.f32.xlu0 %v2108_v15 }
0x12bb   :  { %v2002_v18 = vpop.xlane.xlu2 %2001 }
0x12bc   :  { %v2006_v19 = vsub.f32 %v1995_v50, %v2002_v18 }
0x12be   :  { %v2008_v8 = vmul.f32 1.442695, %v2006_v19 }
0x12c0   :  { %2907 = vpow2.f32 %v2008_v8 }
0x12c6   :  { %v3752_v46 = vpop.eup %2907 }
0x12c7   :  { %v2012_v24 = vsel %vm151_vm9, %v3752_v46, 0.0 }
0x12c8   :  { %2013 = vadd.xlane.f32.xlu1 %v2012_v24 }
0x12d8   :  { %v2005_v9 = vpop.xlane.xlu2 %2004 }
0x12d9   :  { %v2007_v20 = vsub.f32 %v1998_v54, %v2005_v9 }
0x12db   :  { %v2010_v22 = vmul.f32 1.442695, %v2007_v20 }
0x12dd   :  { %2909 = vpow2.f32 %v2010_v22 }
0x12e0   :  { %v2101_v23 = vpop.xlane.xlu2 %2100 }
0x12e1   :  { %v2103_v25 = vsub.f32 %v2094_v4, %v2101_v23  ;;  %2769 = vrot.lane.b32.xlu1 %v2753_v3, %s2982_s7  ;;  %s2503_s7 = sshll.u32 %s3888_s2, 4  ;;  %s2504_s7 = int_to_ptr.hbm [resolvable:$true] %s2503_s7 }
0x12e3   :  { %v3757_v26 = vpop.eup %2909  ;;  %v2106_v27 = vmul.f32 1.442695, %v2103_v25  ;;  %v2194_v30 = vpop.xlane.xlu0 %2193 }
0x12e4   :  { %v2198_v32 = vsub.f32 %v2187_v58, %v2194_v30  ;;  %v2015_v0 = vsel %vm151_vm9, %v3757_v26, 0.0 }
0x12e5   :  { %2911 = vpow2.f32 %v2106_v27  ;;  %2016 = vadd.xlane.f32.xlu0 %v2015_v0 }
0x12e6   :  { %v2200_v37 = vmul.f32 1.442695, %v2198_v32 }
0x12e8   :  { %2913 = vpow2.f32 %v2200_v37  ;;  %v2755_v31 = vpop.permute.xlu2 %2754 }
0x12e9   :  { %v2756_v38 = vunpack.i.l.bf16 %v2755_v31  ;;  %2774 = vrot.lane.b32.xlu1 %v2773_v39, %s2985_s10  ;;  %v2757_v41 = vunpack.i.h.bf16 %v2755_v31 }
0x12eb   :  { %v2912_v44 = vpop.eup %2911  ;;  %1952 = vmatpush.msrb.mxu2 %v2756_v38  ;;  %v1918_v33 = vpop.xlane.xlu0 %1917 }
0x12ec   :  { %v2197_v45 = vpop.xlane.xlu1 %2196  ;;  %2915 = vrcp.f32 %v1918_v33  ;;  %v2111_v43 = vsel %vm151_vm9, %v2912_v44, 0.0 }
0x12ed   :  { %v2199_v47 = vsub.f32 %v2190_v62, %v2197_v45  ;;  %2112 = vadd.xlane.f32.xlu2 %v2111_v43  ;;  %1953 = vmatpush.msrb.mxu2 %v2757_v41 }
0x12ee   :  { %v2914_v49 = vpop.eup %2913 }
0x12ef   :  { %v2202_v50 = vmul.f32 1.442695, %v2199_v47  ;;  %v2204_v52 = vsel %vm151_vm9, %v2914_v49, 0.0 }
0x12f0   :  { %v2765_v51 = vpop.permute.xlu2 %2764  ;;  %2205 = vadd.xlane.f32.xlu0 %v2204_v52 }
0x12f1   :  { %2917 = vpow2.f32 %v2202_v50  ;;  %v2766_v34 = vunpack.i.l.bf16 %v2765_v51  ;;  %2779 = vrot.lane.b32.xlu1 %v2778_v21, %s2985_s10  ;;  %v2767_v55 = vunpack.i.h.bf16 %v2765_v51 }
0x12f2   :  { %v2916_v35 = vpop.eup %2915 }
0x12f3   :  { %v1924_v39 = vmul.f32 %v2916_v35, %v3733_v53  ;;  %2144 = vmatpush.msra.mxu2 %v2766_v34  ;;  %v1921_v54 = vpop.xlane.xlu0 %1920 }
0x12f4   :  { %2919 = vrcp.f32 %v1921_v54 }
0x12f5   :  { %2613 = vmatmul.msk.f32.vlgmr.msrb.gmra.mxu2 %vm151_vm9, %v1924_v39 }
0x12f6   :  { %2145 = vmatpush.msra.mxu2 %v2767_v55 }
0x12f7   :  { %v2918_v56 = vpop.eup %2917 }
0x12f8   :  { %v2207_v10 = vsel %vm151_vm9, %v2918_v56, 0.0 }
0x12f9   :  { %2208 = vadd.xlane.f32.xlu0 %v2207_v10  ;;  %v1241_v10 = vld [vmem:[%s3887_s1 + $0xf0] sm:$0xff] }
0x12fa   :  { %v2920_v28 = vpop.eup %2919 }
0x12fb   :  { %v1925_v4 = vmul.f32 %v2920_v28, %v3739_v12  ;;  %v1239_v28 = vld [vmem:[%s3887_s1 + $0xe0] sm:$0xff] }
0x12fd   :  { %2614 = vmatmul.msk.f32.gmra.mxu2 %vm151_vm9, %v1925_v4 }
0x1303   :  { %v2760_v40 = vpop.permute.xlu1 %2759 }
0x1304   :  { %v2761_v29 = vunpack.i.l.bf16 %v2760_v40  ;;  %v2762_v21 = vunpack.i.h.bf16 %v2760_v40 }
0x1306   :  { %2048 = vmatpush.msrb.mxu1 %v2761_v29 }
0x1308   :  { %2049 = vmatpush.msrb.mxu1 %v2762_v21  ;;  %v1250_v21 = vld [vmem:[%s3887_s1 + $0x138] sm:$0xff] }
0x1309   :  { %2408 = vmatpush.msrb.mxu0 %v1250_v21 }
0x1328   :  { %v2110_v11 = vpop.xlane.xlu0 %2109 }
0x1329   :  { %2921 = vrcp.f32 %v2110_v11  ;;  %v1249_v11 = vld [vmem:[%s3887_s1 + $0x130] sm:$0xff] }
0x132a   :  { %2409 = vmatpush.msrb.mxu0 %v1249_v11 }
0x132f   :  { %v2922_v57 = vpop.eup %2921 }
0x1330   :  { %v2116_v13 = vmul.f32 %v2922_v57, %v3748_v7  ;;  %v1248_v57 = vld [vmem:[%s3887_s1 + $0x128] sm:$0xff] }
0x1331   :  { %2410 = vmatpush.msrb.mxu0 %v1248_v57 }
0x1332   :  { %2625 = vmatmul.msk.f32.vlgmr.msra.gmra.mxu2 %vm151_vm9, %v2116_v13  ;;  %v1247_v13 = vld [vmem:[%s3887_s1 + $0x120] sm:$0xff] }
0x1333   :  { %2411 = vmatpush.msrb.mxu0 %v1247_v13 }
0x133b   :  { %v2014_v14 = vpop.xlane.xlu1 %2013 }
0x133c   :  { %2923 = vrcp.f32 %v2014_v14 }
0x1342   :  { %v2924_v58 = vpop.eup %2923 }
0x1343   :  { %v2020_v59 = vmul.f32 %v2924_v58, %v3752_v46 }
0x1345   :  { %2619 = vmatmul.msk.f32.vlgmr.msrb.gmra.mxu1 %vm151_vm9, %v2020_v59  ;;  %v1246_v59 = vld [vmem:[%s3887_s1 + $0x118] sm:$0xff] }
0x1346   :  { %2412 = vmatpush.msrb.mxu0 %v1246_v59 }
0x1353   :  { %v2770_v60 = vpop.permute.xlu1 %2769 }
0x1354   :  { %v2771_v36 = vunpack.i.l.bf16 %v2770_v60  ;;  %v2772_v53 = vunpack.i.h.bf16 %v2770_v60 }
0x1356   :  { %2240 = vmatpush.msra.mxu1 %v2771_v36 }
0x1358   :  { %2241 = vmatpush.msra.mxu1 %v2772_v53  ;;  %v2017_v2 = vpop.xlane.xlu0 %2016 }
0x1359   :  { %2925 = vrcp.f32 %v2017_v2  ;;  %v1245_v2 = vld [vmem:[%s3887_s1 + $0x110] sm:$0xff] }
0x135a   :  { %2413 = vmatpush.msrb.mxu0 %v1245_v2 }
0x135b   :  { %v2775_v24 = vpop.permute.xlu1 %2774 }
0x135c   :  { %v2777_v9 = vunpack.i.h.bf16 %v2775_v24  ;;  %v2776_v20 = vunpack.i.l.bf16 %v2775_v24 }
0x135e   :  { %2313 = vmatpush.msrb.mxu3 %v2776_v20 }
0x135f   :  { %v2926_v62 = vpop.eup %2925 }
0x1360   :  { %v2113_v61 = vpop.xlane.xlu2 %2112  ;;  %v2021_v63 = vmul.f32 %v2926_v62, %v3757_v26  ;;  %2314 = vmatpush.msrb.mxu3 %v2777_v9 }
0x1361   :  { %2927 = vrcp.f32 %v2113_v61 }
0x1362   :  { %2620 = vmatmul.msk.f32.gmra.mxu1 %vm151_vm9, %v2021_v63 }
0x1363   :  { %v2206_v12 = vpop.xlane.xlu0 %2205  ;;  %v2780_v22 = vpop.permute.xlu1 %2779 }
0x1364   :  { %2929 = vrcp.f32 %v2206_v12  ;;  %v2782_v23 = vunpack.i.h.bf16 %v2780_v22  ;;  %v2781_v25 = vunpack.i.l.bf16 %v2780_v22  ;;  %v1244_v22 = vld [vmem:[%s3887_s1 + $0x108] sm:$0xff] }
0x1365   :  { %2414 = vmatpush.msrb.mxu0 %v1244_v22 }
0x1366   :  { %2315 = vmatpush.msrb.mxu3 %v2781_v25 }
0x1367   :  { %v2928_v1 = vpop.eup %2927 }
0x1368   :  { %v2117_v3 = vmul.f32 %v2928_v1, %v2912_v44  ;;  %2316 = vmatpush.msrb.mxu3 %v2782_v23  ;;  %v1243_v23 = vld [vmem:[%s3887_s1 + $0x100] sm:$0xff] }
0x1369   :  { %2415 = vmatpush.msrb.mxu0 %v1243_v23 }
0x136a   :  { %v2930_v17 = vpop.eup %2929  ;;  %2626 = vmatmul.msk.f32.gmra.mxu2 %vm151_vm9, %v2117_v3  ;;  %v3846_v3 = vld [vmem:[%s3887_s1 + $0x160] sm:$0xff] }
0x136b   :  { %v2212_v5 = vmul.f32 %v2930_v17, %v2914_v49  ;;  %v2360_v17 = vperm.slane %v3846_v3, 5 }
0x136c   :  { %v2209_v6 = vpop.xlane.xlu0 %2208 }
0x136d   :  { %2931 = vrcp.f32 %v2209_v6  ;;  %2631 = vmatmul.msk.f32.vlgmr.msra.gmra.mxu1 %vm151_vm9, %v2212_v5 }
0x1373   :  { %v2932_v7 = vpop.eup %2931 }
0x1374   :  { %v2213_v15 = vmul.f32 %v2932_v7, %v2918_v56 }
0x1376   :  { %2632 = vmatmul.msk.f32.gmra.mxu1 %vm151_vm9, %v2213_v15 }
0x1378   :  { %v1955_v18 = vpop.f32.mrf.mxu2 }
0x1380   :  { %v1958_v19 = vpop.f32.mrf.mxu2 }
0x13b5   :  { %v2147_v8 = vpop.f32.mrf.mxu2 }
0x13b6   :  { %2259 = vrot.lane.b32.xlu1 %v2147_v8, %s2987_s12 }
0x13c2   :  { %v2051_v46 = vpop.f32.mrf.mxu1 }
0x13c3   :  { %2251 = vrot.lane.b32.xlu0 %v2051_v46, %s2986_s11 }
0x13df   :  { %v2054_v26 = vpop.f32.mrf.mxu1 }
0x13e0   :  { %2253 = vrot.lane.b32.xlu1 %v2054_v26, %s2986_s11 }
0x13ea   :  { %v2243_v27 = vpop.f32.mrf.mxu1 }
0x13eb   :  { %2267 = vrot.lane.b32.xlu0 %v2243_v27, %s2988_s13 }
0x13ed   :  { %v2150_v30 = vpop.f32.mrf.mxu2 }
0x13f3   :  { %v2246_v32 = vpop.f32.mrf.mxu1  ;;  %2261 = vrot.lane.b32.xlu0 %v2150_v30, %s2987_s12 }
0x13f4   :  { %2269 = vrot.lane.b32.xlu2 %v2246_v32, %s2988_s13 }
0x1428   :  { %v2260_v37 = vpop.permute.xlu1 %2259 }
0x1435   :  { %v2252_v0 = vpop.permute.xlu0 %2251 }
0x1436   :  { %v2273_v31 = vsel %vm119_vm8, %v1955_v18, %v2252_v0 }
0x1437   :  { %v2275_v38 = vsel %vm151_vm9, %v2273_v31, %v2260_v37 }
0x144e   :  { %v2270_v43 = vpop.permute.xlu2 %2269 }
0x1452   :  { %v2254_v33 = vpop.permute.xlu1 %2253 }
0x1453   :  { %v2274_v45 = vsel %vm119_vm8, %v1958_v19, %v2254_v33 }
0x145d   :  { %v2268_v44 = vpop.permute.xlu0 %2267 }
0x145e   :  { %v2277_v41 = vsel %vm525_vm10, %v2275_v38, %v2268_v44 }
0x145f   :  { %2633 = vmatmul.msk.f32.vlgmr.msrb.gmra.mxu3 %vm41_vm0, %v2277_v41 }
0x1465   :  { %v2262_v47 = vpop.permute.xlu0 %2261 }
0x1466   :  { %v2276_v49 = vsel %vm151_vm9, %v2274_v45, %v2262_v47  ;;  %v2465_v45 = vld [vmem:[%s3887_s1 + $0x158] sm:$0xff]  ;;  %v2464_v47 = vld [vmem:[%s3887_s1 + $0x150] sm:$0xff] }
0x1467   :  { %v2278_v50 = vsel %vm525_vm10, %v2276_v49, %v2270_v43  ;;  %2484 = vmatpush.msrb.mxu1 %v2465_v45  ;;  %v2463_v43 = vld [vmem:[%s3887_s1 + $0x148] sm:$0xff]  ;;  %v2462_v49 = vld [vmem:[%s3887_s1 + $0x140] sm:$0xff] }
0x1468   :  { %2634 = vmatmul.msk.f32.gmra.mxu3 %vm41_vm0, %v2278_v50 }
0x1469   :  { %2485 = vmatpush.msrb.mxu1 %v2464_v47 }
0x146b   :  { %2486 = vmatpush.msrb.mxu1 %v2463_v43 }
0x146d   :  { %2487 = vmatpush.msrb.mxu1 %v2462_v49 }
0x14e2   :  { %v2318_v52 = vpop.f32.mrf.mxu3 }
0x14e3   :  { %v3800_v51 = vadd.f32 %v2318_v52, %v3638_v42  ;;  %v1242_v42 = vld [vmem:[%s3887_s1 + $0xf8] sm:$0xff] }
0x14e4   :  { %2381 = vmatpush.msrb.mxu2 %v1242_v42 }
0x14e5   :  { %v2326_v34 = vmul.f32 %v3800_v51, %v3800_v51 }
0x14e6   :  { %2382 = vmatpush.msrb.mxu2 %v1241_v10 }
0x14e7   :  { %v2328_v35 = vsel %vm41_vm0, %v2326_v34, 0.0 }
0x14e8   :  { %2329 = vadd.xlane.f32.xlu1 %v2328_v35 }
0x14eb   :  { %v2321_v39 = vpop.f32.mrf.mxu3 }
0x14ec   :  { %v3806_v54 = vadd.f32 %v2321_v39, %v3665_v48  ;;  %v1240_v48 = vld [vmem:[%s3887_s1 + $0xe8] sm:$0xff]  ;;  %s2989_s1 = smov [#allocation2]  }
0x14ed   :  { %2383 = vmatpush.msrb.mxu2 %v1240_v48  ;;  %s2501_s28 = sshll.u32 %s2989_s1, 4  ;;  %s2502_s28 = int_to_ptr.vmem [resolvable:$true] %s2501_s28 }
0x14ee   :  { %v2327_v55 = vmul.f32 %v3806_v54, %v3806_v54 }
0x14ef   :  { %2384 = vmatpush.msrb.mxu2 %v1239_v28 }
0x14f0   :  { %v2331_v56 = vsel %vm41_vm0, %v2327_v55, 0.0 }
0x14f1   :  { %2332 = vadd.xlane.f32.xlu0 %v2331_v56 }
0x155b   :  { %v2330_v4 = vpop.xlane.xlu1 %2329 }
0x155c   :  { %v2334_v40 = vmul.f32 %v2330_v4, %v3050_v16  ;;  %v2459_v4 = vperm.slane %v3846_v3, 6 }
0x155e   :  { %v2336_v29 = vadd.f32 1e-06, %v2334_v40 }
0x1560   :  { %2933 = vrsqrt.f32 %v2336_v29  ;;  %vm2344_vm9 = vweird.f32 %v2336_v29 }
0x1564   :  { %v2333_v14 = vpop.xlane.xlu0 %2332 }
0x1565   :  { %v2335_v58 = vmul.f32 %v2333_v14, %v3050_v16 }
0x1566   :  { %v2934_v60 = vpop.eup %2933 }
0x1567   :  { %v2339_v36 = vmul.f32 %v2934_v60, %v2336_v29  ;;  %v2337_v53 = vadd.f32 1e-06, %v2335_v58  ;;  %vm2345_vm8 = vweird.f32 %v2934_v60 }
0x1568   :  { %vm2346_vm10 = vmor %vm2344_vm9, %vm2345_vm8 }
0x1569   :  { %v2340_v62 = vmul.f32 %v2934_v60, %v2339_v36  ;;  %2935 = vrsqrt.f32 %v2337_v53  ;;  %vm2354_vm14 = vweird.f32 %v2337_v53 }
0x156b   :  { %v2341_v61 = vmul.f32 0.5, %v2340_v62 }
0x156d   :  { %v2342_v63 = vsub.f32 1.5, %v2341_v61 }
0x156f   :  { %v2936_v12 = vpop.eup %2935  ;;  %v2343_v1 = vmul.f32 %v2934_v60, %v2342_v63 }
0x1570   :  { %v2349_v5 = vmul.f32 %v2936_v12, %v2337_v53  ;;  %vm2355_vm13 = vweird.f32 %v2936_v12 }
0x1571   :  { %v2347_v6 = vsel %vm2346_vm10, %v2934_v60, %v2343_v1  ;;  %vm2356_vm15 = vmor %vm2354_vm14, %vm2355_vm13 }
0x1572   :  { %v2358_v7 = vmul.f32 %v2347_v6, %v3800_v51  ;;  %v2350_v15 = vmul.f32 %v2936_v12, %v2349_v5 }
0x1574   :  { %v2361_v18 = vmul.f32 %v2360_v17, %v2358_v7  ;;  %v2351_v19 = vmul.f32 0.5, %v2350_v15 }
0x1576   :  { %v2352_v8 = vsub.f32 1.5, %v2351_v19  ;;  %2635 = vmatmul.msk.f32.vlgmr.msrb.gmra.mxu2 %vm41_vm0, %v2361_v18 }
0x1578   :  { %v2353_v46 = vmul.f32 %v2936_v12, %v2352_v8 }
0x157a   :  { %v2357_v24 = vsel %vm2356_vm15, %v2936_v12, %v2353_v46 }
0x157b   :  { %v2359_v9 = vmul.f32 %v2357_v24, %v3806_v54 }
0x157d   :  { %v2362_v20 = vmul.f32 %v2360_v17, %v2359_v9 }
0x157f   :  { %2636 = vmatmul.msk.f32.gmra.mxu2 %vm41_vm0, %v2362_v20 }
0x15f9   :  { %v2386_v25 = vpop.f32.mrf.mxu2 }
0x15fa   :  { %v2392_v26 = vmax.f32 %v2386_v25, 0.0 }
0x15fc   :  { %2637 = vmatmul.msk.f32.vlgmr.msrb.gmra.mxu0 %vm1199_vm11, %v2392_v26 }
0x1602   :  { %v2389_v27 = vpop.f32.mrf.mxu2 }
0x1603   :  { %v2393_v30 = vmax.f32 %v2389_v27, 0.0 }
0x1605   :  { %2638 = vmatmul.msk.f32.gmra.mxu0 %vm1199_vm11, %v2393_v30 }
0x1679   :  { %v2417_v32 = vpop.f32.mrf.mxu0 }
0x167a   :  { %v2423_v0 = vadd.f32 %v2417_v32, %v3800_v51 }
0x167c   :  { %v2425_v37 = vmul.f32 %v2423_v0, %v2423_v0 }
0x167e   :  { %v2427_v31 = vsel %vm41_vm0, %v2425_v37, 0.0 }
0x167f   :  { %2428 = vadd.xlane.f32.xlu2 %v2427_v31 }
0x1682   :  { %v2420_v38 = vpop.f32.mrf.mxu0 }
0x1683   :  { %v2424_v44 = vadd.f32 %v2420_v38, %v3806_v54 }
0x1685   :  { %v2426_v41 = vmul.f32 %v2424_v44, %v2424_v44 }
0x1687   :  { %v2430_v33 = vsel %vm41_vm0, %v2426_v41, 0.0 }
0x1688   :  { %2431 = vadd.xlane.f32.xlu1 %v2430_v33 }
0x16f2   :  { %v2429_v50 = vpop.xlane.xlu2 %2428 }
0x16f3   :  { %v2433_v52 = vmul.f32 %v2429_v50, %v3050_v16 }
0x16f5   :  { %v2435_v51 = vadd.f32 1e-06, %v2433_v52 }
0x16f7   :  { %2937 = vrsqrt.f32 %v2435_v51  ;;  %vm2443_vm1 = vweird.f32 %v2435_v51 }
0x16fb   :  { %v2432_v34 = vpop.xlane.xlu1 %2431 }
0x16fc   :  { %v2434_v35 = vmul.f32 %v2432_v34, %v3050_v16 }
0x16fd   :  { %v2938_v39 = vpop.eup %2937 }
0x16fe   :  { %v2438_v54 = vmul.f32 %v2938_v39, %v2435_v51  ;;  %v2436_v55 = vadd.f32 1e-06, %v2434_v35  ;;  %vm2444_vm11 = vweird.f32 %v2938_v39 }
0x16ff   :  { %vm2445_vm2 = vmor %vm2443_vm1, %vm2444_vm11 }
0x1700   :  { %v2439_v56 = vmul.f32 %v2938_v39, %v2438_v54  ;;  %2939 = vrsqrt.f32 %v2436_v55  ;;  %vm2453_vm4 = vweird.f32 %v2436_v55 }
0x1702   :  { %v2440_v42 = vmul.f32 0.5, %v2439_v56 }
0x1704   :  { %v2441_v10 = vsub.f32 1.5, %v2440_v42 }
0x1706   :  { %v2940_v48 = vpop.eup %2939  ;;  %v2442_v28 = vmul.f32 %v2938_v39, %v2441_v10 }
0x1707   :  { %v2448_v40 = vmul.f32 %v2940_v48, %v2436_v55  ;;  %vm2454_vm3 = vweird.f32 %v2940_v48 }
0x1708   :  { %v2446_v29 = vsel %vm2445_vm2, %v2938_v39, %v2442_v28  ;;  %vm2455_vm5 = vmor %vm2453_vm4, %vm2454_vm3 }
0x1709   :  { %v2457_v21 = vmul.f32 %v2446_v29, %v2423_v0  ;;  %v2449_v11 = vmul.f32 %v2940_v48, %v2448_v40 }
0x170b   :  { %v2460_v57 = vmul.f32 %v2459_v4, %v2457_v21  ;;  %v2450_v16 = vmul.f32 0.5, %v2449_v11 }
0x170d   :  { %v2451_v13 = vsub.f32 1.5, %v2450_v16  ;;  %2639 = vmatmul.msk.f32.vlgmr.msrb.gmra.mxu1 %vm41_vm0, %v2460_v57 }
0x170f   :  { %v2452_v14 = vmul.f32 %v2940_v48, %v2451_v13 }
0x1711   :  { %v2456_v58 = vsel %vm2455_vm5, %v2940_v48, %v2452_v14 }
0x1712   :  { %v2458_v59 = vmul.f32 %v2456_v58, %v2424_v44 }
0x1714   :  { %v2461_v60 = vmul.f32 %v2459_v4, %v2458_v59 }
0x1716   :  { %2640 = vmatmul.msk.f32.gmra.mxu1 %vm41_vm0, %v2461_v60 }
0x178a   :  { %v2489_v36 = vpop.f32.mrf.mxu1 }
0x178b   :  { %2495 = vst [vmem:[#allocation2] sm:$0xff] %v2489_v36 }
0x1793   :  { %v2492_v53 = vpop.f32.mrf.mxu1 }
0x1794   :  { %2496 = vst [vmem:[#allocation2 + $0x8] sm:$0xff] %v2492_v53 }
0x1795   :  { %2509 = dma.vmem_to_hbm [thread:$0]  %s2502_s28, 256, %s2504_s7, [#allocation3], %s2990_s8, %s2990_s8, %s2986_s11  }
0x1796   :  { %2971 = dma.done.wait [#allocation3], 256  }
0x1797   :  { %2972 = vsyncadd [#allocation3], 4294967040 }
0x1798   :  { %2514 = vsyncpa [#allocation3], 1 }

</bundles_post_ra>
